<compile_context>
chip_gen: v6e
topology: v6e:2x2x1
jax: 0.10.0
libtpu: 0.0.40
codegen_flags: <defaults>
</compile_context>

<pallas_src>
import jax
import jax.numpy as jnp
from jax.experimental import pallas as pl
from jax.experimental.pallas import tpu as pltpu


def _round_up(x, m):
    return (x + m - 1) // m * m


def _im2col_3x3(a, H, W, C):
    """(H+2, W+2, C) zero-padded tile -> (H*W, 9*C) im2col patch matrix."""
    cols = [a[dy:dy + H, dx:dx + W, :].reshape(H * W, C)
            for dy in range(3) for dx in range(3)]
    return jnp.concatenate(cols, axis=1)


def _resblk_kernel(x_ref, w1_ref, w2_ref, ws_ref,
                   s1_ref, b1_ref, s2_ref, b2_ref, ss_ref, bs_ref,
                   o_ref, h_ref):
    # x_ref : (1, H+2, W+2, Cp_in)   zero-padded input tile, bf16, lane-padded
    # w1_ref: (9*Cp_in,  Cp_out)     conv1 weights, im2col-flattened, bf16
    # w2_ref: (9*Cp_out, Cp_out)     conv2 weights, im2col-flattened, bf16
    # ws_ref: (Cp_in,    Cp_out)     1x1 shortcut conv weights, bf16
    # s*/b*_ref: (1, Cp_out)         folded BN scale / bias (f32)
    # o_ref : (1, H, W, Cp_out)      block output (f32, lane-dense)
    # h_ref : (H+2, W+2, Cp_out)     VMEM scratch: stage-1 activation + halo
    H, W = o_ref.shape[1], o_ref.shape[2]
    Cp_in = x_ref.shape[3]
    Cp_out = o_ref.shape[3]

    x = x_ref[0]                                          # (H+2, W+2, Cp_in)

    # ---- conv1: one im2col dot, K = 9*Cp_in (single MXU pass) ----
    patch = _im2col_3x3(x, H, W, Cp_in)                   # (H*W, 9*Cp_in) bf16
    y1 = jnp.dot(patch, w1_ref[...], preferred_element_type=jnp.float32)
    y1 = y1 * s1_ref[0] + b1_ref[0]                       # folded BN1 (f32)
    y1 = jnp.maximum(y1, 0.0)                             # ReLU

    # ---- keep stage-1 output in VMEM with a zero halo (conv2 zero pad=1) ----
    # Full zero each step (cheap, ~80 KB bulk store) so the halo is always
    # valid regardless of how the "parallel" grid axis is split across cores.
    h_ref[...] = jnp.zeros_like(h_ref)
    h_ref[pl.ds(1, H), pl.ds(1, W), :] = (
        y1.reshape(H, W, Cp_out).astype(h_ref.dtype))
    h = h_ref[...]                                        # (H+2, W+2, Cp_out)

    # ---- conv2: one im2col dot, K = 9*Cp_out ----
    patch2 = _im2col_3x3(h, H, W, Cp_out)                 # (H*W, 9*Cp_out)
    y2 = jnp.dot(patch2, w2_ref[...], preferred_element_type=jnp.float32)
    y2 = y2 * s2_ref[0] + b2_ref[0]                       # folded BN2, no ReLU

    # ---- shortcut: 1x1 conv + BN on the original (un-padded) input ----
    xc = x[1:1 + H, 1:1 + W, :].reshape(H * W, Cp_in)
    ysc = jnp.dot(xc, ws_ref[...], preferred_element_type=jnp.float32)
    ysc = ysc * ss_ref[0] + bs_ref[0]

    out = ysc + y2                                        # residual add
    o_ref[0] = out.reshape(H, W, Cp_out).astype(o_ref.dtype)


def _resblk_impl(x_nchw, params):
    """ResBlk forward (eval). x_nchw: (N, ch_in, H, W) -> (N, ch_out, H, W)."""
    N, Cin, H, W = x_nchw.shape
    Cout = params["w1"].shape[3]
    Cp_in = _round_up(Cin, 128)
    Cp_out = _round_up(Cout, 128)

    # Interface glue (a real model would stay NHWC / lane-padded end-to-end):
    # NCHW -> NHWC, bf16 matmul operands, zero spatial halo + lane-pad channels.
    x = jnp.transpose(x_nchw, (0, 2, 3, 1)).astype(jnp.bfloat16)
    x_pad = jnp.pad(x, ((0, 0), (1, 1), (1, 1), (0, Cp_in - Cin)))

    def pad_w(w, ci, co):  # HWIO -> zero-pad channels -> (kh*kw*ci, co) bf16
        wp = jnp.pad(w, ((0, 0), (0, 0),
                         (0, ci - w.shape[2]), (0, co - w.shape[3])))
        return wp.reshape(w.shape[0] * w.shape[1] * ci, co).astype(jnp.bfloat16)

    def pad_v(v):
        return jnp.pad(v, (0, Cp_out - v.shape[0])).reshape(1, Cp_out) \
                  .astype(jnp.float32)

    w1f = pad_w(params["w1"], Cp_in, Cp_out)      # (9*Cp_in,  Cp_out)
    w2f = pad_w(params["w2"], Cp_out, Cp_out)     # (9*Cp_out, Cp_out)
    wsf = pad_w(params["ws"], Cp_in, Cp_out)      # (Cp_in,    Cp_out)
    s1, b1 = pad_v(params["scale1"]), pad_v(params["bias1"])
    s2, b2 = pad_v(params["scale2"]), pad_v(params["bias2"])
    ss, bs = pad_v(params["scale_s"]), pad_v(params["bias_s"])

    out = pl.pallas_call(
        _resblk_kernel,
        out_shape=jax.ShapeDtypeStruct((N, H, W, Cp_out), jnp.float32),
        grid_spec=pltpu.PrefetchScalarGridSpec(
            num_scalar_prefetch=0,
            grid=(N,),
            in_specs=[
                pl.BlockSpec((1, H + 2, W + 2, Cp_in), lambda n: (n, 0, 0, 0)),
                pl.BlockSpec((9 * Cp_in, Cp_out), lambda n: (0, 0)),
                pl.BlockSpec((9 * Cp_out, Cp_out), lambda n: (0, 0)),
                pl.BlockSpec((Cp_in, Cp_out), lambda n: (0, 0)),
                pl.BlockSpec((1, Cp_out), lambda n: (0, 0)),
                pl.BlockSpec((1, Cp_out), lambda n: (0, 0)),
                pl.BlockSpec((1, Cp_out), lambda n: (0, 0)),
                pl.BlockSpec((1, Cp_out), lambda n: (0, 0)),
                pl.BlockSpec((1, Cp_out), lambda n: (0, 0)),
                pl.BlockSpec((1, Cp_out), lambda n: (0, 0)),
            ],
            out_specs=pl.BlockSpec((1, H, W, Cp_out), lambda n: (n, 0, 0, 0)),
            scratch_shapes=[pltpu.VMEM((H + 2, W + 2, Cp_out), jnp.bfloat16)],
        ),
        compiler_params=pltpu.CompilerParams(
            dimension_semantics=("parallel",)),
    )(x_pad, w1f, w2f, wsf, s1, b1, s2, b2, ss, bs)

    # Drop channel padding; NHWC -> NCHW to match the PyTorch interface.
    return jnp.transpose(out[..., :Cout], (0, 3, 1, 2))


# One fused XLA program: layout glue + pallas_call, no eager op-by-op dispatch.
resblk = jax.jit(_resblk_impl)


def init_params(key, ch_in, ch_out):
    """Random ResBlk params with conv-bias + BN running stats folded."""
    ks = jax.random.split(key, 18)
    eps = 1e-5

    def fold_bn(conv_bias, gamma, beta, mean, var):
        scale = gamma / jnp.sqrt(var + eps)
        bias = beta + scale * (conv_bias - mean)
        return scale, bias

    w1 = 0.1 * jax.random.normal(ks[0], (3, 3, ch_in, ch_out), jnp.float32)
    cb1 = 0.1 * jax.random.normal(ks[1], (ch_out,), jnp.float32)
    g1 = 1.0 + 0.1 * jax.random.normal(ks[2], (ch_out,), jnp.float32)
    be1 = 0.1 * jax.random.normal(ks[3], (ch_out,), jnp.float32)
    m1 = 0.05 * jax.random.normal(ks[4], (ch_out,), jnp.float32)
    v1 = jnp.abs(1.0 + 0.1 * jax.random.normal(ks[5], (ch_out,), jnp.float32))

    w2 = 0.1 * jax.random.normal(ks[6], (3, 3, ch_out, ch_out), jnp.float32)
    cb2 = 0.1 * jax.random.normal(ks[7], (ch_out,), jnp.float32)
    g2 = 1.0 + 0.1 * jax.random.normal(ks[8], (ch_out,), jnp.float32)
    be2 = 0.1 * jax.random.normal(ks[9], (ch_out,), jnp.float32)
    m2 = 0.05 * jax.random.normal(ks[10], (ch_out,), jnp.float32)
    v2 = jnp.abs(1.0 + 0.1 * jax.random.normal(ks[11], (ch_out,), jnp.float32))

    s1, b1 = fold_bn(cb1, g1, be1, m1, v1)
    s2, b2 = fold_bn(cb2, g2, be2, m2, v2)

    if ch_in != ch_out:
        ws = 0.1 * jax.random.normal(ks[12], (1, 1, ch_in, ch_out), jnp.float32)
        cbs = 0.1 * jax.random.normal(ks[13], (ch_out,), jnp.float32)
        gs = 1.0 + 0.1 * jax.random.normal(ks[14], (ch_out,), jnp.float32)
        bes = 0.1 * jax.random.normal(ks[15], (ch_out,), jnp.float32)
        ms = 0.05 * jax.random.normal(ks[16], (ch_out,), jnp.float32)
        vs = jnp.abs(1.0 + 0.1 * jax.random.normal(ks[17], (ch_out,), jnp.float32))
        ss, bs = fold_bn(cbs, gs, bes, ms, vs)
    else:
        # nn.Sequential() identity shortcut expressed as an identity 1x1 conv.
        ws = jnp.eye(ch_in, dtype=jnp.float32).reshape(1, 1, ch_in, ch_out)
        ss = jnp.ones((ch_out,), jnp.float32)
        bs = jnp.zeros((ch_out,), jnp.float32)

    return {"w1": w1, "scale1": s1, "bias1": b1,
            "w2": w2, "scale2": s2, "bias2": b2,
            "ws": ws, "scale_s": ss, "bias_s": bs}


def _reference(x_nchw, p):
    """Pure-JAX (lax conv) reference, mirroring the kernel's bf16 matmul inputs."""
    xb = x_nchw.astype(jnp.bfloat16)

    def conv3(x, w):
        return jax.lax.conv_general_dilated(
            x, w.astype(jnp.bfloat16), window_strides=(1, 1),
            padding=((1, 1), (1, 1)),
            dimension_numbers=("NCHW", "HWIO", "NCHW"),
            preferred_element_type=jnp.float32)

    def affine(y, s, b):
        return y * s[None, :, None, None] + b[None, :, None, None]

    y1 = jnp.maximum(affine(conv3(xb, p["w1"]), p["scale1"], p["bias1"]), 0.0)
    y2 = affine(conv3(y1.astype(jnp.bfloat16), p["w2"]), p["scale2"], p["bias2"])

    ysc = jax.lax.conv_general_dilated(
        xb, p["ws"].astype(jnp.bfloat16), window_strides=(1, 1), padding="VALID",
        dimension_numbers=("NCHW", "HWIO", "NCHW"),
        preferred_element_type=jnp.float32)
    ysc = affine(ysc, p["scale_s"], p["bias_s"])
    return ysc + y2


if __name__ == "__main__":
    key = jax.random.PRNGKey(0)
    k_x, k_p = jax.random.split(key)

    N, Cin, Cout, H, W = 2, 4, 8, 16, 16
    x = jax.random.normal(k_x, (N, Cin, H, W), jnp.float32)
    params = init_params(k_p, Cin, Cout)

    out = jax.block_until_ready(resblk(x, params))
    ref = _reference(x, params)

    assert out.shape == (N, Cout, H, W)
    max_err = float(jnp.max(jnp.abs(out - ref)))
    assert jnp.allclose(out, ref, atol=1e-3, rtol=1e-3), f"mismatch: {max_err}"

    print("KERNEL_OK")
</pallas_src>

<mosaic_0001>
module attributes {stable_mosaic.version = 11 : i64} {
  func.func @_resblk_kernel(%arg0: i32, %arg1: memref<1x18x18x128xbf16, #tpu.memory_space<vmem>>, %arg2: memref<1152x128xbf16, #tpu.memory_space<vmem>>, %arg3: memref<1152x128xbf16, #tpu.memory_space<vmem>>, %arg4: memref<128x128xbf16, #tpu.memory_space<vmem>>, %arg5: memref<1x128xf32, #tpu.memory_space<vmem>>, %arg6: memref<1x128xf32, #tpu.memory_space<vmem>>, %arg7: memref<1x128xf32, #tpu.memory_space<vmem>>, %arg8: memref<1x128xf32, #tpu.memory_space<vmem>>, %arg9: memref<1x128xf32, #tpu.memory_space<vmem>>, %arg10: memref<1x128xf32, #tpu.memory_space<vmem>>, %arg11: memref<1x16x16x128xf32, #tpu.memory_space<vmem>>, %arg12: memref<18x18x128xbf16, #tpu.memory_space<vmem>>) attributes {dimension_semantics = [#tpu.dimension_semantics<parallel>], iteration_bounds = array<i64: 2>, scalar_prefetch = 0 : i64, scratch_operands = 1 : i64, tpu.core_type = #tpu.core_type<tc>, window_params = [{transform_indices = @transform_0, window_bounds = array<i64: 1, 18, 18, 128>}, {pipeline_mode = #tpu.pipeline_mode<synchronous>, transform_indices = @transform_1, window_bounds = array<i64: 1152, 128>}, {pipeline_mode = #tpu.pipeline_mode<synchronous>, transform_indices = @transform_2, window_bounds = array<i64: 1152, 128>}, {pipeline_mode = #tpu.pipeline_mode<synchronous>, transform_indices = @transform_3, window_bounds = array<i64: 128, 128>}, {pipeline_mode = #tpu.pipeline_mode<synchronous>, transform_indices = @transform_4, window_bounds = array<i64: 1, 128>}, {pipeline_mode = #tpu.pipeline_mode<synchronous>, transform_indices = @transform_5, window_bounds = array<i64: 1, 128>}, {pipeline_mode = #tpu.pipeline_mode<synchronous>, transform_indices = @transform_6, window_bounds = array<i64: 1, 128>}, {pipeline_mode = #tpu.pipeline_mode<synchronous>, transform_indices = @transform_7, window_bounds = array<i64: 1, 128>}, {pipeline_mode = #tpu.pipeline_mode<synchronous>, transform_indices = @transform_8, window_bounds = array<i64: 1, 128>}, {pipeline_mode = #tpu.pipeline_mode<synchronous>, transform_indices = @transform_9, window_bounds = array<i64: 1, 128>}, {transform_indices = @transform_10, window_bounds = array<i64: 1, 16, 16, 128>}]} {
    %c0 = arith.constant 0 : index
    %c0_0 = arith.constant 0 : index
    %c0_1 = arith.constant 0 : index
    %c0_2 = arith.constant 0 : index
    %0 = vector.load %arg1[%c0, %c0_0, %c0_1, %c0_2] : memref<1x18x18x128xbf16, #tpu.memory_space<vmem>>, vector<1x18x18x128xbf16>
    %1 = vector.shape_cast %0 : vector<1x18x18x128xbf16> to vector<18x18x128xbf16>
    %2 = vector.extract_strided_slice %1 {offsets = [0, 0, 0], sizes = [16, 16, 128], strides = [1, 1, 1]} : vector<18x18x128xbf16> to vector<16x16x128xbf16>
    %3 = vector.shape_cast %2 : vector<16x16x128xbf16> to vector<256x128xbf16>
    %4 = vector.extract_strided_slice %1 {offsets = [0, 1, 0], sizes = [16, 16, 128], strides = [1, 1, 1]} : vector<18x18x128xbf16> to vector<16x16x128xbf16>
    %5 = vector.shape_cast %4 : vector<16x16x128xbf16> to vector<256x128xbf16>
    %6 = vector.extract_strided_slice %1 {offsets = [0, 2, 0], sizes = [16, 16, 128], strides = [1, 1, 1]} : vector<18x18x128xbf16> to vector<16x16x128xbf16>
    %7 = vector.shape_cast %6 : vector<16x16x128xbf16> to vector<256x128xbf16>
    %8 = vector.extract_strided_slice %1 {offsets = [1, 0, 0], sizes = [16, 16, 128], strides = [1, 1, 1]} : vector<18x18x128xbf16> to vector<16x16x128xbf16>
    %9 = vector.shape_cast %8 : vector<16x16x128xbf16> to vector<256x128xbf16>
    %10 = vector.extract_strided_slice %1 {offsets = [1, 1, 0], sizes = [16, 16, 128], strides = [1, 1, 1]} : vector<18x18x128xbf16> to vector<16x16x128xbf16>
    %11 = vector.shape_cast %10 : vector<16x16x128xbf16> to vector<256x128xbf16>
    %12 = vector.extract_strided_slice %1 {offsets = [1, 2, 0], sizes = [16, 16, 128], strides = [1, 1, 1]} : vector<18x18x128xbf16> to vector<16x16x128xbf16>
    %13 = vector.shape_cast %12 : vector<16x16x128xbf16> to vector<256x128xbf16>
    %14 = vector.extract_strided_slice %1 {offsets = [2, 0, 0], sizes = [16, 16, 128], strides = [1, 1, 1]} : vector<18x18x128xbf16> to vector<16x16x128xbf16>
    %15 = vector.shape_cast %14 : vector<16x16x128xbf16> to vector<256x128xbf16>
    %16 = vector.extract_strided_slice %1 {offsets = [2, 1, 0], sizes = [16, 16, 128], strides = [1, 1, 1]} : vector<18x18x128xbf16> to vector<16x16x128xbf16>
    %17 = vector.shape_cast %16 : vector<16x16x128xbf16> to vector<256x128xbf16>
    %18 = vector.extract_strided_slice %1 {offsets = [2, 2, 0], sizes = [16, 16, 128], strides = [1, 1, 1]} : vector<18x18x128xbf16> to vector<16x16x128xbf16>
    %19 = vector.shape_cast %18 : vector<16x16x128xbf16> to vector<256x128xbf16>
    %20 = tpu.concatenate %3, %5, %7, %9, %11, %13, %15, %17, %19 in 1 : vector<256x128xbf16>, vector<256x128xbf16>, vector<256x128xbf16>, vector<256x128xbf16>, vector<256x128xbf16>, vector<256x128xbf16>, vector<256x128xbf16>, vector<256x128xbf16>, vector<256x128xbf16> -> vector<256x1152xbf16>
    %c0_3 = arith.constant 0 : index
    %c0_4 = arith.constant 0 : index
    %21 = vector.load %arg2[%c0_3, %c0_4] : memref<1152x128xbf16, #tpu.memory_space<vmem>>, vector<1152x128xbf16>
    %cst = arith.constant dense<0.000000e+00> : vector<256x128xf32>
    %22 = tpu.matmul %20, %21, %cst {dimension_numbers = #tpu.dot_dimension_numbers<[1], [0], [0], [1], [0, 0, 1, 1], [], []>} : vector<256x1152xbf16>, vector<1152x128xbf16>, vector<256x128xf32> -> vector<256x128xf32>
    %c0_5 = arith.constant 0 : index
    %c0_6 = arith.constant 0 : index
    %23 = vector.load %arg5[%c0_5, %c0_6] : memref<1x128xf32, #tpu.memory_space<vmem>>, vector<1x128xf32>
    %24 = vector.shape_cast %23 : vector<1x128xf32> to vector<128xf32>
    %25 = vector.shape_cast %24 : vector<128xf32> to vector<1x128xf32>
    %26 = vector.broadcast %25 : vector<1x128xf32> to vector<256x128xf32>
    %27 = arith.mulf %22, %26 : vector<256x128xf32>
    %c0_7 = arith.constant 0 : index
    %c0_8 = arith.constant 0 : index
    %28 = vector.load %arg6[%c0_7, %c0_8] : memref<1x128xf32, #tpu.memory_space<vmem>>, vector<1x128xf32>
    %29 = vector.shape_cast %28 : vector<1x128xf32> to vector<128xf32>
    %30 = vector.shape_cast %29 : vector<128xf32> to vector<1x128xf32>
    %31 = vector.broadcast %30 : vector<1x128xf32> to vector<256x128xf32>
    %32 = arith.addf %27, %31 : vector<256x128xf32>
    %cst_9 = arith.constant 0.000000e+00 : f32
    %33 = vector.broadcast %cst_9 : f32 to vector<256x128xf32>
    %34 = arith.maximumf %32, %33 : vector<256x128xf32>
    %cst_10 = arith.constant 0.000000e+00 : bf16
    %35 = vector.broadcast %cst_10 : bf16 to vector<18x18x128xbf16>
    %c0_11 = arith.constant 0 : index
    %c0_12 = arith.constant 0 : index
    %c0_13 = arith.constant 0 : index
    %36 = vector.load %arg12[%c0_11, %c0_12, %c0_13] : memref<18x18x128xbf16, #tpu.memory_space<vmem>>, vector<18x18x128xbf16>
    tpu.vector_store %arg12[%c0_11, %c0_12, %c0_13], %35 {strides = array<i32>} : memref<18x18x128xbf16, #tpu.memory_space<vmem>>, vector<18x18x128xbf16>,
    %37 = vector.shape_cast %34 : vector<256x128xf32> to vector<16x16x128xf32>
    %38 = arith.truncf %37 : vector<16x16x128xf32> to vector<16x16x128xbf16>
    %c1 = arith.constant 1 : index
    %c1_14 = arith.constant 1 : index
    %c0_15 = arith.constant 0 : index
    %39 = vector.load %arg12[%c1, %c1_14, %c0_15] : memref<18x18x128xbf16, #tpu.memory_space<vmem>>, vector<16x16x128xbf16>
    tpu.vector_store %arg12[%c1, %c1_14, %c0_15], %38 {strides = array<i32>} : memref<18x18x128xbf16, #tpu.memory_space<vmem>>, vector<16x16x128xbf16>,
    %c0_16 = arith.constant 0 : index
    %c0_17 = arith.constant 0 : index
    %c0_18 = arith.constant 0 : index
    %40 = vector.load %arg12[%c0_16, %c0_17, %c0_18] : memref<18x18x128xbf16, #tpu.memory_space<vmem>>, vector<18x18x128xbf16>
    %41 = vector.extract_strided_slice %40 {offsets = [0, 0, 0], sizes = [16, 16, 128], strides = [1, 1, 1]} : vector<18x18x128xbf16> to vector<16x16x128xbf16>
    %42 = vector.shape_cast %41 : vector<16x16x128xbf16> to vector<256x128xbf16>
    %43 = vector.extract_strided_slice %40 {offsets = [0, 1, 0], sizes = [16, 16, 128], strides = [1, 1, 1]} : vector<18x18x128xbf16> to vector<16x16x128xbf16>
    %44 = vector.shape_cast %43 : vector<16x16x128xbf16> to vector<256x128xbf16>
    %45 = vector.extract_strided_slice %40 {offsets = [0, 2, 0], sizes = [16, 16, 128], strides = [1, 1, 1]} : vector<18x18x128xbf16> to vector<16x16x128xbf16>
    %46 = vector.shape_cast %45 : vector<16x16x128xbf16> to vector<256x128xbf16>
    %47 = vector.extract_strided_slice %40 {offsets = [1, 0, 0], sizes = [16, 16, 128], strides = [1, 1, 1]} : vector<18x18x128xbf16> to vector<16x16x128xbf16>
    %48 = vector.shape_cast %47 : vector<16x16x128xbf16> to vector<256x128xbf16>
    %49 = vector.extract_strided_slice %40 {offsets = [1, 1, 0], sizes = [16, 16, 128], strides = [1, 1, 1]} : vector<18x18x128xbf16> to vector<16x16x128xbf16>
    %50 = vector.shape_cast %49 : vector<16x16x128xbf16> to vector<256x128xbf16>
    %51 = vector.extract_strided_slice %40 {offsets = [1, 2, 0], sizes = [16, 16, 128], strides = [1, 1, 1]} : vector<18x18x128xbf16> to vector<16x16x128xbf16>
    %52 = vector.shape_cast %51 : vector<16x16x128xbf16> to vector<256x128xbf16>
    %53 = vector.extract_strided_slice %40 {offsets = [2, 0, 0], sizes = [16, 16, 128], strides = [1, 1, 1]} : vector<18x18x128xbf16> to vector<16x16x128xbf16>
    %54 = vector.shape_cast %53 : vector<16x16x128xbf16> to vector<256x128xbf16>
    %55 = vector.extract_strided_slice %40 {offsets = [2, 1, 0], sizes = [16, 16, 128], strides = [1, 1, 1]} : vector<18x18x128xbf16> to vector<16x16x128xbf16>
    %56 = vector.shape_cast %55 : vector<16x16x128xbf16> to vector<256x128xbf16>
    %57 = vector.extract_strided_slice %40 {offsets = [2, 2, 0], sizes = [16, 16, 128], strides = [1, 1, 1]} : vector<18x18x128xbf16> to vector<16x16x128xbf16>
    %58 = vector.shape_cast %57 : vector<16x16x128xbf16> to vector<256x128xbf16>
    %59 = tpu.concatenate %42, %44, %46, %48, %50, %52, %54, %56, %58 in 1 : vector<256x128xbf16>, vector<256x128xbf16>, vector<256x128xbf16>, vector<256x128xbf16>, vector<256x128xbf16>, vector<256x128xbf16>, vector<256x128xbf16>, vector<256x128xbf16>, vector<256x128xbf16> -> vector<256x1152xbf16>
    %c0_19 = arith.constant 0 : index
    %c0_20 = arith.constant 0 : index
    %60 = vector.load %arg3[%c0_19, %c0_20] : memref<1152x128xbf16, #tpu.memory_space<vmem>>, vector<1152x128xbf16>
    %cst_21 = arith.constant dense<0.000000e+00> : vector<256x128xf32>
    %61 = tpu.matmul %59, %60, %cst_21 {dimension_numbers = #tpu.dot_dimension_numbers<[1], [0], [0], [1], [0, 0, 1, 1], [], []>} : vector<256x1152xbf16>, vector<1152x128xbf16>, vector<256x128xf32> -> vector<256x128xf32>
    %c0_22 = arith.constant 0 : index
    %c0_23 = arith.constant 0 : index
    %62 = vector.load %arg7[%c0_22, %c0_23] : memref<1x128xf32, #tpu.memory_space<vmem>>, vector<1x128xf32>
    %63 = vector.shape_cast %62 : vector<1x128xf32> to vector<128xf32>
    %64 = vector.shape_cast %63 : vector<128xf32> to vector<1x128xf32>
    %65 = vector.broadcast %64 : vector<1x128xf32> to vector<256x128xf32>
    %66 = arith.mulf %61, %65 : vector<256x128xf32>
    %c0_24 = arith.constant 0 : index
    %c0_25 = arith.constant 0 : index
    %67 = vector.load %arg8[%c0_24, %c0_25] : memref<1x128xf32, #tpu.memory_space<vmem>>, vector<1x128xf32>
    %68 = vector.shape_cast %67 : vector<1x128xf32> to vector<128xf32>
    %69 = vector.shape_cast %68 : vector<128xf32> to vector<1x128xf32>
    %70 = vector.broadcast %69 : vector<1x128xf32> to vector<256x128xf32>
    %71 = arith.addf %66, %70 : vector<256x128xf32>
    %72 = vector.extract_strided_slice %1 {offsets = [1, 1, 0], sizes = [16, 16, 128], strides = [1, 1, 1]} : vector<18x18x128xbf16> to vector<16x16x128xbf16>
    %73 = vector.shape_cast %72 : vector<16x16x128xbf16> to vector<256x128xbf16>
    %c0_26 = arith.constant 0 : index
    %c0_27 = arith.constant 0 : index
    %74 = vector.load %arg4[%c0_26, %c0_27] : memref<128x128xbf16, #tpu.memory_space<vmem>>, vector<128x128xbf16>
    %cst_28 = arith.constant dense<0.000000e+00> : vector<256x128xf32>
    %75 = tpu.matmul %73, %74, %cst_28 {dimension_numbers = #tpu.dot_dimension_numbers<[1], [0], [0], [1], [0, 0, 1, 1], [], []>} : vector<256x128xbf16>, vector<128x128xbf16>, vector<256x128xf32> -> vector<256x128xf32>
    %c0_29 = arith.constant 0 : index
    %c0_30 = arith.constant 0 : index
    %76 = vector.load %arg9[%c0_29, %c0_30] : memref<1x128xf32, #tpu.memory_space<vmem>>, vector<1x128xf32>
    %77 = vector.shape_cast %76 : vector<1x128xf32> to vector<128xf32>
    %78 = vector.shape_cast %77 : vector<128xf32> to vector<1x128xf32>
    %79 = vector.broadcast %78 : vector<1x128xf32> to vector<256x128xf32>
    %80 = arith.mulf %75, %79 : vector<256x128xf32>
    %c0_31 = arith.constant 0 : index
    %c0_32 = arith.constant 0 : index
    %81 = vector.load %arg10[%c0_31, %c0_32] : memref<1x128xf32, #tpu.memory_space<vmem>>, vector<1x128xf32>
    %82 = vector.shape_cast %81 : vector<1x128xf32> to vector<128xf32>
    %83 = vector.shape_cast %82 : vector<128xf32> to vector<1x128xf32>
    %84 = vector.broadcast %83 : vector<1x128xf32> to vector<256x128xf32>
    %85 = arith.addf %80, %84 : vector<256x128xf32>
    %86 = arith.addf %85, %71 : vector<256x128xf32>
    %87 = vector.shape_cast %86 : vector<256x128xf32> to vector<16x16x128xf32>
    %c0_33 = arith.constant 0 : index
    %c0_34 = arith.constant 0 : index
    %c0_35 = arith.constant 0 : index
    %c0_36 = arith.constant 0 : index
    %88 = vector.load %arg11[%c0_33, %c0_34, %c0_35, %c0_36] : memref<1x16x16x128xf32, #tpu.memory_space<vmem>>, vector<1x16x16x128xf32>
    %89 = vector.shape_cast %88 : vector<1x16x16x128xf32> to vector<16x16x128xf32>
    %90 = vector.shape_cast %87 : vector<16x16x128xf32> to vector<1x16x16x128xf32>
    tpu.vector_store %arg11[%c0_33, %c0_34, %c0_35, %c0_36], %90 {strides = array<i32>} : memref<1x16x16x128xf32, #tpu.memory_space<vmem>>, vector<1x16x16x128xf32>,
    return
  }
  func.func @transform_0(%arg0: i32) -> (i32, i32, i32, i32) {
    %c0_i32 = arith.constant 0 : i32
    %c0_i32_0 = arith.constant 0 : i32
    %c0_i32_1 = arith.constant 0 : i32
    %c0_i32_2 = arith.constant 0 : i32
    return %arg0, %c0_i32, %c0_i32_0, %c0_i32_1 : i32, i32, i32, i32
  }
  func.func @transform_1(%arg0: i32) -> (i32, i32) {
    %c0_i32 = arith.constant 0 : i32
    %c0_i32_0 = arith.constant 0 : i32
    %c0_i32_1 = arith.constant 0 : i32
    return %c0_i32, %c0_i32_0 : i32, i32
  }
  func.func @transform_2(%arg0: i32) -> (i32, i32) {
    %c0_i32 = arith.constant 0 : i32
    %c0_i32_0 = arith.constant 0 : i32
    %c0_i32_1 = arith.constant 0 : i32
    return %c0_i32, %c0_i32_0 : i32, i32
  }
  func.func @transform_3(%arg0: i32) -> (i32, i32) {
    %c0_i32 = arith.constant 0 : i32
    %c0_i32_0 = arith.constant 0 : i32
    %c0_i32_1 = arith.constant 0 : i32
    return %c0_i32, %c0_i32_0 : i32, i32
  }
  func.func @transform_4(%arg0: i32) -> (i32, i32) {
    %c0_i32 = arith.constant 0 : i32
    %c0_i32_0 = arith.constant 0 : i32
    %c0_i32_1 = arith.constant 0 : i32
    return %c0_i32, %c0_i32_0 : i32, i32
  }
  func.func @transform_5(%arg0: i32) -> (i32, i32) {
    %c0_i32 = arith.constant 0 : i32
    %c0_i32_0 = arith.constant 0 : i32
    %c0_i32_1 = arith.constant 0 : i32
    return %c0_i32, %c0_i32_0 : i32, i32
  }
  func.func @transform_6(%arg0: i32) -> (i32, i32) {
    %c0_i32 = arith.constant 0 : i32
    %c0_i32_0 = arith.constant 0 : i32
    %c0_i32_1 = arith.constant 0 : i32
    return %c0_i32, %c0_i32_0 : i32, i32
  }
  func.func @transform_7(%arg0: i32) -> (i32, i32) {
    %c0_i32 = arith.constant 0 : i32
    %c0_i32_0 = arith.constant 0 : i32
    %c0_i32_1 = arith.constant 0 : i32
    return %c0_i32, %c0_i32_0 : i32, i32
  }
  func.func @transform_8(%arg0: i32) -> (i32, i32) {
    %c0_i32 = arith.constant 0 : i32
    %c0_i32_0 = arith.constant 0 : i32
    %c0_i32_1 = arith.constant 0 : i32
    return %c0_i32, %c0_i32_0 : i32, i32
  }
  func.func @transform_9(%arg0: i32) -> (i32, i32) {
    %c0_i32 = arith.constant 0 : i32
    %c0_i32_0 = arith.constant 0 : i32
    %c0_i32_1 = arith.constant 0 : i32
    return %c0_i32, %c0_i32_0 : i32, i32
  }
  func.func @transform_10(%arg0: i32) -> (i32, i32, i32, i32) {
    %c0_i32 = arith.constant 0 : i32
    %c0_i32_0 = arith.constant 0 : i32
    %c0_i32_1 = arith.constant 0 : i32
    %c0_i32_2 = arith.constant 0 : i32
    return %arg0, %c0_i32, %c0_i32_0, %c0_i32_1 : i32, i32, i32, i32
  }
}

</mosaic_0001>

<bundles_post_ra>
// kernel: _resblk_impl.1
= control target key start
LH: loop header
LB: loop body
LE: loop exit
PB: predicated region body
PF: predicated region fallthrough
CT: control target
= control target key end

     0   :  { %s7876_s13 = smov 0   ;;  %s10992_s0 = inlined_call_operand.vmem [shape: bf16[2,18,18,128], index: 0, kind: input, shape index: {}]   ;;  %s10993_s1 = inlined_call_operand.vmem [shape: bf16[1152,128], index: 1, kind: input, shape index: {}]   ;;  %s10994_s2 = inlined_call_operand.vmem [shape: bf16[1152,128], index: 2, kind: input, shape index: {}]   ;;  %s10995_s3 = inlined_call_operand.vmem [shape: bf16[128,128], index: 3, kind: input, shape index: {}]   ;;  %s10996_s4 = inlined_call_operand.vmem [shape: f32[1,128], index: 4, kind: input, shape index: {}]   ;;  %s10997_s5 = inlined_call_operand.vmem [shape: f32[1,128], index: 5, kind: input, shape index: {}]   ;;  %s10998_s6 = inlined_call_operand.vmem [shape: f32[1,128], index: 6, kind: input, shape index: {}]   ;;  %s10999_s7 = inlined_call_operand.vmem [shape: f32[1,128], index: 7, kind: input, shape index: {}]   ;;  %s11000_s8 = inlined_call_operand.vmem [shape: f32[1,128], index: 8, kind: input, shape index: {}]   ;;  %s11001_s9 = inlined_call_operand.vmem [shape: f32[1,128], index: 9, kind: input, shape index: {}]   ;;  %s11002_s10 = inlined_call_operand.vmem [shape: f32[2,16,16,128], index: 10, kind: output, shape index: {}]  }
   0x1 LB: > { %s6094_s14 = sadd.s32 4294967295, %s7818_s13   ;;  %p6098_p0 = scmp.ge.s32.totalorder %s7818_s13, 1  ;;  %s7818_s13 = sphi %s7876_s13, %s20_s13  }
   0x2   : > { %p312_p1 = scmp.lt.s32.totalorder %s7818_s13, 3 }
   0x4   : > { %p313_p2 = pnand %p6098_p0, %p312_p1 }
   0x6   : > { %316 = sbr.rel (%p313_p2) target bundleno = 1098 (0x44a), region = 60 }
   0xb   : > { %v7609_v0 = vld [vmem:[%s10993_s1 + $0x78] sm:$0xff]   ;;  %p350_p3 = scmp.lt.s32.totalorder %s6094_s14, 1  ;;  %v7611_v2 = vld [vmem:[%s10993_s1 + $0x70] sm:$0xff]   ;;  %v7613_v4 = vld [vmem:[%s10993_s1 + $0x68] sm:$0xff]   ;;  %vm415_vm0 = vsmask.f32 3328 }
   0xc   : > { %v7610_v1 = vld [vmem:[%s10993_s1 + $0x38] sm:$0xff]   ;;  %6471 = vmatprep.subr.bf16.mxu0 %v7609_v0  ;;  %7583 = vmatprep.subr.bf16.mxu1 %v7609_v0  ;;  %v7612_v3 = vld [vmem:[%s10993_s1 + $0x30] sm:$0xff]   ;;  %v7614_v5 = vld [vmem:[%s10993_s1 + $0x28] sm:$0xff]   ;;  %vm416_vm1 = vsmask.f32 7440  ;;  %v11069_v37 = vmov 0 }
   0xd   : > { %6472 = vmatpush3.bf16.msra.mxu0 %v7610_v1  ;;  %7591 = vmatpush3.bf16.msra.mxu1 %v7610_v1  ;;  %s11202_s14 = smov (!%p350_p3, %s6094_s14), 1  ;;  %v7615_v6 = vld [vmem:[%s10993_s1 + $0x60] sm:$0xff]   ;;  %v7617_v8 = vld [vmem:[%s10993_s1 + $0x58] sm:$0xff]   ;;  %v7619_v10 = vld [vmem:[%s10993_s1 + $0x50] sm:$0xff]   ;;  %vm850_vm3 = vcmask 1042432   ;;  %vm851_vm4 = vcmask 1046532  }
   0xe   : > { %6473 = vmatprep.subr.bf16.mxu0 %v7611_v2  ;;  %7584 = vmatprep.subr.bf16.mxu1 %v7611_v2  ;;  %s7599_s29 = smul.u32 216, %s11202_s14  ;;  %v7616_v7 = vld [vmem:[%s10993_s1 + $0x20] sm:$0xff]   ;;  %v7618_v9 = vld [vmem:[%s10993_s1 + $0x18] sm:$0xff]   ;;  %v7620_v16 = vld [vmem:[%s10993_s1 + $0x10] sm:$0xff]   ;;  %vm3214_vm6 = vcmask 1043456   ;;  %vm3221_vm10 = vcmask 1040384  }
   0xf   : > { %v7621_v21 = vld [vmem:[%s10993_s1 + $0x48] sm:$0xff]   ;;  %v7623_v36 = vld [vmem:[%s10993_s1 + $0x40] sm:$0xff]   ;;  %vm7962_vm2 = vmor %vm415_vm0, %vm416_vm1  ;;  %vm3215_vm7 = vsmask.f32 7938  ;;  %vm2890_vm8 = vsmask.f32 256 }
  0x10   : > { %s7917_s18 = scalar_lea.vmem %s10992_s0, %s7599_s29  ;;  %v7622_v31 = vld [vmem:[%s10993_s1 + $0x8] sm:$0xff]   ;;  %v11070_v37 = vsel %vm7962_vm2, 4294967295, %v11069_v37  ;;  %v7624_v50 = vld [vmem:[%s10993_s1] sm:$0xff]   ;;  %v7627_v57 = vld [vmem:[%s10993_s1 + $0xf8] sm:$0xff]   ;;  %vm2891_vm9 = vsmask.f32 4368 }
  0x11   : > { %6474 = vmatpush3.bf16.msra.mxu0 %v7612_v3  ;;  %7592 = vmatpush3.bf16.msra.mxu1 %v7612_v3  ;;  %v7926_v11 = vld [vmem:[%s7917_s18] sm:$0xf]  ;;  %v7929_v12 = vld [vmem:[%s7917_s18 + $0x4] sm:$0xf]  ;;  %v7932_v13 = vld [vmem:[%s7917_s18 + $0x8] sm:$0x1] }
  0x12   : > { %6475 = vmatprep.subr.bf16.mxu0 %v7613_v4  ;;  %7585 = vmatprep.subr.bf16.mxu1 %v7613_v4  ;;  %v419_v14 = vshrl.u32 %v7926_v11, 16  ;;  %v422_v15 = vshll.u32 %v7926_v11, 16  ;;  %v428_v17 = vshll.u32 %v7929_v12, 16  ;;  %v432_v18 = vshrl.u32 %v7929_v12, 16  ;;  %v7943_v20 = vld [vmem:[%s7917_s18 + $0x90] sm:$0xf]  ;;  %vm8158_vm5 = vmor %vm850_vm3, %vm851_vm4 }
  0x13   : > { %v438_v19 = vshll.u32 %v7932_v13, 16  ;;  %v6102_v24 = vrot.slane %v7926_v11, 9  ;;  %v398_v25 = vld [vmem:[%s7917_s18 + $0x94] sm:$0xf]  ;;  %v855_v28 = vrot.slane %v7929_v12, 5  ;;  %v707_v30 = vshrl.u32 %v7943_v20, 16  ;;  %vm9438_vm11 = vmand %vm3214_vm6, %vm3215_vm7 }
  0x14   : > { %v421_v22 = vrot.slane %v419_v14, 4  ;;  %v424_v23 = vrot.slane %v422_v15, 5  ;;  %v430_v26 = vrot.slane %v428_v17, 5  ;;  %v434_v27 = vrot.slane %v432_v18, 4  ;;  %v399_v29 = vld [vmem:[%s7917_s18 + $0x98] sm:$0x1]  ;;  %vm9459_vm12 = vmor %vm2890_vm8, %vm2891_vm9 }
  0x15   : > { %6476 = vmatpush3.bf16.msra.mxu0 %v7614_v5  ;;  %7593 = vmatpush3.bf16.msra.mxu1 %v7614_v5  ;;  %v440_v33 = vrot.slane %v438_v19, 5  ;;  %v710_v34 = vshll.u32 %v7943_v20, 16  ;;  %v716_v35 = vshll.u32 %v398_v25, 16  ;;  %11071 = vst [vmem:[#allocation3_spill] sm:$0xff] %v11070_v37  ;;  %v709_v39 = vrot.slane %v707_v30, 4  ;;  %v7628_v60 = vld [vmem:[%s10993_s1 + $0x178] sm:$0xff]   ;;  %vm9465_vm13 = vmand %vm3221_vm10, %vm2890_vm8 }
  0x16   : > { %6477 = vmatprep.subr.bf16.mxu0 %v7615_v6  ;;  %7586 = vmatprep.subr.bf16.mxu1 %v7615_v6  ;;  %v425_v32 = vor.u32 %v424_v23, %v421_v22  ;;  %v435_v38 = vor.u32 %v434_v27, %v430_v26  ;;  %v720_v40 = vshrl.u32 %v398_v25, 16  ;;  %v726_v41 = vshll.u32 %v399_v29, 16  ;;  %v7987_v61 = vld [vmem:[%s7917_s18 + $0xc] sm:$0xf]  ;;  %v7990_v62 = vld [vmem:[%s7917_s18 + $0x10] sm:$0xf] }
  0x17   : > { %v858_v43 = vrot.slane %v7932_v13, 5  ;;  %v712_v44 = vrot.slane %v710_v34, 5  ;;  %v718_v45 = vrot.slane %v716_v35, 5  ;;  %v7969_v47 = vrot.slane %v855_v28, 4  ;;  %v7629_v0 = vld [vmem:[%s10993_s1 + $0xb8] sm:$0xff]   ;;  %v7635_v35 = vld [vmem:[%s10993_s1 + $0xe8] sm:$0xff]  }
  0x18   : > { %v426_v42 = vrot.slane %v425_v32, 4  ;;  %v436_v46 = vrot.slane %v435_v38, 4  ;;  %v722_v48 = vrot.slane %v720_v40, 4  ;;  %v728_v49 = vrot.slane %v726_v41, 5  ;;  %v7630_v1 = vld [vmem:[%s10993_s1 + $0x138] sm:$0xff]   ;;  %s6438_s26 = sshll.u32 %s11202_s14, 8 }
  0x19   : > { %6478 = vmatpush3.bf16.msra.mxu0 %v7616_v7  ;;  %7594 = vmatpush3.bf16.msra.mxu1 %v7616_v7  ;;  %v713_v52 = vor.u32 %v712_v44, %v709_v39  ;;  %v6120_v59 = vcombine.low %v7926_v11, %v7929_v12  ;;  %v8001_v2 = vld [vmem:[%s7917_s18 + $0x14] sm:$0x1]  ;;  %v443_v3 = vshrl.u32 %v7987_v61, 16  ;;  %v446_v4 = vshll.u32 %v7987_v61, 16  ;;  %v401_v14 = vld [vmem:[%s7917_s18 + $0xa0] sm:$0xf]  ;;  %s10797_s29 = scalar_lea.vmem %s11002_s10, %s6438_s26 }
  0x1a   : > { %6479 = vmatprep.subr.bf16.mxu0 %v7617_v8  ;;  %7587 = vmatprep.subr.bf16.mxu1 %v7617_v8  ;;  %v431_v51 = vsel %vm7962_vm2, %v426_v42, %v430_v26  ;;  %v441_v53 = vsel %vm7962_vm2, %v436_v46, %v440_v33  ;;  %v723_v54 = vor.u32 %v722_v48, %v718_v45  ;;  %v452_v5 = vshll.u32 %v7990_v62, 16  ;;  %v7632_v26 = vld [vmem:[%s10993_s1 + $0xb0] sm:$0xff]   ;;  %v7660_v11 = vld [vmem:[%s10993_s1 + $0x158] sm:$0xff]  }
  0x1b   : > { %v6136_v55 = vcombine.low %v431_v51, %v441_v53  ;;  %v714_v56 = vrot.slane %v713_v52, 4  ;;  %v8009_v7 = vcombine.low %v7943_v20, %v398_v25  ;;  %v456_v8 = vshrl.u32 %v7990_v62, 16  ;;  %v7638_v44 = vld [vmem:[%s10993_s1 + $0x170] sm:$0xff]   ;;  %v7636_v51 = vld [vmem:[%s10993_s1 + $0xa8] sm:$0xff]  }
  0x1c   : > { %v724_v58 = vrot.slane %v723_v54, 4  ;;  %v445_v17 = vrot.slane %v443_v3, 4  ;;  %v448_v18 = vrot.slane %v446_v4, 5  ;;  %v454_v19 = vrot.slane %v452_v5, 5  ;;  %v7640_v54 = vld [vmem:[%s10993_s1 + $0x130] sm:$0xff]  }
  0x1d   : > { %6480 = vmatpush3.bf16.msra.mxu0 %v7618_v9  ;;  %7595 = vmatpush3.bf16.msra.mxu1 %v7618_v9  ;;  %v719_v63 = vsel %vm7962_vm2, %v714_v56, %v718_v45  ;;  %v462_v9 = vshll.u32 %v8001_v2, 16  ;;  %v458_v20 = vrot.slane %v456_v8, 4  ;;  %v740_v29 = vshll.u32 %v401_v14, 16  ;;  %v8052_v56 = vld [vmem:[%s7917_s18 + $0x1c] sm:$0xf] }
  0x1e   : > { %6481 = vmatprep.subr.bf16.mxu0 %v7619_v10  ;;  %7588 = vmatprep.subr.bf16.mxu1 %v7619_v10  ;;  %v729_v6 = vsel %vm7962_vm2, %v724_v58, %v728_v49  ;;  %v400_v10 = vld [vmem:[%s7917_s18 + $0x9c] sm:$0xf]  ;;  %v449_v27 = vor.u32 %v448_v18, %v445_v17  ;;  %v744_v30 = vshrl.u32 %v401_v14, 16  ;;  %v7637_v58 = vld [vmem:[%s10993_s1 + $0xe0] sm:$0xff]   ;;  %v480_v4 = vshrl.u32 %v8052_v56, 16 }
  0x1f   : > { %1857 = vmatprep.mubr.bf16.mxu0 %v6136_v55  ;;  %v8015_v15 = vcombine.low %v719_v63, %v729_v6  ;;  %v464_v22 = vrot.slane %v462_v9, 5  ;;  %v731_v23 = vshrl.u32 %v400_v10, 16  ;;  %v734_v25 = vshll.u32 %v400_v10, 16  ;;  %v8049_v55 = vld [vmem:[%s7917_s18 + $0x18] sm:$0xf] }
  0x20   : > { %v459_v32 = vor.u32 %v458_v20, %v454_v19  ;;  %v742_v38 = vrot.slane %v740_v29, 5  ;;  %v746_v39 = vrot.slane %v744_v30, 4  ;;  %v470_v63 = vshll.u32 %v8049_v55, 16  ;;  %v403_v6 = vld [vmem:[%s7917_s18 + $0xa8] sm:$0xf]  ;;  %v7643_v29 = vld [vmem:[%s10993_s1 + $0xd8] sm:$0xff]  }
  0x21   : > { %6482 = vmatpush3.bf16.msra.mxu0 %v7620_v16  ;;  %7596 = vmatpush3.bf16.msra.mxu1 %v7620_v16  ;;  %11072 = vst [vmem:[#allocation4_spill] sm:$0xff] %v8015_v15  ;;  %v7631_v16 = vld [vmem:[%s10993_s1 + $0xf0] sm:$0xff]   ;;  %v733_v33 = vrot.slane %v731_v23, 4  ;;  %v736_v34 = vrot.slane %v734_v25, 5  ;;  %v8068_v3 = vcombine.low %v400_v10, %v401_v14  ;;  %v404_v8 = vld [vmem:[%s7917_s18 + $0xac] sm:$0xf] }
  0x22   : > { %6483 = vmatprep.subr.bf16.mxu0 %v7621_v21  ;;  %7589 = vmatprep.subr.bf16.mxu1 %v7621_v21  ;;  %v402_v21 = vld [vmem:[%s7917_s18 + $0xa4] sm:$0x1]  ;;  %v460_v41 = vrot.slane %v459_v32, 4  ;;  %v747_v46 = vor.u32 %v746_v39, %v742_v38  ;;  %v472_v18 = vrot.slane %v470_v63, 5  ;;  %v405_v10 = vld [vmem:[%s7917_s18 + $0xb0] sm:$0x1] }
  0x23   : > { %1953 = vmatprep.mubr.bf16.mxu1 %v8015_v15  ;;  %v737_v42 = vor.u32 %v736_v34, %v733_v33  ;;  %v482_v14 = vrot.slane %v480_v4, 4  ;;  %v755_v20 = vshrl.u32 %v403_v6, 16  ;;  %v764_v25 = vshll.u32 %v404_v8, 16  ;;  %v7644_v33 = vld [vmem:[%s10993_s1 + $0x98] sm:$0xff]  }
  0x24   : > { %v465_v48 = vsel %vm7962_vm2, %v460_v41, %v464_v22  ;;  %v748_v53 = vrot.slane %v747_v46, 4  ;;  %v758_v22 = vshll.u32 %v403_v6, 16  ;;  %v8098_v46 = vcombine.low %v403_v6, %v404_v8  ;;  %v7650_v6 = vld [vmem:[%s10993_s1 + $0x168] sm:$0xff]  }
  0x25   : > { %6484 = vmatpush3.bf16.msra.mxu0 %v7622_v31  ;;  %7597 = vmatpush3.bf16.msra.mxu1 %v7622_v31  ;;  %v750_v31 = vshll.u32 %v402_v21, 16  ;;  %v738_v49 = vrot.slane %v737_v42, 4  ;;  %v862_v13 = vrot.slane %v7990_v62, 5 }
  0x26   : > { %6485 = vmatprep.subr.bf16.mxu0 %v7623_v36  ;;  %7590 = vmatprep.subr.bf16.mxu1 %v7623_v36  ;;  %v450_v36 = vrot.slane %v449_v27, 4  ;;  %v774_v27 = vshll.u32 %v405_v10, 16  ;;  %v760_v32 = vrot.slane %v758_v22, 5  ;;  %v7649_v10 = vld [vmem:[%s10993_s1 + $0xc8] sm:$0xff]   ;;  %v408_v22 = vld [vmem:[%s7917_s18 + $0xbc] sm:$0x1] }
  0x27   : > { %v752_v40 = vrot.slane %v750_v31, 5  ;;  %v757_v31 = vrot.slane %v755_v20, 4 }
  0x28   : > { %v455_v45 = vsel %vm7962_vm2, %v450_v36, %v454_v19  ;;  %v776_v41 = vrot.slane %v774_v27, 5 }
  0x29   : > { %6486 = vmatpush3.bf16.msra.mxu0 %v7624_v50  ;;  %7598 = vmatpush3.bf16.msra.mxu1 %v7624_v50  ;;  %v8038_v50 = vcombine.low %v7987_v61, %v7990_v62  ;;  %v8043_v52 = vcombine.low %v455_v45, %v465_v48  ;;  %v8096_v45 = vcombine.low %v8049_v55, %v8052_v56  ;;  %v8101_v48 = vld [vmem:[%s7917_s18 + $0x24] sm:$0xf] }
  0x2a   : > { %6583 = vmatprep.subr.bf16.mxu1 %v7627_v57  ;;  %6695 = vmatprep.subr.bf16.mxu0 %v7628_v60  ;;  %v743_v57 = vsel %vm7962_vm2, %v738_v49, %v742_v38  ;;  %v467_v60 = vshrl.u32 %v8049_v55, 16  ;;  %v7645_v38 = vld [vmem:[%s10993_s1 + $0xd0] sm:$0xff]   ;;  %v8104_v49 = vld [vmem:[%s7917_s18 + $0x28] sm:$0xf] }
  0x2b   : > { %11073 = vst [vmem:[#allocation5_spill] sm:$0xff] %v8043_v52  ;;  %11075 = vst [vmem:[#allocation7_spill] sm:$0xff] %v8096_v45  ;;  %v504_v4 = vshrl.u32 %v8104_v49, 16 }
  0x2c   : > { %1858 = vmatmul.mubr.bf16.vlgmr.msra.gmra.mxu0 %v6120_v59  ;;  %1954 = vmatmul.mubr.bf16.vlgmr.msra.gmra.mxu1 %v8009_v7  ;;  %v8060_v59 = vld [vmem:[%s7917_s18 + $0x20] sm:$0x1]  ;;  %v469_v17 = vrot.slane %v467_v60, 4  ;;  %v494_v60 = vshll.u32 %v8101_v48, 16 }
  0x2d   : > { %6584 = vmatpush3.bf16.msra.mxu1 %v7629_v0  ;;  %6696 = vmatpush3.bf16.msra.mxu0 %v7630_v1  ;;  %v476_v0 = vshll.u32 %v8052_v56, 16  ;;  %v753_v1 = vsel %vm7962_vm2, %v748_v53, %v752_v40  ;;  %v486_v5 = vshll.u32 %v8060_v59, 16  ;;  %v761_v40 = vor.u32 %v760_v32, %v757_v31 }
  0x2e   : > { %6585 = vmatprep.subr.bf16.mxu1 %v7631_v16  ;;  %6697 = vmatprep.subr.bf16.mxu0 %v7638_v44  ;;  %v8074_v9 = vcombine.low %v743_v57, %v753_v1  ;;  %v7639_v16 = vld [vmem:[%s10993_s1 + $0xa0] sm:$0xff]   ;;  %v473_v23 = vor.u32 %v472_v18, %v469_v17  ;;  %v8112_v57 = vld [vmem:[%s7917_s18 + $0x2c] sm:$0x1]  ;;  %v500_v1 = vshll.u32 %v8104_v49, 16  ;;  %v496_v17 = vrot.slane %v494_v60, 5 }
  0x2f   : > { %1865 = vmatprep.mubr.bf16.mxu0 %v8043_v52  ;;  %v478_v19 = vrot.slane %v476_v0, 5  ;;  %v488_v21 = vrot.slane %v486_v5, 5  ;;  %v762_v53 = vrot.slane %v761_v40, 4  ;;  %v8121_v5 = vld [vmem:[%s7917_s18 + $0xb4] sm:$0xf]  ;;  %v510_v18 = vshll.u32 %v8112_v57, 16 }
  0x30   : > { %11074 = vst [vmem:[#allocation6_spill] sm:$0xff] %v8074_v9  ;;  %1961 = vmatprep.mubr.bf16.mxu1 %v8074_v9  ;;  %v474_v34 = vrot.slane %v473_v23, 4  ;;  %v506_v20 = vrot.slane %v504_v4, 4  ;;  %v779_v23 = vshrl.u32 %v8121_v5, 16  ;;  %v7653_v40 = vld [vmem:[%s10993_s1 + $0xc0] sm:$0xff]  }
  0x31   : > { %6586 = vmatpush3.bf16.msra.mxu1 %v7632_v26  ;;  %6698 = vmatpush3.bf16.msra.mxu0 %v7640_v54  ;;  %v768_v26 = vshrl.u32 %v404_v8, 16  ;;  %v483_v30 = vor.u32 %v482_v14, %v478_v19  ;;  %v7646_v54 = vld [vmem:[%s10993_s1 + $0x90] sm:$0xff]  }
  0x32   : > { %6587 = vmatprep.subr.bf16.mxu1 %v7635_v35  ;;  %v766_v35 = vrot.slane %v764_v25, 5  ;;  %v479_v42 = vsel %vm7962_vm2, %v474_v34, %v478_v19  ;;  %v8130_v19 = vld [vmem:[%s7917_s18 + $0xb8] sm:$0xf]  ;;  %v7652_v25 = vld [vmem:[%s10993_s1 + $0x128] sm:$0xff]   ;;  %6699 = vmatprep.subr.bf16.mxu0 %v7650_v6  ;;  %v781_v32 = vrot.slane %v779_v23, 4 }
  0x33   : > { %v770_v36 = vrot.slane %v768_v26, 4  ;;  %v484_v39 = vrot.slane %v483_v30, 4  ;;  %v782_v30 = vshll.u32 %v8121_v5, 16  ;;  %v792_v34 = vshrl.u32 %v8130_v19, 16 }
  0x34   : > { %1866 = vmatmul.mubr.bf16.gmra.mxu0 %v8038_v50  ;;  %1962 = vmatmul.mubr.bf16.gmra.mxu1 %v8068_v3  ;;  %v767_v8 = vsel %vm7962_vm2, %v762_v53, %v766_v35  ;;  %v7656_v53 = vld [vmem:[%s10993_s1 + $0x160] sm:$0xff]  }
  0x35   : > { %6588 = vmatpush3.bf16.msra.mxu1 %v7636_v51  ;;  %v771_v44 = vor.u32 %v770_v36, %v766_v35  ;;  %v489_v51 = vsel %vm7962_vm2, %v484_v39, %v488_v21  ;;  %v502_v21 = vrot.slane %v500_v1, 5  ;;  %v7651_v35 = vld [vmem:[%s10993_s1 + $0x88] sm:$0xff]   ;;  %6700 = vmatpush3.bf16.msra.mxu0 %v7652_v25  ;;  %v798_v39 = vshll.u32 %v408_v22, 16  ;;  %v7657_v1 = vld [vmem:[%s10993_s1 + $0x120] sm:$0xff]  }
  0x36   : > { %6589 = vmatprep.subr.bf16.mxu1 %v7637_v58  ;;  %v491_v58 = vshrl.u32 %v8101_v48, 16  ;;  %v8116_v63 = vcombine.low %v479_v42, %v489_v51  ;;  %v794_v51 = vrot.slane %v792_v34, 4  ;;  %6701 = vmatprep.subr.bf16.mxu0 %v7656_v53  ;;  %v8202_v22 = vsel %vm8158_vm5, %v6102_v24, %v855_v28  ;;  %v7661_v34 = vld [vmem:[%s10993_s1 + $0x118] sm:$0xff]  }
  0x37   : > { %v772_v0 = vrot.slane %v771_v44, 4  ;;  %v507_v31 = vor.u32 %v506_v20, %v502_v21  ;;  %v800_v60 = vrot.slane %v798_v39, 5  ;;  %v8194_v20 = vld [vmem:[%s7917_s18 + $0x34] sm:$0xf]  ;;  %v8222_v28 = vcombine.low %v8121_v5, %v8130_v19 }
  0x38   : > { %11076 = vst [vmem:[#allocation8_spill] sm:$0xff] %v8116_v63  ;;  %1873 = vmatprep.mubr.bf16.mxu0 %v8116_v63  ;;  %v524_v12 = vshll.u32 %v8194_v20, 16 }
  0x39   : > { %6590 = vmatpush3.bf16.msra.mxu1 %v7639_v16  ;;  %v493_v16 = vrot.slane %v491_v58, 4  ;;  %v777_v14 = vsel %vm7962_vm2, %v772_v0, %v776_v41  ;;  %v11078_v41 = vmov 0  ;;  %v508_v42 = vrot.slane %v507_v31, 4  ;;  %v7654_v0 = vld [vmem:[%s10993_s1 + $0x80] sm:$0xff]   ;;  %6702 = vmatpush3.bf16.msra.mxu0 %v7657_v1  ;;  %v7663_v1 = vld [vmem:[%s10993_s1 + $0x150] sm:$0xff]  }
  0x3a   : > { %6591 = vmatprep.subr.bf16.mxu1 %v7643_v29  ;;  %v8143_v26 = vcombine.low %v767_v8, %v777_v14  ;;  %v512_v29 = vrot.slane %v510_v18, 5  ;;  %v11079_v41 = vsel %vm8158_vm5, 4294967295, %v11078_v41  ;;  %v8178_v8 = vcombine.low %v8101_v48, %v8104_v49  ;;  %6703 = vmatprep.subr.bf16.mxu0 %v7660_v11  ;;  %v8267_v11 = vld [vmem:[%s7917_s18 + $0x50] sm:$0x1] }
  0x3b   : > { %v497_v27 = vor.u32 %v496_v17, %v493_v16  ;;  %11080 = vst [vmem:[#allocation10_spill] sm:$0xff] %v11079_v41  ;;  %v6103_v18 = vrot.slane %v7987_v61, 9  ;;  %v7667_v61 = vld [vmem:[%s10993_s1 + $0x148] sm:$0xff]  }
  0x3c   : > { %11077 = vst [vmem:[#allocation9_spill] sm:$0xff] %v8143_v26  ;;  %1874 = vmatmul.mubr.bf16.gmra.mxu0 %v8096_v45  ;;  %1969 = vmatprep.mubr.bf16.mxu1 %v8143_v26  ;;  %v513_v4 = vsel %vm7962_vm2, %v508_v42, %v512_v29  ;;  %11081 = vst [vmem:[#allocation11_spill] sm:$0xff] %v8178_v8  ;;  %v8241_v42 = vld [vmem:[%s7917_s18 + $0x44] sm:$0x1]  ;;  %v8412_v26 = vld [vmem:[%s7917_s18 + $0x74] sm:$0x1] }
  0x3d   : > { %6592 = vmatpush3.bf16.msra.mxu1 %v7644_v33  ;;  %v788_v33 = vshll.u32 %v8130_v19, 16  ;;  %v498_v36 = vrot.slane %v497_v27, 4  ;;  %v528_v27 = vshrl.u32 %v8194_v20, 16  ;;  %6704 = vmatpush3.bf16.msra.mxu0 %v7661_v34 }
  0x3e   : > { %6593 = vmatprep.subr.bf16.mxu1 %v7645_v38  ;;  %v784_v38 = vrot.slane %v782_v30, 5  ;;  %1970 = vmatmul.mubr.bf16.gmra.mxu1 %v8098_v46 }
  0x3f   : > { %v790_v44 = vrot.slane %v788_v33, 5  ;;  %v526_v33 = vrot.slane %v524_v12, 5  ;;  %6705 = vmatprep.subr.bf16.mxu0 %v7663_v1  ;;  %v582_v1 = vshll.u32 %v8267_v11, 16 }
  0x40   : > { %v785_v58 = vor.u32 %v784_v38, %v781_v32 }
  0x41   : > { %6594 = vmatpush3.bf16.msra.mxu1 %v7646_v54  ;;  %v503_v54 = vsel %vm7962_vm2, %v498_v36, %v502_v21  ;;  %v795_v6 = vor.u32 %v794_v51, %v790_v44  ;;  %v8191_v21 = vld [vmem:[%s7917_s18 + $0x30] sm:$0xf]  ;;  %v8232_v36 = vld [vmem:[%s7917_s18 + $0x3c] sm:$0xf] }
  0x42   : > { %6595 = vmatprep.subr.bf16.mxu1 %v7649_v10  ;;  %v8180_v16 = vcombine.low %v503_v54, %v513_v4  ;;  %v786_v17 = vrot.slane %v785_v58, 4  ;;  %v8188_v10 = vsel %vm8158_vm5, %v7969_v47, %v858_v43  ;;  %v8209_v47 = vld [vmem:[%s7917_s18 + $0x38] sm:$0x1]  ;;  %v515_v23 = vshrl.u32 %v8191_v21, 16 }
  0x43   : > { %v796_v14 = vrot.slane %v795_v6, 4  ;;  %v518_v25 = vshll.u32 %v8191_v21, 16  ;;  %v534_v29 = vshll.u32 %v8209_v47, 16  ;;  %v6152_v39 = vcombine.low %v8202_v22, %v8188_v10  ;;  %v7664_v22 = vld [vmem:[%s10993_s1 + $0x110] sm:$0xff]  }
  0x44   : > { %11082 = vst [vmem:[#allocation12_spill] sm:$0xff] %v8180_v16  ;;  %1881 = vmatprep.mubr.bf16.mxu0 %v8180_v16  ;;  %v791_v43 = vsel %vm7962_vm2, %v786_v17, %v790_v44  ;;  %v517_v31 = vrot.slane %v515_v23, 4  ;;  %v539_v44 = vshrl.u32 %v8232_v36, 16  ;;  %v542_v51 = vshll.u32 %v8232_v36, 16  ;;  %6706 = vmatpush3.bf16.msra.mxu0 %v7664_v22 }
  0x45   : > { %6596 = vmatpush3.bf16.msra.mxu1 %v7651_v35  ;;  %v801_v24 = vsel %vm7962_vm2, %v796_v14, %v800_v60  ;;  %1882 = vmatmul.mubr.bf16.gmra.mxu0 %v8178_v8  ;;  %v520_v32 = vrot.slane %v518_v25, 5  ;;  %v530_v35 = vrot.slane %v528_v27, 4  ;;  %v536_v5 = vrot.slane %v534_v29, 5  ;;  %v8261_v14 = vld [vmem:[%s7917_s18 + $0x4c] sm:$0xf] }
  0x46   : > { %6597 = vmatprep.subr.bf16.mxu1 %v7653_v40  ;;  %v8226_v30 = vcombine.low %v791_v43, %v801_v24  ;;  %v8238_v40 = vld [vmem:[%s7917_s18 + $0x40] sm:$0xf]  ;;  %v558_v60 = vshll.u32 %v8241_v42, 16  ;;  %v8258_v6 = vcombine.low %v8191_v21, %v8194_v20  ;;  %v541_v17 = vrot.slane %v539_v44, 4  ;;  %6707 = vmatprep.subr.bf16.mxu0 %v7667_v61 }
  0x47   : > { %v521_v38 = vor.u32 %v520_v32, %v517_v31  ;;  %v531_v53 = vor.u32 %v530_v35, %v526_v33  ;;  %v548_v54 = vshll.u32 %v8238_v40, 16  ;;  %v552_v58 = vshrl.u32 %v8238_v40, 16 }
  0x48   : > { %11083 = vst [vmem:[#allocation13_spill] sm:$0xff] %v8226_v30  ;;  %1977 = vmatprep.mubr.bf16.mxu1 %v8226_v30  ;;  %11084 = vst [vmem:[#allocation14_spill] sm:$0xff] %v8258_v6  ;;  %v544_v10 = vrot.slane %v542_v51, 5  ;;  %v560_v12 = vrot.slane %v558_v60, 5  ;;  %v864_v27 = vrot.slane %v862_v13, 4  ;;  %v865_v29 = vrot.slane %v8001_v2, 5 }
  0x49   : > { %6598 = vmatpush3.bf16.msra.mxu1 %v7654_v0  ;;  %v8250_v0 = vld [vmem:[%s7917_s18 + $0x48] sm:$0xf]  ;;  %v522_v4 = vrot.slane %v521_v38, 4  ;;  %v532_v43 = vrot.slane %v531_v53, 4  ;;  %v550_v23 = vrot.slane %v548_v54, 5  ;;  %v554_v25 = vrot.slane %v552_v58, 4 }
  0x4a   : > { %1978 = vmatmul.mubr.bf16.gmra.mxu1 %v8222_v28  ;;  %v545_v24 = vor.u32 %v544_v10, %v541_v17  ;;  %v563_v34 = vshrl.u32 %v8250_v0, 16  ;;  %v566_v35 = vshll.u32 %v8250_v0, 16  ;;  %v572_v2 = vshll.u32 %v8261_v14, 16  ;;  %v8288_v51 = vld [vmem:[%s7917_s18 + $0x54] sm:$0xf] }
  0x4b   : > { %2018 = vmatprep.mubr.bf16.mxu1 %v8038_v50  ;;  %v527_v50 = vsel %vm7962_vm2, %v522_v4, %v526_v33  ;;  %v537_v31 = vsel %vm7962_vm2, %v532_v43, %v536_v5  ;;  %v555_v32 = vor.u32 %v554_v25, %v550_v23  ;;  %v863_v33 = vsel %vm8158_vm5, %v6103_v18, %v862_v13  ;;  %v8295_v60 = vld [vmem:[%s7917_s18 + $0x58] sm:$0xf]  ;;  %v7668_v4 = vld [vmem:[%s10993_s1 + $0x108] sm:$0xff]   ;;  %v8314_v43 = vld [vmem:[%s7917_s18 + $0x5c] sm:$0x1] }
  0x4c   : > { %v8278_v38 = vcombine.low %v527_v50, %v537_v31  ;;  %v546_v44 = vrot.slane %v545_v24, 4  ;;  %v8292_v53 = vcombine.low %v8232_v36, %v8238_v40  ;;  %v565_v54 = vrot.slane %v563_v34, 4  ;;  %6708 = vmatpush3.bf16.msra.mxu0 %v7668_v4 }
  0x4d   : > { %v556_v5 = vrot.slane %v555_v32, 4  ;;  %v568_v58 = vrot.slane %v566_v35, 5  ;;  %v574_v18 = vrot.slane %v572_v2, 5  ;;  %v576_v13 = vshrl.u32 %v8261_v14, 16  ;;  %v7671_v32 = vld [vmem:[%s10993_s1 + $0x100] sm:$0xff]  }
  0x4e   : > { %11085 = vst [vmem:[#allocation15_spill] sm:$0xff] %v8278_v38  ;;  %11086 = vst [vmem:[#allocation16_spill] sm:$0xff] %v8292_v53  ;;  %1889 = vmatprep.mubr.bf16.mxu0 %v8278_v38  ;;  %v551_v62 = vsel %vm7962_vm2, %v546_v44, %v550_v23  ;;  %v866_v10 = vsel %vm8158_vm5, %v864_v27, %v865_v29  ;;  %v7670_v23 = vld [vmem:[%s10993_s1 + $0x140] sm:$0xff]   ;;  %v869_v24 = vrot.slane %v8052_v56, 5  ;;  %v584_v31 = vrot.slane %v582_v1, 5 }
  0x4f   : > { %1890 = vmatmul.mubr.bf16.gmra.mxu0 %v8258_v6  ;;  %v561_v17 = vsel %vm7962_vm2, %v556_v5, %v560_v12  ;;  %v569_v22 = vor.u32 %v568_v58, %v565_v54  ;;  %v578_v50 = vrot.slane %v576_v13, 4  ;;  %v587_v27 = vshrl.u32 %v8288_v51, 16  ;;  %6709 = vmatprep.subr.bf16.mxu0 %v7670_v23  ;;  %v7673_v58 = vld [vmem:[%s10993_s1 + $0x1f8] sm:$0xff]   ;;  %v8342_v1 = vld [vmem:[%s7917_s18 + $0x60] sm:$0xf] }
  0x50   : > { %v8319_v25 = vcombine.low %v551_v62, %v561_v17  ;;  %v590_v29 = vshll.u32 %v8288_v51, 16  ;;  %v871_v35 = vrot.slane %v869_v24, 4  ;;  %v596_v56 = vshll.u32 %v8295_v60, 16  ;;  %6710 = vmatpush3.bf16.msra.mxu0 %v7671_v32  ;;  %6807 = vmatprep.subr.bf16.mxu1 %v7673_v58  ;;  %v7676_v32 = vld [vmem:[%s10993_s1 + $0x1f0] sm:$0xff]   ;;  %v8391_v58 = vld [vmem:[%s7917_s18 + $0x6c] sm:$0xf] }
  0x51   : > { %v570_v12 = vrot.slane %v569_v22, 4  ;;  %v579_v34 = vor.u32 %v578_v50, %v574_v18  ;;  %v8332_v44 = vcombine.low %v863_v33, %v866_v10  ;;  %v589_v2 = vrot.slane %v587_v27, 4  ;;  %v7674_v33 = vld [vmem:[%s10993_s1 + $0x1b8] sm:$0xff]   ;;  %v8352_v22 = vld [vmem:[%s7917_s18 + $0x64] sm:$0xf] }
  0x52   : > { %2019 = vmatmul.mubr.bf16.vlgmr.msra.gmra.mxu1 %v6152_v39  ;;  %11087 = vst [vmem:[#allocation17_spill] sm:$0xff] %v8319_v25  ;;  %v6104_v39 = vrot.slane %v8049_v55, 9  ;;  %1897 = vmatprep.mubr.bf16.mxu0 %v8319_v25  ;;  %v872_v55 = vrot.slane %v8060_v59, 5  ;;  %v592_v5 = vrot.slane %v590_v29, 5  ;;  %v600_v54 = vshrl.u32 %v8295_v60, 16 }
  0x53   : > { %2026 = vmatprep.mubr.bf16.mxu1 %v8096_v45  ;;  %v575_v61 = vsel %vm7962_vm2, %v570_v12, %v574_v18  ;;  %v580_v62 = vrot.slane %v579_v34, 4  ;;  %v598_v59 = vrot.slane %v596_v56, 5  ;;  %v606_v13 = vshll.u32 %v8314_v43, 16  ;;  %v8357_v18 = vld [vmem:[%s10993_s1 + $0x238] sm:$0xff]   ;;  %v8367_v29 = vld [vmem:[%s7917_s18 + $0x68] sm:$0x1]  ;;  %6808 = vmatpush3.bf16.msra.mxu1 %v7674_v33 }
  0x54   : > { %v8349_v4 = vcombine.low %v8250_v0, %v8261_v14  ;;  %v593_v17 = vor.u32 %v592_v5, %v589_v2  ;;  %v602_v10 = vrot.slane %v600_v54, 4  ;;  %v870_v50 = vsel %vm8158_vm5, %v6104_v39, %v869_v24  ;;  %7439 = vmatprep.subr.bf16.mxu0 %v8357_v18  ;;  %v7677_v2 = vld [vmem:[%s10993_s1 + $0x1b0] sm:$0xff]   ;;  %6809 = vmatprep.subr.bf16.mxu1 %v7676_v32 }
  0x55   : > { %v585_v23 = vsel %vm7962_vm2, %v580_v62, %v584_v31  ;;  %v873_v12 = vsel %vm8158_vm5, %v871_v35, %v872_v55  ;;  %v876_v27 = vrot.slane %v8104_v49, 5  ;;  %v608_v34 = vrot.slane %v606_v13, 5 }
  0x56   : > { %v8374_v31 = vcombine.low %v575_v61, %v585_v23  ;;  %v594_v39 = vrot.slane %v593_v17, 4  ;;  %v603_v24 = vor.u32 %v602_v10, %v598_v59  ;;  %v6105_v49 = vrot.slane %v8101_v48, 9  ;;  %v8394_v61 = vld [vmem:[%s7917_s18 + $0x70] sm:$0xf] }
  0x57   : > { %1898 = vmatmul.mubr.bf16.gmra.mxu0 %v8292_v53  ;;  %v879_v35 = vrot.slane %v8112_v57, 5  ;;  %v611_v55 = vshrl.u32 %v8342_v1, 16  ;;  %v614_v56 = vshll.u32 %v8342_v1, 16  ;;  %v620_v48 = vshll.u32 %v8352_v22, 16  ;;  %6810 = vmatpush3.bf16.msra.mxu1 %v7677_v2 }
  0x58   : > { %11088 = vst [vmem:[#allocation18_spill] sm:$0xff] %v8374_v31  ;;  %1905 = vmatprep.mubr.bf16.mxu0 %v8374_v31  ;;  %v599_v5 = vsel %vm7962_vm2, %v594_v39, %v598_v59  ;;  %v604_v54 = vrot.slane %v603_v24, 4  ;;  %v624_v57 = vshrl.u32 %v8352_v22, 16  ;;  %v878_v62 = vrot.slane %v876_v27, 4  ;;  %v7679_v59 = vld [vmem:[%s10993_s1 + $0x1e8] sm:$0xff]  }
  0x59   : > { %v613_v13 = vrot.slane %v611_v55, 4  ;;  %v616_v33 = vrot.slane %v614_v56, 5  ;;  %v630_v17 = vshll.u32 %v8367_v29, 16  ;;  %v8400_v10 = vcombine.low %v870_v50, %v873_v12  ;;  %6811 = vmatprep.subr.bf16.mxu1 %v7679_v59  ;;  %v7680_v55 = vld [vmem:[%s10993_s1 + $0x1a8] sm:$0xff]  }
  0x5a   : > { %2027 = vmatmul.mubr.bf16.gmra.mxu1 %v8332_v44  ;;  %v609_v23 = vsel %vm7962_vm2, %v604_v54, %v608_v34  ;;  %v622_v39 = vrot.slane %v620_v48, 5  ;;  %v626_v24 = vrot.slane %v624_v57, 4  ;;  %v877_v56 = vsel %vm8158_vm5, %v6105_v49, %v876_v27 }
  0x5b   : > { %2034 = vmatprep.mubr.bf16.mxu1 %v8178_v8  ;;  %v8404_v30 = vcombine.low %v599_v5, %v609_v23  ;;  %v617_v32 = vor.u32 %v616_v33, %v613_v13  ;;  %v632_v50 = vrot.slane %v630_v17, 5  ;;  %v635_v34 = vshrl.u32 %v8391_v58, 16  ;;  %6812 = vmatpush3.bf16.msra.mxu1 %v7680_v55  ;;  %v8424_v13 = vld [vmem:[%s7917_s18 + $0x78] sm:$0xf]  ;;  %v7682_v33 = vld [vmem:[%s10993_s1 + $0x1e0] sm:$0xff]  }
  0x5c   : > { %v627_v2 = vor.u32 %v626_v24, %v622_v39  ;;  %v638_v5 = vshll.u32 %v8391_v58, 16  ;;  %v644_v54 = vshll.u32 %v8394_v61, 16  ;;  %v880_v27 = vsel %vm8158_vm5, %v878_v62, %v879_v35  ;;  %v8432_v35 = vld [vmem:[%s7917_s18 + $0x7c] sm:$0xf]  ;;  %6813 = vmatprep.subr.bf16.mxu1 %v7682_v33 }
  0x5d   : > { %11089 = vst [vmem:[#allocation19_spill] sm:$0xff] %v8404_v30  ;;  %v618_v12 = vrot.slane %v617_v32, 4  ;;  %v883_v48 = vrot.slane %v8194_v20, 5  ;;  %v648_v57 = vshrl.u32 %v8394_v61, 16  ;;  %v637_v17 = vrot.slane %v635_v34, 4  ;;  %v7683_v20 = vld [vmem:[%s10993_s1 + $0x1a0] sm:$0xff]  }
  0x5e   : > { %v628_v49 = vrot.slane %v627_v2, 4  ;;  %v640_v59 = vrot.slane %v638_v5, 5  ;;  %v646_v23 = vrot.slane %v644_v54, 5  ;;  %v654_v55 = vshll.u32 %v8412_v26, 16  ;;  %v8449_v54 = vld [vmem:[%s7917_s18 + $0x80] sm:$0x1] }
  0x5f   : > { %1906 = vmatmul.mubr.bf16.gmra.mxu0 %v8349_v4  ;;  %v623_v62 = vsel %vm7962_vm2, %v618_v12, %v622_v39  ;;  %v650_v32 = vrot.slane %v648_v57, 4  ;;  %v8444_v2 = vcombine.low %v8288_v51, %v8295_v60  ;;  %v8446_v34 = vcombine.low %v877_v56, %v880_v27  ;;  %6814 = vmatpush3.bf16.msra.mxu1 %v7683_v20  ;;  %v7684_v57 = vld [vmem:[%s10993_s1 + $0x1d8] sm:$0xff]  }
  0x60   : > { %1913 = vmatprep.mubr.bf16.mxu0 %v8404_v30  ;;  %v633_v24 = vsel %vm7962_vm2, %v628_v49, %v632_v50  ;;  %v641_v5 = vor.u32 %v640_v59, %v637_v17  ;;  %v6106_v39 = vrot.slane %v8191_v21, 9  ;;  %v885_v12 = vrot.slane %v883_v48, 4  ;;  %6815 = vmatprep.subr.bf16.mxu1 %v7684_v57 }
  0x61   : > { %v886_v50 = vrot.slane %v8209_v47, 5  ;;  %v651_v49 = vor.u32 %v650_v32, %v646_v23  ;;  %v8456_v33 = vcombine.low %v623_v62, %v633_v24  ;;  %v656_v56 = vrot.slane %v654_v55, 5  ;;  %v8463_v47 = vld [vmem:[%s7917_s18 + $0x84] sm:$0xf]  ;;  %v8467_v62 = vld [vmem:[%s7917_s18 + $0x88] sm:$0xf] }
  0x62   : > { %2035 = vmatmul.mubr.bf16.gmra.mxu1 %v8400_v10  ;;  %v659_v27 = vshrl.u32 %v8424_v13, 16  ;;  %v662_v17 = vshll.u32 %v8424_v13, 16  ;;  %v642_v59 = vrot.slane %v641_v5, 4  ;;  %v890_v21 = vrot.slane %v8238_v40, 5  ;;  %v7686_v24 = vld [vmem:[%s10993_s1 + $0x198] sm:$0xff]  }
  0x63   : > { %2042 = vmatprep.mubr.bf16.mxu1 %v8258_v6  ;;  %11090 = vst [vmem:[#allocation20_spill] sm:$0xff] %v8456_v33  ;;  %v652_v20 = vrot.slane %v651_v49, 4  ;;  %v668_v9 = vshll.u32 %v8432_v35, 16  ;;  %v672_v6 = vshrl.u32 %v8432_v35, 16  ;;  %v884_v40 = vsel %vm8158_vm5, %v6106_v39, %v883_v48  ;;  %6816 = vmatpush3.bf16.msra.mxu1 %v7686_v24 }
  0x64   : > { %v661_v32 = vrot.slane %v659_v27, 4  ;;  %v664_v15 = vrot.slane %v662_v17, 5  ;;  %v887_v55 = vsel %vm8158_vm5, %v885_v12, %v886_v50  ;;  %v678_v49 = vshll.u32 %v8449_v54, 16  ;;  %v7687_v17 = vld [vmem:[%s10993_s1 + $0x1d0] sm:$0xff]  }
  0x65   : > { %v670_v5 = vrot.slane %v668_v9, 5  ;;  %v674_v27 = vrot.slane %v672_v6, 4  ;;  %v8486_v48 = vcombine.low %v8342_v1, %v8352_v22  ;;  %v647_v9 = vsel %vm7962_vm2, %v642_v59, %v646_v23  ;;  %6817 = vmatprep.subr.bf16.mxu1 %v7687_v17  ;;  %v7690_v23 = vld [vmem:[%s10993_s1 + $0x1c8] sm:$0xff]  }
  0x66   : > { %v665_v57 = vor.u32 %v664_v15, %v661_v32  ;;  %v657_v39 = vsel %vm7962_vm2, %v652_v20, %v656_v56  ;;  %v7688_v15 = vld [vmem:[%s10993_s1 + $0x190] sm:$0xff]   ;;  %v8495_v6 = vcombine.low %v884_v40, %v887_v55  ;;  %v6107_v12 = vrot.slane %v8232_v36, 9  ;;  %v8504_v20 = vld [vmem:[%s7917_s18 + $0x8c] sm:$0x1] }
  0x67   : > { %1914 = vmatmul.mubr.bf16.gmra.mxu0 %v8444_v2  ;;  %v675_v50 = vor.u32 %v674_v27, %v670_v5  ;;  %v683_v32 = vshrl.u32 %v8463_v47, 16  ;;  %v892_v59 = vrot.slane %v890_v21, 4  ;;  %v893_v56 = vrot.slane %v8241_v42, 5  ;;  %v7691_v17 = vld [vmem:[%s10993_s1 + $0x188] sm:$0xff]   ;;  %6818 = vmatpush3.bf16.msra.mxu1 %v7688_v15 }
  0x68   : > { %1921 = vmatprep.mubr.bf16.mxu0 %v8456_v33  ;;  %v686_v24 = vshll.u32 %v8463_v47, 16  ;;  %v692_v40 = vshll.u32 %v8467_v62, 16  ;;  %v8508_v55 = vcombine.low %v647_v9, %v657_v39  ;;  %v666_v36 = vrot.slane %v665_v57, 4  ;;  %6819 = vmatprep.subr.bf16.mxu1 %v7690_v23  ;;  %v7692_v9 = vld [vmem:[%s10993_s1 + $0x1c0] sm:$0xff]  }
  0x69   : > { %v680_v27 = vrot.slane %v678_v49, 5  ;;  %v676_v8 = vrot.slane %v675_v50, 4  ;;  %v685_v45 = vrot.slane %v683_v32, 4  ;;  %v891_v49 = vsel %vm8158_vm5, %v6107_v12, %v890_v21  ;;  %v7693_v21 = vld [vmem:[%s10993_s1 + $0x180] sm:$0xff]  }
  0x6a   : > { %2043 = vmatmul.mubr.bf16.gmra.mxu1 %v8446_v34  ;;  %11091 = vst [vmem:[#allocation21_spill] sm:$0xff] %v8508_v55  ;;  %v688_v33 = vrot.slane %v686_v24, 5  ;;  %v694_v42 = vrot.slane %v692_v40, 5  ;;  %v894_v57 = vsel %vm8158_vm5, %v892_v59, %v893_v56  ;;  %v702_v39 = vshll.u32 %v8504_v20, 16 }
  0x6b   : > { %2050 = vmatprep.mubr.bf16.mxu1 %v8292_v53  ;;  %v696_v53 = vshrl.u32 %v8467_v62, 16  ;;  %v671_v15 = vsel %vm7962_vm2, %v666_v36, %v670_v5  ;;  %v681_v50 = vsel %vm7962_vm2, %v676_v8, %v680_v27  ;;  %6820 = vmatpush3.bf16.msra.mxu1 %v7691_v17  ;;  %v8536_v12 = vcombine.low %v8391_v58, %v8394_v61 }
  0x6c   : > { %v689_v32 = vor.u32 %v688_v33, %v685_v45  ;;  %6821 = vmatprep.subr.bf16.mxu1 %v7692_v9  ;;  %v6108_v59 = vrot.slane %v8250_v0, 9  ;;  %v900_v5 = vrot.slane %v8267_v11, 5  ;;  %v8542_v56 = vcombine.low %v671_v15, %v681_v50 }
  0x6d   : > { %v698_v30 = vrot.slane %v696_v53, 4  ;;  %v897_v53 = vrot.slane %v8261_v14, 5  ;;  %v8538_v14 = vcombine.low %v891_v49, %v894_v57  ;;  %v704_v8 = vrot.slane %v702_v39, 5 }
  0x6e   : > { %11092 = vst [vmem:[#allocation22_spill] sm:$0xff] %v8542_v56  ;;  %v904_v24 = vrot.slane %v8295_v60, 5  ;;  %v6109_v27 = vrot.slane %v8288_v51, 9  ;;  %v8560_v60 = vcombine.low %v8424_v13, %v8432_v35  ;;  %v907_v49 = vrot.slane %v8314_v43, 5 }
  0x6f   : > { %1922 = vmatmul.mubr.bf16.gmra.mxu0 %v8486_v48  ;;  %v699_v23 = vor.u32 %v698_v30, %v694_v42  ;;  %v899_v45 = vrot.slane %v897_v53, 4  ;;  %v690_v30 = vrot.slane %v689_v32, 4  ;;  %6822 = vmatpush3.bf16.msra.mxu1 %v7693_v21  ;;  %v898_v0 = vsel %vm8158_vm5, %v6108_v59, %v897_v53  ;;  %v8586_v21 = vld [vmem:[%s7917_s18 + $0x94] sm:$0xf] }
  0x70   : > { %1929 = vmatprep.mubr.bf16.mxu0 %v8508_v55  ;;  %v906_v9 = vrot.slane %v904_v24, 4  ;;  %v911_v53 = vrot.slane %v8352_v22, 5  ;;  %v918_v39 = vrot.slane %v8394_v61, 5  ;;  %v914_v51 = vrot.slane %v8367_v29, 5 }
  0x71   : > { %v700_v33 = vrot.slane %v699_v23, 4  ;;  %v901_v11 = vsel %vm8158_vm5, %v899_v45, %v900_v5  ;;  %v695_v40 = vsel %vm7962_vm2, %v690_v30, %v694_v42  ;;  %v6110_v42 = vrot.slane %v8342_v1, 9  ;;  %v8602_v30 = vld [vmem:[%s7917_s18 + $0x90] sm:$0xf] }
  0x72   : > { %2051 = vmatmul.mubr.bf16.gmra.mxu1 %v8495_v6  ;;  %v8562_v17 = vcombine.low %v898_v0, %v901_v11  ;;  %v6111_v15 = vrot.slane %v8391_v58, 9  ;;  %v905_v43 = vsel %vm8158_vm5, %v6109_v27, %v904_v24  ;;  %v908_v50 = vsel %vm8158_vm5, %v906_v9, %v907_v49  ;;  %v8606_v24 = vld [vmem:[%s7917_s18 + $0xa0] sm:$0xf]  ;;  %v8610_v11 = vld [vmem:[%s7917_s18 + $0x98] sm:$0x1] }
  0x73   : > { %2058 = vmatprep.mubr.bf16.mxu1 %v8349_v4  ;;  %v705_v36 = vsel %vm7962_vm2, %v700_v33, %v704_v8  ;;  %v11022_v22 = vrot.slane %v8432_v35, 5  ;;  %v11020_v1 = vrot.slane %v8467_v62, 5  ;;  %v913_v29 = vrot.slane %v911_v53, 4  ;;  %v8622_v49 = vld [vmem:[%s7917_s18 + $0xac] sm:$0xf] }
  0x74   : > { %v8565_v57 = vcombine.low %v695_v40, %v705_v36  ;;  %v921_v58 = vrot.slane %v8412_v26, 5  ;;  %v920_v61 = vrot.slane %v918_v39, 4  ;;  %v6112_v32 = vrot.slane %v8424_v13, 9  ;;  %v8614_v36 = vld [vmem:[%s7917_s18 + $0x9c] sm:$0xf]  ;;  %v7678_v26 = vld [vmem:[%s10993_s1 + $0x230] sm:$0xff]  }
  0x75   : > { %v928_v23 = vrot.slane %v8449_v54, 5  ;;  %v11019_v59 = vrot.slane %v8586_v21, 5  ;;  %v8591_v5 = vcombine.low %v8463_v47, %v8467_v62  ;;  %v8593_v45 = vcombine.low %v905_v43, %v908_v50  ;;  %v8626_v50 = vld [vmem:[%s7917_s18 + $0xa4] sm:$0x1]  ;;  %v8630_v8 = vld [vmem:[%s7917_s18 + $0xa8] sm:$0xf] }
  0x76   : > { %11093 = vst [vmem:[#allocation23_spill] sm:$0xff] %v8565_v57  ;;  %v927_v13 = vrot.slane %v11022_v22, 4  ;;  %v934_v54 = vrot.slane %v11020_v1, 4  ;;  %v11021_v0 = vrot.slane %v8606_v24, 5  ;;  %v953_v43 = vrot.slane %v8622_v49, 5 }
  0x77   : > { %1930 = vmatmul.mubr.bf16.gmra.mxu0 %v8536_v12  ;;  %v8619_v9 = vrot.slane %v11019_v59, 4  ;;  %v8640_v59 = vld [vmem:[%s7917_s18 + $0xb0] sm:$0x1]  ;;  %v912_v33 = vsel %vm8158_vm5, %v6110_v42, %v911_v53  ;;  %v915_v40 = vsel %vm8158_vm5, %v913_v29, %v914_v51  ;;  %v919_v53 = vsel %vm8158_vm5, %v6111_v15, %v918_v39  ;;  %v7685_v29 = vld [vmem:[%s10993_s1 + $0x220] sm:$0xff]   ;;  %v7807_v49 = vld [vmem:[%s7917_s18 + $0xbc] sm:$0x1] }
  0x78   : > { %1937 = vmatprep.mubr.bf16.mxu0 %v8542_v56  ;;  %v8637_v27 = vrot.slane %v11021_v0, 4  ;;  %v8651_v1 = vrot.slane %v953_v43, 4  ;;  %v960_v0 = vrot.slane %v8130_v19, 5  ;;  %v8654_v22 = vcombine.low %v912_v33, %v915_v40  ;;  %v7696_v40 = vld [vmem:[%s10993_s1 + $0x208] sm:$0xff]   ;;  %v11109_v19 = vld [vmem:[#allocation11_spill] sm:$0xff] }
  0x79   : > { %v922_v42 = vsel %vm8158_vm5, %v920_v61, %v921_v58  ;;  %v929_v15 = vsel %vm8158_vm5, %v927_v13, %v928_v23  ;;  %v7694_v58 = vld [vmem:[%s10993_s1 + $0x218] sm:$0xff]   ;;  %v11097_v13 = vrot.slane %v8504_v20, 5  ;;  %v11099_v20 = vrot.slane %v8602_v30, 9 }
  0x7a   : > { %2059 = vmatmul.mubr.bf16.gmra.mxu1 %v8538_v14  ;;  %v8671_v51 = vcombine.low %v919_v53, %v922_v42  ;;  %v11100_v53 = vrot.slane %v8610_v11, 5  ;;  %v11102_v30 = vrot.slane %v8614_v36, 9  ;;  %v11104_v36 = vrot.slane %v8630_v8, 9 }
  0x7b   : > { %2066 = vmatprep.mubr.bf16.mxu1 %v8444_v2  ;;  %v936_v33 = vsel %vm8158_vm5, %v934_v54, %v11097_v13  ;;  %v962_v8 = vrot.slane %v960_v0, 4  ;;  %v963_v13 = vrot.slane %v7807_v49, 5 }
  0x7c   : > { %v943_v42 = vsel %vm8158_vm5, %v8619_v9, %v11100_v53  ;;  %v11103_v9 = vrot.slane %v8626_v50, 5  ;;  %v11105_v50 = vrot.slane %v8640_v59, 5  ;;  %v11106_v59 = vld [vmem:[#allocation19_spill] sm:$0xff] }
  0x7f   : > { %1938 = vmatmul.mubr.bf16.gmra.mxu0 %v8560_v60 }
  0x80   : > { %1945 = vmatprep.mubr.bf16.mxu0 %v8565_v57 }
  0x82   : > { %2067 = vmatmul.mubr.bf16.gmra.mxu1 %v8562_v17 }
  0x83   : > { %2074 = vmatprep.mubr.bf16.mxu1 %v8486_v48 }
  0x87   : > { %1946 = vmatmul.mubr.bf16.gmra.mxu0 %v8591_v5 }
  0x88   : > { %2179 = vmatprep.mubr.bf16.mxu0 %v8332_v44  ;;  %v7681_v44 = vld [vmem:[%s10993_s1 + $0x228] sm:$0xff]  }
  0x8a   : > { %2075 = vmatmul.mubr.bf16.gmra.mxu1 %v8593_v45 }
  0x8b   : > { %2082 = vmatprep.mubr.bf16.mxu1 %v8536_v12 }
  0x8f   : > { %2180 = vmatmul.mubr.bf16.vlgmr.msra.gmra.mxu0 %v8043_v52 }
  0x90   : > { %7440 = vmatpush3.bf16.msra.mxu0 %v8357_v18  ;;  %2187 = vmatprep.mubr.bf16.mxu0 %v8400_v10  ;;  %v11094_v18 = vrot.slane %v8432_v35, 5  ;;  %v11095_v35 = vrot.slane %v8467_v62, 5  ;;  %v11098_v62 = vrot.slane %v8586_v21, 5  ;;  %v11101_v21 = vrot.slane %v8606_v24, 5  ;;  %v8756_v24 = vld [vmem:[%s7917_s18 + $0xc4] sm:$0xf] }
  0x91   : > { %7441 = vmatprep.subr.bf16.mxu0 %v7678_v26 }
  0x92   : > { %2083 = vmatmul.mubr.bf16.gmra.mxu1 %v8654_v22  ;;  %v926_v39 = vsel %vm8158_vm5, %v6112_v32, %v11094_v18  ;;  %v11096_v32 = vrot.slane %v8463_v47, 9  ;;  %v7697_v47 = vld [vmem:[%s10993_s1 + $0x200] sm:$0xff]   ;;  %v940_v54 = vsel %vm8158_vm5, %v11099_v20, %v11098_v62  ;;  %v947_v11 = vsel %vm8158_vm5, %v11102_v30, %v11101_v21 }
  0x93   : > { %2090 = vmatprep.mubr.bf16.mxu1 %v8560_v60  ;;  %v8689_v61 = vcombine.low %v926_v39, %v929_v15  ;;  %v950_v18 = vsel %vm8158_vm5, %v8637_v27, %v11103_v9  ;;  %v8753_v15 = vld [vmem:[%s7917_s18 + $0xc0] sm:$0xf]  ;;  %v954_v27 = vsel %vm8158_vm5, %v11104_v36, %v953_v43  ;;  %v964_v43 = vsel %vm8158_vm5, %v962_v8, %v963_v13 }
  0x94   : > { %7442 = vmatpush3.bf16.msra.mxu0 %v7678_v26  ;;  %v7695_v26 = vld [vmem:[%s10993_s1 + $0x210] sm:$0xff]   ;;  %v933_v23 = vsel %vm8158_vm5, %v11096_v32, %v11095_v35  ;;  %v8748_v39 = vcombine.low %v947_v11, %v950_v18  ;;  %v8775_v35 = vcombine.low %v8753_v15, %v8756_v24  ;;  %v11111_v62 = vld [vmem:[#allocation4_spill] sm:$0xff]  ;;  %v966_v8 = vshrl.u32 %v8753_v15, 16 }
  0x95   : > { %7443 = vmatprep.subr.bf16.mxu0 %v7681_v44  ;;  %v7806_v32 = vld [vmem:[%s7917_s18 + $0xb4] sm:$0xf]  ;;  %v11112_v20 = vld [vmem:[#allocation16_spill] sm:$0xff]  ;;  %v969_v49 = vshll.u32 %v8753_v15, 16  ;;  %v979_v13 = vshrl.u32 %v8756_v24, 16 }
  0x97   : > { %2188 = vmatmul.mubr.bf16.gmra.mxu0 %v8116_v63 }
  0x98   : > { %2195 = vmatprep.mubr.bf16.mxu0 %v8446_v34  ;;  %7444 = vmatpush3.bf16.msra.mxu0 %v7681_v44  ;;  %v8711_v44 = vcombine.low %v933_v23, %v936_v33  ;;  %v6117_v23 = vrot.slane %v7806_v32, 9  ;;  %v11113_v32 = vld [vmem:[#allocation6_spill] sm:$0xff] }
  0x99   : > { %7445 = vmatprep.subr.bf16.mxu0 %v7685_v29 }
  0x9a   : > { %2091 = vmatmul.mubr.bf16.gmra.mxu1 %v8671_v51 }
  0x9b   : > { %2098 = vmatprep.mubr.bf16.mxu1 %v8591_v5 }
  0x9c   : > { %7446 = vmatpush3.bf16.msra.mxu0 %v7685_v29  ;;  %v8731_v29 = vcombine.low %v940_v54, %v943_v42 }
  0x9d   : > { %7447 = vmatprep.subr.bf16.mxu0 %v7694_v58 }
  0x9f   : > { %2196 = vmatmul.mubr.bf16.gmra.mxu0 %v8180_v16 }
  0xa0   : > { %2203 = vmatprep.mubr.bf16.mxu0 %v8495_v6  ;;  %7448 = vmatpush3.bf16.msra.mxu0 %v7694_v58  ;;  %v957_v58 = vsel %vm8158_vm5, %v8651_v1, %v11105_v50  ;;  %v961_v1 = vsel %vm8158_vm5, %v6117_v23, %v960_v0  ;;  %v11110_v0 = vld [vmem:[#allocation14_spill] sm:$0xff] }
  0xa1   : > { %7449 = vmatprep.subr.bf16.mxu0 %v7695_v26  ;;  %v8791_v33 = vcombine.low %v961_v1, %v964_v43  ;;  %v975_v1 = vshll.u32 %v8756_v24, 16 }
  0xa2   : > { %2099 = vmatmul.mubr.bf16.gmra.mxu1 %v8689_v61 }
  0xa3   : > { %2106 = vmatprep.mubr.bf16.mxu1 %v8009_v7 }
  0xa4   : > { %7450 = vmatpush3.bf16.msra.mxu0 %v7695_v26  ;;  %v8771_v26 = vcombine.low %v954_v27, %v957_v58 }
  0xa5   : > { %7451 = vmatprep.subr.bf16.mxu0 %v7696_v40 }
  0xa7   : > { %2204 = vmatmul.mubr.bf16.gmra.mxu0 %v8278_v38 }
  0xa8   : > { %2211 = vmatprep.mubr.bf16.mxu0 %v8538_v14  ;;  %7452 = vmatpush3.bf16.msra.mxu0 %v7696_v40  ;;  %v11107_v40 = vld [vmem:[#allocation20_spill] sm:$0xff] }
  0xa9   : > { %7453 = vmatprep.subr.bf16.mxu0 %v7697_v47 }
  0xaa   : > { %2107 = vmatmul.mubr.bf16.gmra.mxu1 %v8711_v44 }
  0xab   : > { %2114 = vmatprep.mubr.bf16.mxu1 %v8068_v3 }
  0xac   : > { %7454 = vmatpush3.bf16.msra.mxu0 %v7697_v47  ;;  %v11108_v47 = vld [vmem:[#allocation7_spill] sm:$0xff] }
  0xaf   : > { %2212 = vmatmul.mubr.bf16.gmra.mxu0 %v8319_v25 }
  0xb0   : > { %2219 = vmatprep.mubr.bf16.mxu0 %v8562_v17 }
  0xb2   : > { %2115 = vmatmul.mubr.bf16.gmra.mxu1 %v8731_v29 }
  0xb3   : > { %2122 = vmatprep.mubr.bf16.mxu1 %v8098_v46 }
  0xb7   : > { %2220 = vmatmul.mubr.bf16.gmra.mxu0 %v8374_v31 }
  0xb8   : > { %2227 = vmatprep.mubr.bf16.mxu0 %v8593_v45 }
  0xba   : > { %2123 = vmatmul.mubr.bf16.gmra.mxu1 %v8748_v39 }
  0xbb   : > { %2130 = vmatprep.mubr.bf16.mxu1 %v8222_v28 }
  0xbf   : > { %2228 = vmatmul.mubr.bf16.gmra.mxu0 %v11106_v59 }
  0xc0   : > { %2235 = vmatprep.mubr.bf16.mxu0 %v8654_v22 }
  0xc2   : > { %2131 = vmatmul.mubr.bf16.gmra.mxu1 %v8771_v26 }
  0xc3   : > { %2138 = vmatprep.mubr.bf16.mxu1 %v8775_v35 }
  0xc7   : > { %2236 = vmatmul.mubr.bf16.gmra.mxu0 %v11107_v40 }
  0xc8   : > { %2243 = vmatprep.mubr.bf16.mxu0 %v8671_v51 }
  0xca   : > { %2139 = vmatmul.mubr.bf16.gmra.mxu1 %v8791_v33 }
  0xcb   : > { %2340 = vmatprep.mubr.bf16.mxu1 %v8116_v63 }
  0xcf   : > { %2244 = vmatmul.mubr.bf16.gmra.mxu0 %v8508_v55 }
  0xd0   : > { %2251 = vmatprep.mubr.bf16.mxu0 %v8689_v61 }
  0xd2   : > { %2341 = vmatmul.mubr.bf16.vlgmr.msra.gmra.mxu1 %v11108_v47  ;;  %v994_v47 = vrot.slane %v8756_v24, 5 }
  0xd3   : > { %2348 = vmatprep.mubr.bf16.mxu1 %v8180_v16 }
  0xd4   : > { %v996_v24 = vrot.slane %v994_v47, 4 }
  0xd7   : > { %2252 = vmatmul.mubr.bf16.gmra.mxu0 %v8542_v56 }
  0xd8   : > { %2259 = vmatprep.mubr.bf16.mxu0 %v8711_v44 }
  0xda   : > { %2349 = vmatmul.mubr.bf16.gmra.mxu1 %v11109_v19 }
  0xdb   : > { %2356 = vmatprep.mubr.bf16.mxu1 %v8278_v38 }
  0xdf   : > { %2260 = vmatmul.mubr.bf16.gmra.mxu0 %v8565_v57 }
  0xe0   : > { %2267 = vmatprep.mubr.bf16.mxu0 %v8731_v29 }
  0xe2   : > { %2357 = vmatmul.mubr.bf16.gmra.mxu1 %v11110_v0 }
  0xe3   : > { %2364 = vmatprep.mubr.bf16.mxu1 %v8319_v25 }
  0xe7   : > { %2268 = vmatmul.mubr.bf16.gmra.mxu0 %v11111_v62 }
  0xe8   : > { %2275 = vmatprep.mubr.bf16.mxu0 %v8748_v39 }
  0xea   : > { %2365 = vmatmul.mubr.bf16.gmra.mxu1 %v11112_v20 }
  0xeb   : > { %2372 = vmatprep.mubr.bf16.mxu1 %v8374_v31 }
  0xec   : > { %v6487_v54 = vpop.f32.mrf.mxu0  ;;  %v6559_v53 = vpop.f32.mrf.mxu1 }
  0xee   : > { %v6488_v42 = vpop.f32.mrf.mxu0  ;;  %v6560_v21 = vpop.f32.mrf.mxu1 }
  0xef   : > { %v8813_v30 = vadd.f32 %v6488_v42, %v6487_v54  ;;  %v8815_v11 = vadd.f32 %v6560_v21, %v6559_v53  ;;  %2276 = vmatmul.mubr.bf16.gmra.mxu0 %v11113_v32  ;;  %v968_v53 = vrot.slane %v966_v8, 4  ;;  %v971_v42 = vrot.slane %v969_v49, 5  ;;  %v11114_v49 = vld [vmem:[#allocation9_spill] sm:$0xff] }
  0xf0   : > { %v6490_v9 = vpop.f32.mrf.mxu0  ;;  %v6562_v18 = vpop.f32.mrf.mxu1  ;;  %2283 = vmatprep.mubr.bf16.mxu0 %v8771_v26  ;;  %v977_v21 = vrot.slane %v975_v1, 5 }
  0xf2   : > { %v6491_v36 = vpop.f32.mrf.mxu0  ;;  %v6563_v27 = vpop.f32.mrf.mxu1  ;;  %2373 = vmatmul.mubr.bf16.gmra.mxu1 %v8349_v4  ;;  %v411_v4 = vld [vmem:[%s7917_s18 + $0xc8] sm:$0x1] }
  0xf3   : > { %v8817_v50 = vadd.f32 %v6491_v36, %v6490_v9  ;;  %v8819_v58 = vadd.f32 %v6563_v27, %v6562_v18  ;;  %2380 = vmatprep.mubr.bf16.mxu1 %v11106_v59  ;;  %v981_v9 = vrot.slane %v979_v13, 4  ;;  %v7699_v18 = vld [vmem:[%s10994_s2 + $0x78] sm:$0xff]   ;;  %v6118_v59 = vrot.slane %v8753_v15, 9 }
  0xf4   : > { %v6493_v23 = vpop.f32.mrf.mxu0  ;;  %v6565_v19 = vpop.f32.mrf.mxu1  ;;  %v997_v31 = vrot.slane %v411_v4, 5  ;;  %6943 = vmatprep.subr.bf16.mxu1 %v7699_v18  ;;  %v972_v15 = vor.u32 %v971_v42, %v968_v53  ;;  %v11115_v42 = vld [vmem:[#allocation13_spill] sm:$0xff] }
  0xf5   : > { %v982_v1 = vor.u32 %v981_v9, %v977_v21  ;;  %v995_v25 = vsel %vm8158_vm5, %v6118_v59, %v994_v47 }
  0xf6   : > { %v6494_v43 = vpop.f32.mrf.mxu0  ;;  %v6566_v54 = vpop.f32.mrf.mxu1  ;;  %v973_v38 = vrot.slane %v972_v15, 4  ;;  %v7701_v15 = vld [vmem:[%s10994_s2 + $0x70] sm:$0xff]  }
  0xf7   : > { %v8830_v0 = vadd.f32 %v6494_v43, %v6493_v23  ;;  %v8836_v36 = vadd.f32 %v6566_v54, %v6565_v19  ;;  %v7700_v23 = vld [vmem:[%s10994_s2 + $0x38] sm:$0xff]   ;;  %2284 = vmatmul.mubr.bf16.gmra.mxu0 %v11114_v49  ;;  %v985_v19 = vshll.u32 %v411_v4, 16  ;;  %v983_v16 = vrot.slane %v982_v1, 4 }
  0xf8   : > { %v6496_v20 = vpop.f32.mrf.mxu0  ;;  %v6568_v43 = vpop.f32.mrf.mxu1  ;;  %2291 = vmatprep.mubr.bf16.mxu0 %v8791_v33  ;;  %6944 = vmatpush3.bf16.msra.mxu1 %v7700_v23 }
  0xf9   : > { %v987_v63 = vrot.slane %v985_v19, 5  ;;  %6945 = vmatprep.subr.bf16.mxu1 %v7701_v15 }
  0xfa   : > { %v6497_v27 = vpop.f32.mrf.mxu0  ;;  %2381 = vmatmul.mubr.bf16.gmra.mxu1 %v8444_v2  ;;  %v6569_v13 = vpop.f32.mrf.mxu1 }
  0xfb   : > { %v8842_v8 = vadd.f32 %v6497_v27, %v6496_v20  ;;  %2388 = vmatprep.mubr.bf16.mxu1 %v11107_v40  ;;  %v8848_v54 = vadd.f32 %v6569_v13, %v6568_v43  ;;  %v998_v20 = vsel %vm8158_vm5, %v996_v24, %v997_v31  ;;  %v988_v9 = vsel %vm7962_vm2, %v983_v16, %v987_v63 }
  0xfc   : > { %v6499_v18 = vpop.f32.mrf.mxu0  ;;  %v8854_v2 = vcombine.low %v995_v25, %v998_v20  ;;  %v978_v25 = vsel %vm7962_vm2, %v973_v38, %v977_v21  ;;  %v7702_v38 = vld [vmem:[%s10994_s2 + $0x30] sm:$0xff]  }
  0xfd   : > { %6946 = vmatpush3.bf16.msra.mxu1 %v7702_v38 }
  0xfe   : > { %v6500_v27 = vpop.f32.mrf.mxu0  ;;  %v6571_v40 = vpop.f32.mrf.mxu1 }
  0xff   : > { %v8856_v53 = vadd.f32 %v6500_v27, %v6499_v18  ;;  %2292 = vmatmul.mubr.bf16.gmra.mxu0 %v11115_v42 }
 0x100   : > { %v6502_v4 = vpop.f32.mrf.mxu0  ;;  %v6572_v59 = vpop.f32.mrf.mxu1  ;;  %2299 = vmatprep.mubr.bf16.mxu0 %v8854_v2 }
 0x101   : > { %v8860_v47 = vadd.f32 %v6572_v59, %v6571_v40 }
 0x102   : > { %2389 = vmatmul.mubr.bf16.gmra.mxu1 %v8486_v48  ;;  %v6503_v31 = vpop.f32.mrf.mxu0  ;;  %v6574_v24 = vpop.f32.mrf.mxu1  ;;  %v8870_v48 = vcombine.low %v978_v25, %v988_v9 }
 0x103   : > { %2396 = vmatprep.mubr.bf16.mxu1 %v8508_v55  ;;  %v8868_v23 = vadd.f32 %v6503_v31, %v6502_v4 }
 0x104   : > { %v6575_v43 = vpop.f32.mrf.mxu1  ;;  %11116 = vst [vmem:[#allocation7_spill] sm:$0xff] %v8870_v48 }
 0x105   : > { %v6505_v13 = vpop.f32.mrf.mxu0  ;;  %v8872_v40 = vadd.f32 %v6575_v43, %v6574_v24 }
 0x107   : > { %v6506_v1 = vpop.f32.mrf.mxu0  ;;  %2300 = vmatmul.mubr.bf16.gmra.mxu0 %v8870_v48 }
 0x108   : > { %v8880_v21 = vadd.f32 %v6506_v1, %v6505_v13  ;;  %7455 = vmatprep.mubr.bf16.mxu0 %v8400_v10 }
 0x109   : > { %v6508_v16 = vpop.f32.mrf.mxu0 }
 0x10a   : > { %v6577_v63 = vpop.f32.mrf.mxu1  ;;  %2397 = vmatmul.mubr.bf16.gmra.mxu1 %v8536_v12 }
 0x10b   : > { %2404 = vmatprep.mubr.bf16.mxu1 %v8542_v56  ;;  %v6509_v20 = vpop.f32.mrf.mxu0 }
 0x10c   : > { %v6578_v19 = vpop.f32.mrf.mxu1  ;;  %v8888_v27 = vadd.f32 %v6509_v20, %v6508_v16 }
 0x10d   : > { %v8886_v18 = vadd.f32 %v6578_v19, %v6577_v63 }
 0x10e   : > { %v6580_v4 = vpop.f32.mrf.mxu1 }
 0x10f   : > { %v6511_v25 = vpop.f32.mrf.mxu0  ;;  %7456 = vmatmul.mubr.bf16.vlgmr.msra.gmra.mxu0 %v8446_v34 }
 0x110   : > { %v6581_v59 = vpop.f32.mrf.mxu1  ;;  %7459 = vmatprep.mubr.bf16.mxu0 %v8495_v6  ;;  %v7704_v6 = vld [vmem:[%s10994_s2 + $0x28] sm:$0xff]  }
 0x111   : > { %v8890_v31 = vadd.f32 %v6581_v59, %v6580_v4  ;;  %v6512_v10 = vpop.f32.mrf.mxu0 }
 0x112   : > { %v6599_v9 = vpop.f32.mrf.mxu1  ;;  %2405 = vmatmul.mubr.bf16.gmra.mxu1 %v8560_v60  ;;  %v8896_v24 = vadd.f32 %v6512_v10, %v6511_v25  ;;  %v7703_v60 = vld [vmem:[%s10994_s2 + $0x68] sm:$0xff]  }
 0x113   : > { %2412 = vmatprep.mubr.bf16.mxu1 %v8565_v57  ;;  %v6514_v13 = vpop.f32.mrf.mxu0  ;;  %6947 = vmatprep.subr.bf16.mxu1 %v7703_v60 }
 0x114   : > { %v6600_v12 = vpop.f32.mrf.mxu1  ;;  %6948 = vmatpush3.bf16.msra.mxu1 %v7704_v6 }
 0x115   : > { %v6601_v43 = vadd.f32 %v6600_v12, %v6599_v9  ;;  %v6515_v38 = vpop.f32.mrf.mxu0 }
 0x116   : > { %v6602_v15 = vpop.f32.mrf.mxu1  ;;  %v8907_v63 = vadd.f32 %v6515_v38, %v6514_v13 }
 0x117   : > { %v8899_v1 = vadd.f32 %v6601_v43, %v8813_v30  ;;  %v6517_v19 = vpop.f32.mrf.mxu0  ;;  %7460 = vmatmul.mubr.bf16.gmra.mxu0 %v8538_v14 }
 0x118   : > { %v6603_v34 = vpop.f32.mrf.mxu1  ;;  %7463 = vmatprep.mubr.bf16.mxu0 %v8562_v17 }
 0x119   : > { %v6604_v16 = vadd.f32 %v6603_v34, %v6602_v15  ;;  %v6518_v4 = vpop.f32.mrf.mxu0 }
 0x11a   : > { %v6605_v20 = vpop.f32.mrf.mxu1  ;;  %2413 = vmatmul.mubr.bf16.gmra.mxu1 %v8591_v5  ;;  %v8916_v25 = vadd.f32 %v6518_v4, %v6517_v19 }
 0x11b   : > { %v8912_v30 = vadd.f32 %v6604_v16, %v8817_v50  ;;  %2420 = vmatprep.mubr.bf16.mxu1 %v11111_v62  ;;  %v6520_v10 = vpop.f32.mrf.mxu0  ;;  %v8968_v62 = vld [vmem:[%s7917_s18 + $0xd4] sm:$0x1] }
 0x11c   : > { %v6606_v59 = vpop.f32.mrf.mxu1 }
 0x11d   : > { %v6607_v9 = vadd.f32 %v6606_v59, %v6605_v20  ;;  %v6521_v5 = vpop.f32.mrf.mxu0 }
 0x11e   : > { %v6608_v12 = vpop.f32.mrf.mxu1  ;;  %v8921_v13 = vadd.f32 %v6521_v5, %v6520_v10  ;;  %v8947_v10 = vld [vmem:[%s7917_s18 + $0xd0] sm:$0xf] }
 0x11f   : > { %v8919_v43 = vadd.f32 %v6607_v9, %v8830_v0  ;;  %v6523_v15 = vpop.f32.mrf.mxu0  ;;  %7464 = vmatmul.mubr.bf16.gmra.mxu0 %v8593_v45  ;;  %v7705_v45 = vld [vmem:[%s10994_s2 + $0x60] sm:$0xff]   ;;  %v8944_v9 = vld [vmem:[%s7917_s18 + $0xcc] sm:$0xf] }
 0x120   : > { %v6609_v14 = vpop.f32.mrf.mxu1  ;;  %7467 = vmatprep.mubr.bf16.mxu0 %v8654_v22  ;;  %v7706_v22 = vld [vmem:[%s10994_s2 + $0x20] sm:$0xff]   ;;  %6949 = vmatprep.subr.bf16.mxu1 %v7705_v45 }
 0x121   : > { %v6610_v50 = vadd.f32 %v6609_v14, %v6608_v12  ;;  %v6524_v0 = vpop.f32.mrf.mxu0  ;;  %6950 = vmatpush3.bf16.msra.mxu1 %v7706_v22 }
 0x122   : > { %v6611_v60 = vpop.f32.mrf.mxu1  ;;  %2421 = vmatmul.mubr.bf16.gmra.mxu1 %v8009_v7  ;;  %v8930_v34 = vadd.f32 %v6524_v0, %v6523_v15  ;;  %v1000_v15 = vshrl.u32 %v8944_v9, 16  ;;  %v1009_v0 = vshll.u32 %v8947_v10, 16 }
 0x123   : > { %v8926_v17 = vadd.f32 %v6610_v50, %v8842_v8  ;;  %2428 = vmatprep.mubr.bf16.mxu1 %v11113_v32  ;;  %v6526_v16 = vpop.f32.mrf.mxu0 }
 0x124   : > { %v6612_v38 = vpop.f32.mrf.mxu1  ;;  %v1002_v45 = vrot.slane %v1000_v15, 4 }
 0x125   : > { %v6613_v6 = vadd.f32 %v6612_v38, %v6611_v60  ;;  %v6527_v8 = vpop.f32.mrf.mxu0  ;;  %v1003_v60 = vshll.u32 %v8944_v9, 16 }
 0x126   : > { %v6614_v19 = vpop.f32.mrf.mxu1  ;;  %v8941_v4 = vadd.f32 %v6527_v8, %v6526_v16 }
 0x127   : > { %v8933_v7 = vadd.f32 %v6613_v6, %v8856_v53  ;;  %v6529_v53 = vpop.f32.mrf.mxu0  ;;  %7468 = vmatmul.mubr.bf16.gmra.mxu0 %v8671_v51  ;;  %v1005_v8 = vrot.slane %v1003_v60, 5  ;;  %v1019_v60 = vshll.u32 %v8968_v62, 16 }
 0x128   : > { %v6615_v20 = vpop.f32.mrf.mxu1  ;;  %7471 = vmatprep.mubr.bf16.mxu0 %v8689_v61 }
 0x129   : > { %v6616_v59 = vadd.f32 %v6615_v20, %v6614_v19  ;;  %v6530_v14 = vpop.f32.mrf.mxu0  ;;  %v1011_v20 = vrot.slane %v1009_v0, 5 }
 0x12a   : > { %v6617_v12 = vpop.f32.mrf.mxu1  ;;  %2429 = vmatmul.mubr.bf16.gmra.mxu1 %v8068_v3  ;;  %v1013_v3 = vshrl.u32 %v8947_v10, 16  ;;  %v8960_v51 = vadd.f32 %v6530_v14, %v6529_v53 }
 0x12b   : > { %v8952_v5 = vadd.f32 %v6616_v59, %v8868_v23  ;;  %2436 = vmatprep.mubr.bf16.mxu1 %v11114_v49  ;;  %v6532_v38 = vpop.f32.mrf.mxu0 }
 0x12c   : > { %v6618_v50 = vpop.f32.mrf.mxu1  ;;  %v1015_v59 = vrot.slane %v1013_v3, 4 }
 0x12d   : > { %v6619_v23 = vadd.f32 %v6618_v50, %v6617_v12  ;;  %v6533_v61 = vpop.f32.mrf.mxu0  ;;  %v1006_v50 = vor.u32 %v1005_v8, %v1002_v45 }
 0x12e   : > { %v6620_v6 = vpop.f32.mrf.mxu1  ;;  %v8965_v49 = vadd.f32 %v6533_v61, %v6532_v38  ;;  %v1016_v15 = vor.u32 %v1015_v59, %v1011_v20  ;;  %v1021_v61 = vrot.slane %v1019_v60, 5 }
 0x12f   : > { %v8963_v16 = vadd.f32 %v6619_v23, %v8880_v21  ;;  %v6535_v22 = vpop.f32.mrf.mxu0  ;;  %7472 = vmatmul.mubr.bf16.gmra.mxu0 %v8711_v44  ;;  %v1007_v38 = vrot.slane %v1006_v50, 4 }
 0x130   : > { %v6621_v19 = vpop.f32.mrf.mxu1  ;;  %7475 = vmatprep.mubr.bf16.mxu0 %v8731_v29 }
 0x131   : > { %v6622_v32 = vadd.f32 %v6621_v19, %v6620_v6  ;;  %v6536_v12 = vpop.f32.mrf.mxu0  ;;  %v1017_v6 = vrot.slane %v1016_v15, 4  ;;  %v7708_v19 = vld [vmem:[%s10994_s2 + $0x18] sm:$0xff]  }
 0x132   : > { %v6623_v53 = vpop.f32.mrf.mxu1  ;;  %2437 = vmatmul.mubr.bf16.gmra.mxu1 %v8098_v46  ;;  %v8978_v0 = vadd.f32 %v6536_v12, %v6535_v22  ;;  %v1028_v22 = vrot.slane %v8947_v10, 5  ;;  %v7710_v12 = vld [vmem:[%s10994_s2 + $0xb8] sm:$0xff]  }
 0x133   : > { %v8973_v21 = vadd.f32 %v6622_v32, %v8888_v27  ;;  %2444 = vmatprep.mubr.bf16.mxu1 %v11115_v42  ;;  %v8980_v23 = vpop.f32.mrf.mxu0  ;;  %v7707_v32 = vld [vmem:[%s10994_s2 + $0x58] sm:$0xff]  }
 0x134   : > { %v6624_v14 = vpop.f32.mrf.mxu1  ;;  %6951 = vmatprep.subr.bf16.mxu1 %v7707_v32 }
 0x135   : > { %v6625_v3 = vadd.f32 %v6624_v14, %v6623_v53  ;;  %v8988_v29 = vpop.f32.mrf.mxu0  ;;  %v7709_v53 = vld [vmem:[%s10994_s2 + $0xf8] sm:$0xff]   ;;  %6952 = vmatpush3.bf16.msra.mxu1 %v7708_v19 }
 0x136   : > { %v6626_v46 = vpop.f32.mrf.mxu1  ;;  %7055 = vmatprep.subr.bf16.mxu0 %v7709_v53 }
 0x137   : > { %v8983_v44 = vadd.f32 %v6625_v3, %v8896_v24  ;;  %v6541_v8 = vpop.f32.mrf.mxu0  ;;  %7476 = vmatmul.mubr.bf16.gmra.mxu0 %v8748_v39  ;;  %v1012_v39 = vsel %vm7962_vm2, %v1007_v38, %v1011_v20  ;;  %v1031_v3 = vrot.slane %v8968_v62, 5  ;;  %v6119_v20 = vrot.slane %v8944_v9, 9 }
 0x138   : > { %v6627_v27 = vpop.f32.mrf.mxu1  ;;  %7479 = vmatprep.mubr.bf16.mxu0 %v8771_v26  ;;  %7056 = vmatpush3.bf16.msra.mxu0 %v7710_v12 }
 0x139   : > { %v6628_v45 = vadd.f32 %v6627_v27, %v6626_v46  ;;  %v1030_v27 = vrot.slane %v1028_v22, 4 }
 0x13a   : > { %v6629_v59 = vpop.f32.mrf.mxu1  ;;  %2445 = vmatmul.mubr.bf16.gmra.mxu1 %v8222_v28  ;;  %v6542_v28 = vpop.f32.mrf.mxu0 }
 0x13b   : > { %v8996_v24 = vadd.f32 %v6628_v45, %v8907_v63  ;;  %2452 = vmatprep.mubr.bf16.mxu1 %v8870_v48  ;;  %v1022_v63 = vsel %vm7962_vm2, %v1017_v6, %v1021_v61  ;;  %v9011_v26 = vadd.f32 %v6542_v28, %v6541_v8  ;;  %v1032_v8 = vsel %vm8158_vm5, %v1030_v27, %v1031_v3  ;;  %v7716_v27 = vld [vmem:[%s10994_s2 + $0xa8] sm:$0xff]  }
 0x13c   : > { %v6630_v14 = vpop.f32.mrf.mxu1  ;;  %v9013_v15 = vpop.f32.mrf.mxu0  ;;  %v6172_v32 = vcombine.low %v1012_v39, %v1022_v63  ;;  %v6171_v28 = vcombine.low %v8944_v9, %v8947_v10  ;;  %v7713_v63 = vld [vmem:[%s10994_s2 + $0x50] sm:$0xff]   ;;  %v7715_v10 = vld [vmem:[%s10994_s2 + $0xe8] sm:$0xff]  }
 0x13d   : > { %v6631_v50 = vadd.f32 %v6630_v14, %v6629_v59  ;;  %v7711_v59 = vld [vmem:[%s10994_s2 + $0xf0] sm:$0xff]   ;;  %6953 = vmatprep.subr.bf16.mxu1 %v7713_v63 }
 0x13e   : > { %v6632_v60 = vpop.f32.mrf.mxu1  ;;  %v9020_v38 = vpop.f32.mrf.mxu0  ;;  %7057 = vmatprep.subr.bf16.mxu0 %v7711_v59 }
 0x13f   : > { %v9017_v46 = vadd.f32 %v6631_v50, %v8916_v25  ;;  %7480 = vmatmul.mubr.bf16.gmra.mxu0 %v8791_v33  ;;  %v1029_v25 = vsel %vm8158_vm5, %v6119_v20, %v1028_v22  ;;  %v7714_v50 = vld [vmem:[%s10994_s2 + $0x10] sm:$0xff]  }
 0x140   : > { %v6633_v6 = vpop.f32.mrf.mxu1  ;;  %v6547_v19 = vpop.f32.mrf.mxu0  ;;  %7483 = vmatprep.mubr.bf16.mxu0 %v8854_v2  ;;  %v6173_v14 = vcombine.low %v1029_v25, %v1032_v8  ;;  %6954 = vmatpush3.bf16.msra.mxu1 %v7714_v50 }
 0x141   : > { %v6634_v61 = vadd.f32 %v6633_v6, %v6632_v60 }
 0x142   : > { %v6635_v45 = vpop.f32.mrf.mxu1  ;;  %2453 = vmatmul.mubr.bf16.gmra.mxu1 %v8775_v35  ;;  %v7712_v35 = vld [vmem:[%s10994_s2 + $0xb0] sm:$0xff]   ;;  %v6548_v33 = vpop.f32.mrf.mxu0 }
 0x143   : > { %v9025_v62 = vadd.f32 %v6634_v61, %v8921_v13  ;;  %2460 = vmatprep.mubr.bf16.mxu1 %v6172_v32  ;;  %v9038_v53 = vadd.f32 %v6548_v33, %v6547_v19  ;;  %7058 = vmatpush3.bf16.msra.mxu0 %v7712_v35 }
 0x144   : > { %v6636_v13 = vpop.f32.mrf.mxu1  ;;  %v9040_v2 = vpop.f32.mrf.mxu0  ;;  %7059 = vmatprep.subr.bf16.mxu0 %v7715_v10 }
 0x145   : > { %v6637_v12 = vadd.f32 %v6636_v13, %v6635_v45 }
 0x146   : > { %v6638_v22 = vpop.f32.mrf.mxu1  ;;  %v9053_v60 = vpop.f32.mrf.mxu0 }
 0x147   : > { %v9045_v39 = vadd.f32 %v6637_v12, %v8930_v34  ;;  %7484 = vmatmul.mubr.bf16.gmra.mxu0 %v6173_v14  ;;  %v7718_v14 = vld [vmem:[%s10994_s2 + $0xa0] sm:$0xff]  }
 0x148   : > { %v6639_v3 = vpop.f32.mrf.mxu1  ;;  %v6553_v20 = vpop.f32.mrf.mxu0  ;;  %7060 = vmatpush3.bf16.msra.mxu0 %v7716_v27 }
 0x149   : > { %v6640_v32 = vadd.f32 %v6639_v3, %v6638_v22 }
 0x14a   : > { %v6641_v9 = vpop.f32.mrf.mxu1  ;;  %2461 = vmatmul.mubr.bf16.gmra.mxu1 %v6171_v28  ;;  %v6554_v6 = vpop.f32.mrf.mxu0  ;;  %v7717_v28 = vld [vmem:[%s10994_s2 + $0xe0] sm:$0xff]  }
 0x14b   : > { %v9056_v34 = vadd.f32 %v6640_v32, %v8941_v4  ;;  %v9064_v19 = vadd.f32 %v6554_v6, %v6553_v20  ;;  %7061 = vmatprep.subr.bf16.mxu0 %v7717_v28  ;;  %v6540_v6 = vadd.f32 %v8988_v29, %v8980_v23 }
 0x14c   : > { %v6642_v61 = vpop.f32.mrf.mxu1  ;;  %v9066_v25 = vpop.f32.mrf.mxu0  ;;  %7062 = vmatpush3.bf16.msra.mxu0 %v7718_v14 }
 0x14d   : > { %v6643_v45 = vadd.f32 %v6642_v61, %v6641_v9 }
 0x14e   : > { %v6644_v8 = vpop.f32.mrf.mxu1  ;;  %v9071_v59 = vpop.f32.mrf.mxu0 }
 0x14f   : > { %v9069_v4 = vadd.f32 %v6643_v45, %v8960_v51 }
 0x150   : > { %v6645_v35 = vpop.f32.mrf.mxu1  ;;  %v6711_v12 = vpop.f32.mrf.mxu0 }
 0x151   : > { %v6646_v33 = vadd.f32 %v6645_v35, %v6644_v8 }
 0x152   : > { %v6647_v13 = vpop.f32.mrf.mxu1  ;;  %v6712_v51 = vpop.f32.mrf.mxu0 }
 0x153   : > { %v9074_v22 = vadd.f32 %v6646_v33, %v8965_v49  ;;  %v6713_v3 = vadd.f32 %v6712_v51, %v6711_v12  ;;  %v7820_v33 = vmov 0  }
 0x154   : > { %v6648_v63 = vpop.f32.mrf.mxu1  ;;  %v6714_v20 = vpop.f32.mrf.mxu0  ;;  %2746 = vst [vmem:[#allocation2 + $0x18] sm:$0xf] %v7820_v33  ;;  %2740 = vst [vmem:[#allocation2] sm:$0xf] %v7820_v33 }
 0x155   : > { %v6649_v50 = vadd.f32 %v6648_v63, %v6647_v13  ;;  %v9086_v49 = vadd.f32 %v6713_v3, %v8899_v1  ;;  %2741 = vst [vmem:[#allocation2 + $0x4] sm:$0xf] %v7820_v33  ;;  %2742 = vst [vmem:[#allocation2 + $0x8] sm:$0x1] %v7820_v33 }
 0x156   : > { %v6650_v32 = vpop.f32.mrf.mxu1  ;;  %v6715_v27 = vpop.f32.mrf.mxu0  ;;  %2743 = vst [vmem:[#allocation2 + $0xc] sm:$0xf] %v7820_v33  ;;  %2744 = vst [vmem:[#allocation2 + $0x10] sm:$0xf] %v7820_v33 }
 0x157   : > { %v9083_v9 = vadd.f32 %v6649_v50, %v8978_v0  ;;  %v6716_v45 = vadd.f32 %v6715_v27, %v6714_v20  ;;  %2745 = vst [vmem:[#allocation2 + $0x14] sm:$0x1] %v7820_v33  ;;  %2747 = vst [vmem:[#allocation2 + $0x1c] sm:$0xf] %v7820_v33 }
 0x158   : > { %v6651_v10 = vpop.f32.mrf.mxu1  ;;  %v6717_v35 = vpop.f32.mrf.mxu0  ;;  %2748 = vst [vmem:[#allocation2 + $0x20] sm:$0x1] %v7820_v33  ;;  %2749 = vst [vmem:[#allocation2 + $0x24] sm:$0xf] %v7820_v33 }
 0x159   : > { %v6652_v61 = vadd.f32 %v6651_v10, %v6650_v32  ;;  %2750 = vst [vmem:[#allocation2 + $0x28] sm:$0xf] %v7820_v33  ;;  %2751 = vst [vmem:[#allocation2 + $0x2c] sm:$0x1] %v7820_v33  ;;  %v9093_v0 = vadd.f32 %v6716_v45, %v8912_v30  ;;  %v6546_v32 = vadd.f32 %v9020_v38, %v9013_v15  ;;  %v7722_v15 = vld [vmem:[%s10994_s2 + $0x98] sm:$0xff]  }
 0x15a   : > { %v6653_v8 = vpop.f32.mrf.mxu1  ;;  %2752 = vst [vmem:[#allocation2 + $0x30] sm:$0xf] %v7820_v33  ;;  %2753 = vst [vmem:[#allocation2 + $0x34] sm:$0xf] %v7820_v33  ;;  %v6718_v29 = vpop.f32.mrf.mxu0 }
 0x15b   : > { %2754 = vst [vmem:[#allocation2 + $0x38] sm:$0x1] %v7820_v33  ;;  %2755 = vst [vmem:[#allocation2 + $0x3c] sm:$0xf] %v7820_v33  ;;  %v9090_v1 = vadd.f32 %v6652_v61, %v6540_v6  ;;  %v6719_v12 = vadd.f32 %v6718_v29, %v6717_v35  ;;  %v7719_v29 = vld [vmem:[%s10994_s2 + $0x48] sm:$0xff]  }
 0x15c   : > { %2756 = vst [vmem:[#allocation2 + $0x40] sm:$0xf] %v7820_v33  ;;  %2757 = vst [vmem:[#allocation2 + $0x44] sm:$0x1] %v7820_v33  ;;  %v6654_v23 = vpop.f32.mrf.mxu1  ;;  %v6720_v14 = vpop.f32.mrf.mxu0  ;;  %6955 = vmatprep.subr.bf16.mxu1 %v7719_v29  ;;  %v7724_v29 = vld [vmem:[%s10994_s2 + $0x90] sm:$0xff]  }
 0x15d   : > { %2758 = vst [vmem:[#allocation2 + $0x48] sm:$0xf] %v7820_v33  ;;  %2759 = vst [vmem:[#allocation2 + $0x4c] sm:$0xf] %v7820_v33  ;;  %v6655_v13 = vadd.f32 %v6654_v23, %v6653_v8  ;;  %v9099_v51 = vadd.f32 %v6719_v12, %v8919_v43  ;;  %v7721_v43 = vld [vmem:[%s10994_s2 + $0xd8] sm:$0xff]  }
 0x15e   : > { %2760 = vst [vmem:[#allocation2 + $0x50] sm:$0x1] %v7820_v33  ;;  %2761 = vst [vmem:[#allocation2 + $0x54] sm:$0xf] %v7820_v33  ;;  %v6656_v28 = vpop.f32.mrf.mxu1  ;;  %v6721_v3 = vpop.f32.mrf.mxu0  ;;  %7063 = vmatprep.subr.bf16.mxu0 %v7721_v43 }
 0x15f   : > { %2762 = vst [vmem:[#allocation2 + $0x58] sm:$0xf] %v7820_v33  ;;  %2763 = vst [vmem:[#allocation2 + $0x5c] sm:$0x1] %v7820_v33  ;;  %v9096_v63 = vadd.f32 %v6655_v13, %v9011_v26  ;;  %v6722_v30 = vadd.f32 %v6721_v3, %v6720_v14  ;;  %7064 = vmatpush3.bf16.msra.mxu0 %v7722_v15  ;;  %v6552_v14 = vadd.f32 %v9053_v60, %v9040_v2  ;;  %v7723_v15 = vld [vmem:[%s10994_s2 + $0xd0] sm:$0xff]  }
 0x160   : > { %2764 = vst [vmem:[#allocation2 + $0x60] sm:$0xf] %v7820_v33  ;;  %2765 = vst [vmem:[#allocation2 + $0x64] sm:$0xf] %v7820_v33  ;;  %v6657_v50 = vpop.f32.mrf.mxu1  ;;  %v6723_v27 = vpop.f32.mrf.mxu0  ;;  %7065 = vmatprep.subr.bf16.mxu0 %v7723_v15 }
 0x161   : > { %2766 = vst [vmem:[#allocation2 + $0x68] sm:$0x1] %v7820_v33  ;;  %2767 = vst [vmem:[#allocation2 + $0x6c] sm:$0xf] %v7820_v33  ;;  %v6658_v20 = vadd.f32 %v6657_v50, %v6656_v28  ;;  %v9106_v61 = vadd.f32 %v6722_v30, %v8926_v17  ;;  %v7720_v28 = vld [vmem:[%s10994_s2 + $0x8] sm:$0xff]  }
 0x162   : > { %2768 = vst [vmem:[#allocation2 + $0x70] sm:$0xf] %v7820_v33  ;;  %2769 = vst [vmem:[#allocation2 + $0x74] sm:$0x1] %v7820_v33  ;;  %v6659_v10 = vpop.f32.mrf.mxu1  ;;  %v6724_v26 = vpop.f32.mrf.mxu0  ;;  %6956 = vmatpush3.bf16.msra.mxu1 %v7720_v28 }
 0x163   : > { %2770 = vst [vmem:[#allocation2 + $0x78] sm:$0xf] %v7820_v33  ;;  %2771 = vst [vmem:[#allocation2 + $0x7c] sm:$0xf] %v7820_v33  ;;  %v9103_v6 = vadd.f32 %v6658_v20, %v6546_v32  ;;  %v6725_v35 = vadd.f32 %v6724_v26, %v6723_v27  ;;  %7066 = vmatpush3.bf16.msra.mxu0 %v7724_v29 }
 0x164   : > { %2772 = vst [vmem:[#allocation2 + $0x80] sm:$0x1] %v7820_v33  ;;  %2773 = vst [vmem:[#allocation2 + $0x84] sm:$0xf] %v7820_v33  ;;  %v6660_v45 = vpop.f32.mrf.mxu1 }
 0x165   : > { %2774 = vst [vmem:[#allocation2 + $0x88] sm:$0xf] %v7820_v33  ;;  %2775 = vst [vmem:[#allocation2 + $0x8c] sm:$0x1] %v7820_v33  ;;  %v6661_v8 = vadd.f32 %v6660_v45, %v6659_v10  ;;  %v9118_v17 = vadd.f32 %v6725_v35, %v8933_v7 }
 0x166   : > { %2776 = vst [vmem:[#allocation2 + $0x90] sm:$0xf] %v7820_v33  ;;  %2777 = vst [vmem:[#allocation2 + $0x94] sm:$0xf] %v7820_v33  ;;  %v6662_v38 = vpop.f32.mrf.mxu1 }
 0x167   : > { %2778 = vst [vmem:[#allocation2 + $0x98] sm:$0x1] %v7820_v33  ;;  %2779 = vst [vmem:[#allocation2 + $0x9c] sm:$0xf] %v7820_v33  ;;  %v9115_v23 = vadd.f32 %v6661_v8, %v9038_v53 }
 0x168   : > { %2780 = vst [vmem:[#allocation2 + $0xa0] sm:$0xf] %v7820_v33  ;;  %2781 = vst [vmem:[#allocation2 + $0xa4] sm:$0x1] %v7820_v33  ;;  %v6663_v13 = vpop.f32.mrf.mxu1 }
 0x169   : > { %2782 = vst [vmem:[#allocation2 + $0xa8] sm:$0xf] %v7820_v33  ;;  %2783 = vst [vmem:[#allocation2 + $0xac] sm:$0xf] %v7820_v33  ;;  %v6664_v50 = vadd.f32 %v6663_v13, %v6662_v38 }
 0x16a   : > { %2784 = vst [vmem:[#allocation2 + $0xb0] sm:$0x1] %v7820_v33  ;;  %2785 = vst [vmem:[#allocation2 + $0xb4] sm:$0xf] %v7820_v33  ;;  %v6665_v3 = vpop.f32.mrf.mxu1 }
 0x16b   : > { %2786 = vst [vmem:[#allocation2 + $0xb8] sm:$0xf] %v7820_v33  ;;  %2787 = vst [vmem:[#allocation2 + $0xbc] sm:$0x1] %v7820_v33  ;;  %v9128_v32 = vadd.f32 %v6664_v50, %v6552_v14 }
 0x16c   : > { %2788 = vst [vmem:[#allocation2 + $0xc0] sm:$0xf] %v7820_v33  ;;  %2789 = vst [vmem:[#allocation2 + $0xc4] sm:$0xf] %v7820_v33  ;;  %v6666_v30 = vpop.f32.mrf.mxu1 }
 0x16d   : > { %2790 = vst [vmem:[#allocation2 + $0xc8] sm:$0x1] %v7820_v33  ;;  %2791 = vst [vmem:[#allocation2 + $0xcc] sm:$0xf] %v7820_v33  ;;  %v6667_v27 = vadd.f32 %v6666_v30, %v6665_v3 }
 0x16e   : > { %2792 = vst [vmem:[#allocation2 + $0xd0] sm:$0xf] %v7820_v33  ;;  %2793 = vst [vmem:[#allocation2 + $0xd4] sm:$0x1] %v7820_v33  ;;  %v6726_v33 = vpop.f32.mrf.mxu0  ;;  %v6668_v26 = vpop.f32.mrf.mxu1 }
 0x16f   : > { %v9134_v8 = vadd.f32 %v6667_v27, %v9064_v19 }
 0x170   : > { %v6727_v12 = vpop.f32.mrf.mxu0  ;;  %v6669_v60 = vpop.f32.mrf.mxu1 }
 0x171   : > { %v6728_v53 = vadd.f32 %v6727_v12, %v6726_v33  ;;  %v6670_v38 = vadd.f32 %v6669_v60, %v6668_v26  ;;  %v9149_v12 = vld [vmem:[#allocation2 + $0x4] sm:$0xf]  ;;  %v7728_v26 = vld [vmem:[%s10994_s2 + $0x88] sm:$0xff]  }
 0x172   : > { %v6729_v7 = vpop.f32.mrf.mxu0  ;;  %v6671_v19 = vpop.f32.mrf.mxu1  ;;  %v3395_v30 = vshll.u32 %v9149_v12, 16 }
 0x173   : > { %v9131_v20 = vadd.f32 %v6728_v53, %v8952_v5  ;;  %v6558_v5 = vadd.f32 %v9071_v59, %v9066_v25  ;;  %v7725_v25 = vld [vmem:[%s10994_s2 + $0x40] sm:$0xff]  }
 0x174   : > { %v6730_v10 = vpop.f32.mrf.mxu0  ;;  %v6672_v53 = vpop.f32.mrf.mxu1  ;;  %6957 = vmatprep.subr.bf16.mxu1 %v7725_v25 }
 0x175   : > { %v6731_v45 = vadd.f32 %v6730_v10, %v6729_v7  ;;  %v9151_v28 = vadd.f32 %v6670_v38, %v6558_v5  ;;  %v7726_v7 = vld [vmem:[%s10994_s2] sm:$0xff]   ;;  %v3399_v10 = vshrl.u32 %v9149_v12, 16  ;;  %v6673_v27 = vadd.f32 %v6672_v53, %v6671_v19  ;;  %v3333_v5 = vld [vmem:[#allocation2 + $0x8] sm:$0x1] }
 0x176   : > { %v6732_v43 = vpop.f32.mrf.mxu0  ;;  %6958 = vmatpush3.bf16.msra.mxu1 %v7726_v7  ;;  %v3397_v38 = vrot.slane %v3395_v30, 5  ;;  %v3405_v25 = vshll.u32 %v3333_v5, 16 }
 0x177   : > { %v9137_v2 = vadd.f32 %v6731_v45, %v8963_v16  ;;  %v9147_v16 = vld [vmem:[#allocation2] sm:$0xf]  ;;  %v9173_v29 = vadd.f32 %v6673_v27, %v8815_v11 }
 0x178   : > { %v6733_v35 = vpop.f32.mrf.mxu0  ;;  %v3386_v59 = vshrl.u32 %v9147_v16, 16  ;;  %v3389_v50 = vshll.u32 %v9147_v16, 16  ;;  %v3407_v7 = vrot.slane %v3405_v25, 5 }
 0x179   : > { %v6734_v33 = vadd.f32 %v6733_v35, %v6732_v43  ;;  %v6674_v35 = vpop.f32.mrf.mxu1 }
 0x17a   : > { %v6735_v13 = vpop.f32.mrf.mxu0  ;;  %v3388_v43 = vrot.slane %v3386_v59, 4  ;;  %v3391_v60 = vrot.slane %v3389_v50, 5 }
 0x17b   : > { %v9154_v14 = vadd.f32 %v6734_v33, %v8973_v21  ;;  %v7727_v21 = vld [vmem:[%s10994_s2 + $0xc8] sm:$0xff]   ;;  %v3401_v33 = vrot.slane %v3399_v10, 4  ;;  %v6675_v53 = vpop.f32.mrf.mxu1 }
 0x17c   : > { %v6736_v3 = vpop.f32.mrf.mxu0  ;;  %7067 = vmatprep.subr.bf16.mxu0 %v7727_v21  ;;  %v6676_v50 = vadd.f32 %v6675_v53, %v6674_v35  ;;  %v3819_v35 = vrot.slane %v9149_v12, 5 }
 0x17d   : > { %v6737_v45 = vadd.f32 %v6736_v3, %v6735_v13  ;;  %7068 = vmatpush3.bf16.msra.mxu0 %v7728_v26  ;;  %v3392_v13 = vor.u32 %v3391_v60, %v3388_v43  ;;  %v3402_v59 = vor.u32 %v3401_v33, %v3397_v38  ;;  %v6677_v21 = vpop.f32.mrf.mxu1 }
 0x17e   : > { %v6738_v15 = vpop.f32.mrf.mxu0  ;;  %v9179_v10 = vadd.f32 %v6676_v50, %v8819_v58  ;;  %v7729_v58 = vld [vmem:[%s10994_s2 + $0xc0] sm:$0xff]  }
 0x17f   : > { %v9176_v19 = vadd.f32 %v6737_v45, %v8983_v44  ;;  %v3393_v42 = vrot.slane %v3392_v13, 4  ;;  %v3403_v30 = vrot.slane %v3402_v59, 4  ;;  %v6678_v27 = vpop.f32.mrf.mxu1  ;;  %7069 = vmatprep.subr.bf16.mxu0 %v7729_v58 }
 0x180   : > { %v6739_v3 = vpop.f32.mrf.mxu0  ;;  %v6679_v43 = vadd.f32 %v6678_v27, %v6677_v21 }
 0x181   : > { %v6740_v48 = vadd.f32 %v6739_v3, %v6738_v15  ;;  %v3398_v44 = vsel %vm7962_vm2, %v3393_v42, %v3397_v38  ;;  %v3408_v26 = vsel %vm7962_vm2, %v3403_v30, %v3407_v7  ;;  %v6680_v33 = vpop.f32.mrf.mxu1  ;;  %v3821_v38 = vrot.slane %v3819_v35, 4 }
 0x182   : > { %v6741_v57 = vpop.f32.mrf.mxu0  ;;  %v6314_v15 = vcombine.low %v3398_v44, %v3408_v26  ;;  %v9195_v42 = vadd.f32 %v6679_v43, %v8836_v36  ;;  %v3822_v3 = vrot.slane %v3333_v5, 5 }
 0x183   : > { %v9182_v11 = vadd.f32 %v6740_v48, %v8996_v24  ;;  %v6298_v48 = vcombine.low %v9147_v16, %v9149_v12  ;;  %v6681_v25 = vpop.f32.mrf.mxu1 }
 0x184   : > { %v6742_v45 = vpop.f32.mrf.mxu0  ;;  %4821 = vmatprep.mubr.bf16.mxu1 %v6314_v15  ;;  %v6682_v59 = vadd.f32 %v6681_v25, %v6680_v33 }
 0x185   : > { %v6743_v60 = vadd.f32 %v6742_v45, %v6741_v57  ;;  %v7731_v57 = vld [vmem:[%s10994_s2 + $0x80] sm:$0xff]   ;;  %4822 = vmatmul.mubr.bf16.vlgmr.msra.gmra.mxu1 %v6298_v48  ;;  %v6683_v12 = vpop.f32.mrf.mxu1 }
 0x186   : > { %v6744_v13 = vpop.f32.mrf.mxu0  ;;  %7070 = vmatpush3.bf16.msra.mxu0 %v7731_v57  ;;  %v9208_v7 = vadd.f32 %v6682_v59, %v8848_v54 }
 0x187   : > { %v9198_v24 = vadd.f32 %v6743_v60, %v9017_v46  ;;  %v9205_v46 = vsel %vm8158_vm5, %v3821_v38, %v3822_v3  ;;  %v6684_v30 = vpop.f32.mrf.mxu1 }
 0x188   : > { %v6745_v53 = vpop.f32.mrf.mxu0  ;;  %11117 = vst [vmem:[#allocation11_spill] sm:$0xff] %v9205_v46  ;;  %v6685_v5 = vadd.f32 %v6684_v30, %v6683_v12 }
 0x189   : > { %v6746_v50 = vadd.f32 %v6745_v53, %v6744_v13  ;;  %v6686_v45 = vpop.f32.mrf.mxu1 }
 0x18a   : > { %v6747_v36 = vpop.f32.mrf.mxu0  ;;  %v9214_v43 = vadd.f32 %v6685_v5, %v8860_v47 }
 0x18b   : > { %v9211_v21 = vadd.f32 %v6746_v50, %v9025_v62  ;;  %v6687_v15 = vpop.f32.mrf.mxu1 }
 0x18c   : > { %v6748_v44 = vpop.f32.mrf.mxu0  ;;  %v6688_v13 = vadd.f32 %v6687_v15, %v6686_v45 }
 0x18d   : > { %v6749_v27 = vadd.f32 %v6748_v44, %v6747_v36  ;;  %v6689_v58 = vpop.f32.mrf.mxu1 }
 0x18e   : > { %v6750_v26 = vpop.f32.mrf.mxu0  ;;  %v9220_v62 = vadd.f32 %v6688_v13, %v8872_v40 }
 0x18f   : > { %v9217_v60 = vadd.f32 %v6749_v27, %v9045_v39  ;;  %v6690_v57 = vpop.f32.mrf.mxu1  ;;  %v6280_v39 = vrot.slane %v9147_v16, 9 }
 0x190   : > { %v6751_v33 = vpop.f32.mrf.mxu0  ;;  %v6691_v53 = vadd.f32 %v6690_v57, %v6689_v58 }
 0x191   : > { %v6752_v54 = vadd.f32 %v6751_v33, %v6750_v26  ;;  %v6692_v3 = vpop.f32.mrf.mxu1  ;;  %v9236_v27 = vsel %vm8158_vm5, %v6280_v39, %v3819_v35 }
 0x192   : > { %v6753_v48 = vpop.f32.mrf.mxu0  ;;  %v9227_v50 = vadd.f32 %v6691_v53, %v8886_v18  ;;  %11118 = vst [vmem:[#allocation14_spill] sm:$0xff] %v9236_v27 }
 0x193   : > { %v9223_v38 = vadd.f32 %v6752_v54, %v9056_v34  ;;  %v6693_v36 = vpop.f32.mrf.mxu1 }
 0x194   : > { %v6754_v25 = vpop.f32.mrf.mxu0  ;;  %v6694_v30 = vadd.f32 %v6693_v36, %v6692_v3 }
 0x195   : > { %v6755_v47 = vadd.f32 %v6754_v25, %v6753_v48  ;;  %v9232_v5 = vpop.f32.mrf.mxu1 }
 0x196   : > { %v6756_v59 = vpop.f32.mrf.mxu0  ;;  %v9239_v45 = vadd.f32 %v6694_v30, %v8890_v31 }
 0x197   : > { %v9230_v12 = vadd.f32 %v6755_v47, %v9069_v4  ;;  %v9246_v26 = vpop.f32.mrf.mxu1  ;;  %v7734_v47 = vld [vmem:[%s10994_s2 + $0x178] sm:$0xff]  }
 0x198   : > { %v6757_v40 = vpop.f32.mrf.mxu0  ;;  %7167 = vmatprep.subr.bf16.mxu1 %v7734_v47 }
 0x199   : > { %v6758_v44 = vadd.f32 %v6757_v40, %v6756_v59  ;;  %v9248_v13 = vpop.f32.mrf.mxu1 }
 0x19a   : > { %v6759_v34 = vpop.f32.mrf.mxu0 }
 0x19b   : > { %v9242_v18 = vadd.f32 %v6758_v44, %v9074_v22  ;;  %v9253_v58 = vpop.f32.mrf.mxu1 }
 0x19c   : > { %v6760_v16 = vpop.f32.mrf.mxu0 }
 0x19d   : > { %v6761_v15 = vadd.f32 %v6760_v16, %v6759_v34  ;;  %v9255_v22 = vpop.f32.mrf.mxu1 }
 0x19e   : > { %v6762_v33 = vpop.f32.mrf.mxu0 }
 0x19f   : > { %v9251_v54 = vadd.f32 %v6761_v15, %v9083_v9  ;;  %v9260_v53 = vpop.f32.mrf.mxu1  ;;  %v7735_v9 = vld [vmem:[%s10994_s2 + $0x138] sm:$0xff]  }
 0x1a0   : > { %v6763_v35 = vpop.f32.mrf.mxu0  ;;  %7168 = vmatpush3.bf16.msra.mxu1 %v7735_v9  ;;  %v7736_v15 = vld [vmem:[%s10994_s2 + $0x1f8] sm:$0xff]  }
 0x1a1   : > { %v6764_v31 = vadd.f32 %v6763_v35, %v6762_v33  ;;  %v9268_v39 = vpop.f32.mrf.mxu1  ;;  %7279 = vmatprep.subr.bf16.mxu0 %v7736_v15 }
 0x1a2   : > { %v6765_v48 = vpop.f32.mrf.mxu0 }
 0x1a3   : > { %v9258_v57 = vadd.f32 %v6764_v31, %v9090_v1  ;;  %v9273_v40 = vpop.f32.mrf.mxu1 }
 0x1a4   : > { %v6766_v25 = vpop.f32.mrf.mxu0 }
 0x1a5   : > { %11119 = vst [vmem:[#allocation16_spill] sm:$0xff] %v9258_v57  ;;  %v6767_v3 = vadd.f32 %v6766_v25, %v6765_v48  ;;  %v9275_v34 = vpop.f32.mrf.mxu1 }
 0x1a6   : > { %v6768_v59 = vpop.f32.mrf.mxu0 }
 0x1a7   : > { %v9271_v36 = vadd.f32 %v6767_v3, %v9096_v63  ;;  %v9283_v35 = vpop.f32.mrf.mxu1 }
 0x1a8   : > { %v6769_v1 = vpop.f32.mrf.mxu0 }
 0x1a9   : > { %11120 = vst [vmem:[#allocation24_spill] sm:$0xff] %v9271_v36  ;;  %v6770_v30 = vadd.f32 %v6769_v1, %v6768_v59  ;;  %v9285_v48 = vpop.f32.mrf.mxu1 }
 0x1aa   : > { %v6771_v44 = vpop.f32.mrf.mxu0 }
 0x1ab   : > { %v9278_v16 = vadd.f32 %v6770_v30, %v9103_v6  ;;  %v9290_v9 = vpop.f32.mrf.mxu1 }
 0x1ac   : > { %v6772_v33 = vpop.f32.mrf.mxu0 }
 0x1ad   : > { %11121 = vst [vmem:[#allocation25_spill] sm:$0xff] %v9278_v16  ;;  %v6773_v63 = vadd.f32 %v6772_v33, %v6771_v44  ;;  %v9292_v59 = vpop.f32.mrf.mxu1 }
 0x1ae   : > { %v6774_v31 = vpop.f32.mrf.mxu0 }
 0x1af   : > { %v9288_v25 = vadd.f32 %v6773_v63, %v9115_v23  ;;  %v9297_v4 = vpop.f32.mrf.mxu1 }
 0x1b0   : > { %v6775_v47 = vpop.f32.mrf.mxu0 }
 0x1b1   : > { %11122 = vst [vmem:[#allocation26_spill] sm:$0xff] %v9288_v25  ;;  %v6776_v6 = vadd.f32 %v6775_v47, %v6774_v31  ;;  %v9299_v33 = vpop.f32.mrf.mxu1 }
 0x1b2   : > { %v6777_v3 = vpop.f32.mrf.mxu0 }
 0x1b3   : > { %v9295_v1 = vadd.f32 %v6776_v6, %v9128_v32  ;;  %v9304_v56 = vpop.f32.mrf.mxu1 }
 0x1b4   : > { %v6778_v30 = vpop.f32.mrf.mxu0 }
 0x1b5   : > { %11123 = vst [vmem:[#allocation27_spill] sm:$0xff] %v9295_v1  ;;  %v6779_v44 = vadd.f32 %v6778_v30, %v6777_v3  ;;  %v9306_v55 = vpop.f32.mrf.mxu1 }
 0x1b6   : > { %v6780_v15 = vpop.f32.mrf.mxu0 }
 0x1b7   : > { %v9302_v23 = vadd.f32 %v6779_v44, %v9134_v8  ;;  %v9311_v52 = vpop.f32.mrf.mxu1 }
 0x1b8   : > { %v6781_v63 = vpop.f32.mrf.mxu0 }
 0x1b9   : > { %11124 = vst [vmem:[#allocation28_spill] sm:$0xff] %v9302_v23  ;;  %v6782_v31 = vadd.f32 %v6781_v63, %v6780_v15  ;;  %v9313_v1 = vpop.f32.mrf.mxu1 }
 0x1ba   : > { %v6783_v47 = vpop.f32.mrf.mxu0 }
 0x1bb   : > { %v9309_v32 = vadd.f32 %v6782_v31, %v9151_v28  ;;  %v9318_v41 = vpop.f32.mrf.mxu1 }
 0x1bc   : > { %v6784_v6 = vpop.f32.mrf.mxu0 }
 0x1bd   : > { %11125 = vst [vmem:[#allocation29_spill] sm:$0xff] %v9309_v32  ;;  %v6785_v3 = vadd.f32 %v6784_v6, %v6783_v47  ;;  %v9320_v37 = vpop.f32.mrf.mxu1 }
 0x1be   : > { %v6786_v30 = vpop.f32.mrf.mxu0 }
 0x1bf   : > { %v9316_v8 = vadd.f32 %v6785_v3, %v9173_v29  ;;  %v9325_v32 = vpop.f32.mrf.mxu1 }
 0x1c0   : > { %v6787_v44 = vpop.f32.mrf.mxu0 }
 0x1c1   : > { %11126 = vst [vmem:[#allocation30_spill] sm:$0xff] %v9316_v8  ;;  %v6788_v15 = vadd.f32 %v6787_v44, %v6786_v30  ;;  %v6856_v25 = vpop.f32.mrf.mxu1 }
 0x1c2   : > { %v6789_v63 = vpop.f32.mrf.mxu0 }
 0x1c3   : > { %v9323_v28 = vadd.f32 %v6788_v15, %v9179_v10  ;;  %v6857_v3 = vpop.f32.mrf.mxu1  ;;  %v7740_v15 = vld [vmem:[%s10994_s2 + $0x170] sm:$0xff]  }
 0x1c4   : > { %v6790_v31 = vpop.f32.mrf.mxu0  ;;  %7169 = vmatprep.subr.bf16.mxu1 %v7740_v15 }
 0x1c5   : > { %11127 = vst [vmem:[#allocation31_spill] sm:$0xff] %v9323_v28  ;;  %v6791_v47 = vadd.f32 %v6790_v31, %v6789_v63  ;;  %v6859_v30 = vpop.f32.mrf.mxu1  ;;  %v7741_v63 = vld [vmem:[%s10994_s2 + $0x130] sm:$0xff]  }
 0x1c6   : > { %v6792_v6 = vpop.f32.mrf.mxu0  ;;  %7170 = vmatpush3.bf16.msra.mxu1 %v7741_v63 }
 0x1c7   : > { %v9328_v23 = vadd.f32 %v6791_v47, %v9195_v42  ;;  %v6860_v10 = vpop.f32.mrf.mxu1 }
 0x1c8   : > { %v6793_v29 = vpop.f32.mrf.mxu0 }
 0x1c9   : > { %11128 = vst [vmem:[#allocation32_spill] sm:$0xff] %v9328_v23  ;;  %v6794_v8 = vadd.f32 %v6793_v29, %v6792_v6  ;;  %v6862_v47 = vpop.f32.mrf.mxu1 }
 0x1ca   : > { %v6795_v46 = vpop.f32.mrf.mxu0 }
 0x1cb   : > { %v9331_v44 = vadd.f32 %v6794_v8, %v9208_v7  ;;  %v6863_v8 = vpop.f32.mrf.mxu1 }
 0x1cc   : > { %v6796_v27 = vpop.f32.mrf.mxu0 }
 0x1cd   : > { %11129 = vst [vmem:[#allocation33_spill] sm:$0xff] %v9331_v44  ;;  %v6797_v42 = vadd.f32 %v6796_v27, %v6795_v46  ;;  %v6865_v44 = vpop.f32.mrf.mxu1  ;;  %v6831_v46 = vadd.f32 %v9260_v53, %v9255_v22  ;;  %v6840_v53 = vadd.f32 %v9290_v9, %v9285_v48  ;;  %v6852_v9 = vadd.f32 %v9318_v41, %v9313_v1 }
 0x1ce   : > { %v6798_v31 = vpop.f32.mrf.mxu0 }
 0x1cf   : > { %v9340_v6 = vadd.f32 %v6797_v42, %v9214_v43  ;;  %v6866_v36 = vpop.f32.mrf.mxu1  ;;  %v6825_v43 = vadd.f32 %v9246_v26, %v9232_v5  ;;  %v6828_v42 = vadd.f32 %v9253_v58, %v9248_v13  ;;  %v2351_v5 = vadd.f32 %v6831_v46, %v9099_v51  ;;  %v9366_v13 = vld [vmem:[%s10996_s4] ss:$0 sm:$0xff] }
 0x1d0   : > { %v6799_v7 = vpop.f32.mrf.mxu0  ;;  %v6846_v58 = vadd.f32 %v9304_v56, %v9299_v33  ;;  %v6849_v51 = vadd.f32 %v9311_v52, %v9306_v55  ;;  %v9388_v55 = vadd.f32 %v6840_v53, %v9131_v20  ;;  %v6858_v33 = vadd.f32 %v6857_v3, %v6856_v25 }
 0x1d1   : > { %v6800_v29 = vadd.f32 %v6799_v7, %v6798_v31  ;;  %v6868_v15 = vpop.f32.mrf.mxu1  ;;  %v6837_v31 = vadd.f32 %v9283_v35, %v9275_v34  ;;  %v2346_v56 = vadd.f32 %v6828_v42, %v9093_v0  ;;  %v6867_v42 = vadd.f32 %v6866_v36, %v6865_v44 }
 0x1d2   : > { %v6801_v28 = vpop.f32.mrf.mxu0  ;;  %v9397_v25 = vadd.f32 %v6849_v51, %v9176_v19 }
 0x1d3   : > { %v9343_v23 = vadd.f32 %v6800_v29, %v9220_v62  ;;  %v6834_v62 = vadd.f32 %v9273_v40, %v9268_v39  ;;  %v6869_v22 = vpop.f32.mrf.mxu1 }
 0x1d4   : > { %v6802_v16 = vpop.f32.mrf.mxu0  ;;  %v6870_v20 = vadd.f32 %v6869_v22, %v6868_v15 }
 0x1d5   : > { %v6803_v27 = vadd.f32 %v6802_v16, %v6801_v28  ;;  %v6871_v26 = vpop.f32.mrf.mxu1  ;;  %v2354_v48 = vadd.f32 %v6834_v62, %v9106_v61  ;;  %v6861_v61 = vadd.f32 %v6860_v10, %v6859_v30  ;;  %v9402_v30 = vadd.f32 %v6852_v9, %v9182_v11 }
 0x1d6   : > { %v6804_v57 = vpop.f32.mrf.mxu0 }
 0x1d7   : > { %v9350_v63 = vadd.f32 %v6803_v27, %v9227_v50  ;;  %v6843_v50 = vadd.f32 %v9297_v4, %v9292_v59  ;;  %v9379_v4 = vld [vmem:[%s10997_s5] ss:$0 sm:$0xff]  ;;  %v6872_v34 = vpop.f32.mrf.mxu1  ;;  %v6855_v59 = vadd.f32 %v9325_v32, %v9320_v37  ;;  %v2370_v27 = vadd.f32 %v6846_v58, %v9154_v14 }
 0x1d8   : > { %v6805_v7 = vpop.f32.mrf.mxu0  ;;  %v9413_v19 = vadd.f32 %v6861_v61, %v9217_v60  ;;  %v7746_v61 = vld [vmem:[%s10994_s2 + $0x168] sm:$0xff]  }
 0x1d9   : > { %v6806_v16 = vadd.f32 %v6805_v7, %v6804_v57  ;;  %v2343_v57 = vadd.f32 %v6825_v43, %v9086_v49  ;;  %v6874_v29 = vpop.f32.mrf.mxu1  ;;  %v6864_v43 = vadd.f32 %v6863_v8, %v6862_v47  ;;  %v9407_v44 = vadd.f32 %v6855_v59, %v9198_v24  ;;  %7171 = vmatprep.subr.bf16.mxu1 %v7746_v61 }
 0x1da   : > { %v7457_v28 = vpop.f32.mrf.mxu0  ;;  %v9410_v47 = vadd.f32 %v6858_v33, %v9211_v21  ;;  %v9423_v24 = vadd.f32 %v6870_v20, %v9242_v18 }
 0x1db   : > { %v9371_v39 = vadd.f32 %v6806_v16, %v9239_v45  ;;  %v2512_v40 = vadd.f32 %v7457_v28, %v2351_v5  ;;  %v2359_v45 = vadd.f32 %v6837_v31, %v9118_v17  ;;  %v2367_v17 = vadd.f32 %v6843_v50, %v9137_v2  ;;  %v6875_v62 = vpop.f32.mrf.mxu1 }
 0x1dc   : > { %v2503_v35 = vpop.f32.mrf.mxu0  ;;  %v9420_v16 = vadd.f32 %v6867_v42, %v9230_v12  ;;  %v9426_v21 = vadd.f32 %v6864_v43, %v9223_v38  ;;  %v9428_v5 = vadd.f32 %v6872_v34, %v6871_v26  ;;  %v9430_v58 = vadd.f32 %v6875_v62, %v6874_v29  ;;  %v3226_v34 = vld [vmem:[#allocation2 + $0x18] sm:$0xf]  ;;  %v3217_v43 = vld [vmem:[#allocation2 + $0xc] sm:$0xf] }
 0x1dd   : > { %v2639_v49 = vmul.f32 %v9366_v13, %v2512_v40  ;;  %v2504_v52 = vadd.f32 %v2503_v35, %v2343_v57  ;;  %v9404_v10 = vpop.f32.mrf.mxu1 }
 0x1de   : > { %v7458_v0 = vpop.f32.mrf.mxu0 }
 0x1df   : > { %v2678_v46 = vadd.f32 %v9379_v4, %v2639_v49  ;;  %v2637_v41 = vmul.f32 %v9366_v13, %v2504_v52  ;;  %v2515_v1 = vadd.f32 %v7458_v0, %v2354_v48  ;;  %v9417_v22 = vpop.f32.mrf.mxu1 }
 0x1e0   : > { %v2506_v37 = vpop.f32.mrf.mxu0 }
 0x1e1   : > { %v2710_v32 = vmax.f32 %v2678_v46, 0.0  ;;  %v2676_v2 = vadd.f32 %v9379_v4, %v2637_v41  ;;  %v2640_v3 = vmul.f32 %v9366_v13, %v2515_v1  ;;  %v2507_v14 = vadd.f32 %v2506_v37, %v2346_v56  ;;  %v9434_v12 = vpop.f32.mrf.mxu1  ;;  %v7747_v41 = vld [vmem:[%s10994_s2 + $0x128] sm:$0xff]  }
 0x1e2   : > { %v7461_v36 = vpop.f32.mrf.mxu0  ;;  %7172 = vmatpush3.bf16.msra.mxu1 %v7747_v41  ;;  %v3240_v41 = vld [vmem:[#allocation2 + $0x30] sm:$0xf] }
 0x1e3   : > { %v6441_v8 = vpack.c.bf16 %v2710_v32, %v2710_v32  ;;  %v2708_v15 = vmax.f32 %v2676_v2, 0.0  ;;  %v2679_v31 = vadd.f32 %v9379_v4, %v2640_v3  ;;  %v2528_v7 = vadd.f32 %v7461_v36, %v2367_v17  ;;  %v9444_v59 = vpop.f32.mrf.mxu1 }
 0x1e4   : > { %v2638_v11 = vmul.f32 %v9366_v13, %v2507_v14  ;;  %v2519_v53 = vpop.f32.mrf.mxu0 }
 0x1e5   : > { %v2911_v60 = vshrl.u32 %v6441_v8, 16  ;;  %v6439_v50 = vpack.c.bf16 %v2708_v15, %v2708_v15  ;;  %v2711_v28 = vmax.f32 %v2679_v31, 0.0  ;;  %v2643_v57 = vmul.f32 %v9366_v13, %v2528_v7  ;;  %v9453_v37 = vpop.f32.mrf.mxu1  ;;  %v3230_v31 = vld [vmem:[#allocation2 + $0x20] sm:$0x1] }
 0x1e6   : > { %v2677_v40 = vadd.f32 %v9379_v4, %v2638_v11  ;;  %v2520_v51 = vadd.f32 %v2519_v53, %v2359_v45  ;;  %v7462_v35 = vpop.f32.mrf.mxu0  ;;  %v2914_v48 = vshll.u32 %v6441_v8, 16 }
 0x1e7   : > { %v2913_v18 = vrot.slane %v2911_v60, 7  ;;  %v2894_v56 = vshrl.u32 %v6439_v50, 16  ;;  %v6442_v38 = vpack.c.bf16 %v2711_v28, %v2711_v28  ;;  %v2897_v9 = vshll.u32 %v6439_v50, 16  ;;  %v9469_v60 = vpop.f32.mrf.mxu1 }
 0x1e8   : > { %v2709_v49 = vmax.f32 %v2677_v40, 0.0  ;;  %v2682_v52 = vadd.f32 %v9379_v4, %v2643_v57  ;;  %v2641_v45 = vmul.f32 %v9366_v13, %v2520_v51  ;;  %v2522_v33 = vpop.f32.mrf.mxu0  ;;  %v2531_v46 = vadd.f32 %v7462_v35, %v2370_v27 }
 0x1e9   : > { %v2916_v29 = vor.u32 %v2914_v48, %v2913_v18  ;;  %v2896_v0 = vrot.slane %v2894_v56, 7  ;;  %v2919_v17 = vshrl.u32 %v6442_v38, 16  ;;  %v2917_v1 = vrot.slane %v2913_v18, 4  ;;  %v9479_v61 = vpop.f32.mrf.mxu1 }
 0x1ea   : > { %v6440_v42 = vpack.c.bf16 %v2709_v49, %v2709_v49  ;;  %v2714_v20 = vmax.f32 %v2682_v52, 0.0  ;;  %v2680_v62 = vadd.f32 %v9379_v4, %v2641_v45  ;;  %v7465_v32 = vpop.f32.mrf.mxu0  ;;  %v2922_v36 = vshll.u32 %v6442_v38, 16  ;;  %v3223_v49 = vld [vmem:[#allocation2 + $0x14] sm:$0x1] }
 0x1eb   : > { %v3227_v2 = vsel %vm9438_vm11, %v2916_v29, %v3226_v34  ;;  %v2899_v3 = vor.u32 %v2897_v9, %v2896_v0  ;;  %v2921_v14 = vrot.slane %v2919_v17, 7  ;;  %v2900_v8 = vrot.slane %v2896_v0, 4 }
 0x1ec   : > { %3228 = vst [vmem:[#allocation2 + $0x18] sm:$0xf] %v3227_v2  ;;  %v2902_v7 = vshrl.u32 %v6440_v42, 16  ;;  %v6445_v11 = vpack.c.bf16 %v2714_v20, %v2714_v20  ;;  %v2712_v53 = vmax.f32 %v2680_v62, 0.0  ;;  %v2535_v50 = vpop.f32.mrf.mxu0  ;;  %v2644_v51 = vmul.f32 %v9366_v13, %v2531_v46 }
 0x1ed   : > { %v3218_v28 = vsel %vm9438_vm11, %v2899_v3, %v3217_v43  ;;  %v2924_v40 = vor.u32 %v2922_v36, %v2921_v14  ;;  %v2926_v57 = vrot.slane %v2921_v14, 4  ;;  %v2905_v18 = vshll.u32 %v6440_v42, 16 }
 0x1ee   : > { %3219 = vst [vmem:[#allocation2 + $0xc] sm:$0xf] %v3218_v28  ;;  %v2904_v35 = vrot.slane %v2902_v7, 7  ;;  %v2945_v48 = vshrl.u32 %v6445_v11, 16  ;;  %v6443_v56 = vpack.c.bf16 %v2712_v53, %v2712_v53  ;;  %v7466_v38 = vpop.f32.mrf.mxu0  ;;  %v2948_v52 = vshll.u32 %v6445_v11, 16  ;;  %v11136_v53 = vld [vmem:[#allocation16_spill] sm:$0xff] }
 0x1ef   : > { %v2925_v34 = vsel %vm9459_vm12, %v2917_v1, %v2924_v40  ;;  %v3231_v9 = vsel %vm9465_vm13, %v2926_v57, %v3230_v31  ;;  %v2683_v45 = vadd.f32 %v9379_v4, %v2644_v51  ;;  %v2523_v42 = vadd.f32 %v2522_v33, %v9388_v55  ;;  %v7752_v31 = vld [vmem:[%s10994_s2 + $0x160] sm:$0xff]   ;;  %v9498_v33 = vpop.f32.mrf.mxu1 }
 0x1f0   : > { %3229 = vst [vmem:[#allocation2 + $0x1c] sm:$0xf] %v2925_v34  ;;  %3232 = vst [vmem:[#allocation2 + $0x20] sm:$0x1] %v3231_v9  ;;  %v2907_v29 = vor.u32 %v2905_v18, %v2904_v35  ;;  %v2909_v0 = vrot.slane %v2904_v35, 4  ;;  %v2947_v17 = vrot.slane %v2945_v48, 7  ;;  %v2544_v1 = vadd.f32 %v7465_v32, %v9407_v44  ;;  %v2538_v20 = vpop.f32.mrf.mxu0  ;;  %7173 = vmatprep.subr.bf16.mxu1 %v7752_v31 }
 0x1f1   : > { %v2928_v46 = vshrl.u32 %v6443_v56, 16  ;;  %v2715_v43 = vmax.f32 %v2683_v45, 0.0  ;;  %v9485_v62 = vadd.f32 %v9428_v5, %v9251_v54  ;;  %v2931_v36 = vshll.u32 %v6443_v56, 16  ;;  %v7753_v34 = vld [vmem:[%s10994_s2 + $0x120] sm:$0xff]   ;;  %v3244_v9 = vld [vmem:[#allocation2 + $0x38] sm:$0x1] }
 0x1f2   : > { %v2908_v2 = vsel %vm9459_vm12, %v2900_v8, %v2907_v29  ;;  %v3224_v3 = vsel %vm9465_vm13, %v2909_v0, %v3223_v49  ;;  %v2950_v14 = vor.u32 %v2948_v52, %v2947_v17  ;;  %v2642_v54 = vmul.f32 %v9366_v13, %v2523_v42  ;;  %v3233_v8 = vld [vmem:[#allocation2 + $0x24] sm:$0xf]  ;;  %v7469_v18 = vpop.f32.mrf.mxu0  ;;  %7174 = vmatpush3.bf16.msra.mxu1 %v7753_v34 }
 0x1f3   : > { %3220 = vst [vmem:[#allocation2 + $0x10] sm:$0xf] %v2908_v2  ;;  %3225 = vst [vmem:[#allocation2 + $0x14] sm:$0x1] %v3224_v3  ;;  %v9494_v55 = vrot.slane %v2928_v46, 7  ;;  %v6446_v44 = vpack.c.bf16 %v2715_v43, %v2715_v43  ;;  %v2647_v5 = vmul.f32 %v9366_v13, %v2544_v1  ;;  %v2536_v7 = vadd.f32 %v2535_v50, %v9397_v25 }
 0x1f4   : > { %v3241_v32 = vsel %vm9438_vm11, %v2950_v14, %v3240_v41  ;;  %v2547_v11 = vadd.f32 %v7466_v38, %v9410_v47  ;;  %v9506_v28 = vadd.f32 %v9430_v58, %v11136_v53  ;;  %v2951_v40 = vrot.slane %v2947_v17, 4  ;;  %v2551_v41 = vpop.f32.mrf.mxu0 }
 0x1f5   : > { %3242 = vst [vmem:[#allocation2 + $0x30] sm:$0xf] %v3241_v32  ;;  %v9510_v57 = vadd.f32 %v9417_v22, %v9404_v10  ;;  %v2933_v51 = vor.u32 %v2931_v36, %v9494_v55  ;;  %v2953_v35 = vshrl.u32 %v6446_v44, 16  ;;  %v2681_v48 = vadd.f32 %v9379_v4, %v2642_v54  ;;  %v9520_v22 = vpop.f32.mrf.mxu1 }
 0x1f6   : > { %v2686_v25 = vadd.f32 %v9379_v4, %v2647_v5  ;;  %v2645_v47 = vmul.f32 %v9366_v13, %v2536_v7  ;;  %v2648_v58 = vmul.f32 %v9366_v13, %v2547_v11  ;;  %v2956_v38 = vshll.u32 %v6446_v44, 16  ;;  %v7470_v53 = vpop.f32.mrf.mxu0 }
 0x1f7   : > { %v3234_v50 = vsel %vm9438_vm11, %v2933_v51, %v3233_v8  ;;  %v2955_v56 = vrot.slane %v2953_v35, 7  ;;  %v2539_v10 = vadd.f32 %v2538_v20, %v9402_v30  ;;  %v2713_v49 = vmax.f32 %v2681_v48, 0.0  ;;  %v9535_v31 = vpop.f32.mrf.mxu1  ;;  %v3237_v51 = vld [vmem:[#allocation2 + $0x2c] sm:$0x1] }
 0x1f8   : > { %3235 = vst [vmem:[#allocation2 + $0x24] sm:$0xf] %v3234_v50  ;;  %v2718_v52 = vmax.f32 %v2686_v25, 0.0  ;;  %v2684_v45 = vadd.f32 %v9379_v4, %v2645_v47  ;;  %v2687_v29 = vadd.f32 %v9379_v4, %v2648_v58  ;;  %v2560_v30 = vadd.f32 %v7469_v18, %v9420_v16  ;;  %v3254_v47 = vld [vmem:[#allocation2 + $0x48] sm:$0xf] }
 0x1f9   : > { %v2958_v0 = vor.u32 %v2956_v38, %v2955_v56  ;;  %v2960_v17 = vrot.slane %v2955_v56, 4  ;;  %v2646_v46 = vmul.f32 %v9366_v13, %v2539_v10  ;;  %v6444_v43 = vpack.c.bf16 %v2713_v49, %v2713_v49  ;;  %v9544_v50 = vpop.f32.mrf.mxu1 }
 0x1fa   : > { %v6449_v42 = vpack.c.bf16 %v2718_v52, %v2718_v52  ;;  %v2716_v1 = vmax.f32 %v2684_v45, 0.0  ;;  %v2719_v20 = vmax.f32 %v2687_v29, 0.0  ;;  %v2651_v36 = vmul.f32 %v9366_v13, %v2560_v30  ;;  %v2554_v29 = vpop.f32.mrf.mxu0 }
 0x1fb   : > { %v2959_v2 = vsel %vm9459_vm12, %v2951_v40, %v2958_v0  ;;  %v3245_v3 = vsel %vm9465_vm13, %v2960_v17, %v3244_v9  ;;  %v2685_v14 = vadd.f32 %v9379_v4, %v2646_v46  ;;  %v9539_v16 = vadd.f32 %v9444_v59, %v9434_v12  ;;  %v3247_v17 = vld [vmem:[#allocation2 + $0x3c] sm:$0xf]  ;;  %v3258_v46 = vld [vmem:[#allocation2 + $0x50] sm:$0x1] }
 0x1fc   : > { %3243 = vst [vmem:[#allocation2 + $0x34] sm:$0xf] %v2959_v2  ;;  %3246 = vst [vmem:[#allocation2 + $0x38] sm:$0x1] %v3245_v3  ;;  %v2936_v44 = vshrl.u32 %v6444_v43, 16  ;;  %v2939_v54 = vshll.u32 %v6444_v43, 16  ;;  %v6447_v32 = vpack.c.bf16 %v2716_v1, %v2716_v1  ;;  %v6450_v8 = vpack.c.bf16 %v2719_v20, %v2719_v20  ;;  %v6893_v2 = vpop.f32.mrf.mxu1 }
 0x1fd   : > { %v2979_v5 = vshrl.u32 %v6449_v42, 16  ;;  %v2717_v7 = vmax.f32 %v2685_v14, 0.0  ;;  %v2690_v11 = vadd.f32 %v9379_v4, %v2651_v36  ;;  %v2982_v18 = vshll.u32 %v6449_v42, 16 }
 0x1fe   : > { %v2938_v40 = vrot.slane %v2936_v44, 7  ;;  %v2552_v48 = vadd.f32 %v2551_v41, %v9413_v19  ;;  %v2934_v25 = vrot.slane %v9494_v55, 4  ;;  %v2962_v12 = vshrl.u32 %v6447_v32, 16  ;;  %v7758_v41 = vld [vmem:[%s10994_s2 + $0x158] sm:$0xff]  }
 0x1ff   : > { %v2981_v35 = vrot.slane %v2979_v5, 7  ;;  %v2965_v59 = vshll.u32 %v6447_v32, 16  ;;  %v2987_v58 = vshrl.u32 %v6450_v8, 16  ;;  %v2990_v34 = vshll.u32 %v6450_v8, 16  ;;  %7175 = vmatprep.subr.bf16.mxu1 %v7758_v41 }
 0x200   : > { %v2941_v56 = vor.u32 %v2939_v54, %v2938_v40  ;;  %v2943_v38 = vrot.slane %v2938_v40, 4  ;;  %v2964_v9 = vrot.slane %v2962_v12, 7  ;;  %v6448_v52 = vpack.c.bf16 %v2717_v7, %v2717_v7  ;;  %v7759_v54 = vld [vmem:[%s10994_s2 + $0x118] sm:$0xff]  }
 0x201   : > { %v2984_v10 = vor.u32 %v2982_v18, %v2981_v35  ;;  %v2989_v49 = vrot.slane %v2987_v58, 7  ;;  %v2722_v45 = vmax.f32 %v2690_v11, 0.0  ;;  %v2649_v30 = vmul.f32 %v9366_v13, %v2552_v48  ;;  %v7473_v11 = vpop.f32.mrf.mxu0  ;;  %7176 = vmatpush3.bf16.msra.mxu1 %v7759_v54  ;;  %v3251_v48 = vld [vmem:[#allocation2 + $0x44] sm:$0x1] }
 0x202   : > { %v2942_v19 = vsel %vm9459_vm12, %v2934_v25, %v2941_v56  ;;  %v3238_v55 = vsel %vm9465_vm13, %v2943_v38, %v3237_v51  ;;  %v2985_v43 = vrot.slane %v2981_v35, 4  ;;  %v2967_v42 = vor.u32 %v2965_v59, %v2964_v9  ;;  %v6895_v59 = vpop.f32.mrf.mxu1  ;;  %v11137_v58 = vld [vmem:[#allocation24_spill] sm:$0xff] }
 0x203   : > { %v3255_v0 = vsel %vm9438_vm11, %v2984_v10, %v3254_v47  ;;  %3236 = vst [vmem:[#allocation2 + $0x28] sm:$0xf] %v2942_v19  ;;  %3239 = vst [vmem:[#allocation2 + $0x2c] sm:$0x1] %v3238_v55  ;;  %v2992_v1 = vor.u32 %v2990_v34, %v2989_v49  ;;  %v2994_v20 = vrot.slane %v2989_v49, 4  ;;  %v2968_v3 = vrot.slane %v2964_v9, 4 }
 0x204   : > { %3256 = vst [vmem:[#allocation2 + $0x48] sm:$0xf] %v3255_v0  ;;  %v2970_v14 = vshrl.u32 %v6448_v52, 16  ;;  %v6453_v36 = vpack.c.bf16 %v2722_v45, %v2722_v45  ;;  %v2688_v44 = vadd.f32 %v9379_v4, %v2649_v30  ;;  %v3248_v5 = vsel %vm9438_vm11, %v2967_v42, %v3247_v17  ;;  %v3268_v9 = vld [vmem:[#allocation2 + $0x60] sm:$0xf] }
 0x205   : > { %v2993_v32 = vsel %vm9459_vm12, %v2985_v43, %v2992_v1  ;;  %v3259_v8 = vsel %vm9465_vm13, %v2994_v20, %v3258_v46  ;;  %v2563_v7 = vadd.f32 %v7470_v53, %v9423_v24  ;;  %3249 = vst [vmem:[#allocation2 + $0x3c] sm:$0xf] %v3248_v5  ;;  %v2973_v51 = vshll.u32 %v6448_v52, 16  ;;  %v9600_v43 = vld [vmem:[#allocation2 + $0xc] sm:$0xf] }
 0x206   : > { %3257 = vst [vmem:[#allocation2 + $0x4c] sm:$0xf] %v2993_v32  ;;  %3260 = vst [vmem:[#allocation2 + $0x50] sm:$0x1] %v3259_v8  ;;  %v2972_v40 = vrot.slane %v2970_v14, 7  ;;  %v3013_v35 = vshrl.u32 %v6453_v36, 16  ;;  %v2555_v12 = vadd.f32 %v2554_v29, %v9426_v21  ;;  %v2415_v56 = vadd.f32 %v9510_v57, %v11137_v58  ;;  %v2567_v21 = vpop.f32.mrf.mxu0 }
 0x207   : > { %v2720_v18 = vmax.f32 %v2688_v44, 0.0  ;;  %v3016_v25 = vshll.u32 %v6453_v36, 16  ;;  %v2652_v47 = vmul.f32 %v9366_v13, %v2563_v7  ;;  %v9575_v34 = vadd.f32 %v9469_v60, %v9453_v37 }
 0x208   : > { %v2975_v24 = vor.u32 %v2973_v51, %v2972_v40  ;;  %v2977_v53 = vrot.slane %v2972_v40, 4  ;;  %v9571_v38 = vrot.slane %v3013_v35, 7  ;;  %v2650_v52 = vmul.f32 %v9366_v13, %v2555_v12  ;;  %v7474_v32 = vpop.f32.mrf.mxu0  ;;  %v7737_v12 = vld [vmem:[%s10994_s2 + $0x1b8] sm:$0xff]  }
 0x209   : > { %v6451_v10 = vpack.c.bf16 %v2720_v18, %v2720_v18  ;;  %v2691_v49 = vadd.f32 %v9379_v4, %v2652_v47  ;;  %v2576_v45 = vadd.f32 %v7473_v11, %v2415_v56  ;;  %v9581_v29 = vadd.f32 %v9498_v33, %v9479_v61  ;;  %v6896_v61 = vpop.f32.mrf.mxu1  ;;  %v3272_v18 = vld [vmem:[#allocation2 + $0x68] sm:$0x1] }
 0x20a   : > { %v2976_v57 = vsel %vm9459_vm12, %v2968_v3, %v2975_v24  ;;  %v3252_v19 = vsel %vm9465_vm13, %v2977_v53, %v3251_v48  ;;  %v3018_v37 = vor.u32 %v3016_v25, %v9571_v38  ;;  %v9590_v60 = vadd.f32 %v9535_v31, %v9520_v22  ;;  %v3261_v3 = vld [vmem:[#allocation2 + $0x54] sm:$0xf]  ;;  %v11138_v25 = vld [vmem:[#allocation25_spill] sm:$0xff] }
 0x20b   : > { %3250 = vst [vmem:[#allocation2 + $0x40] sm:$0xf] %v2976_v57  ;;  %3253 = vst [vmem:[#allocation2 + $0x44] sm:$0x1] %v3252_v19  ;;  %v2996_v55 = vshrl.u32 %v6451_v10, 16  ;;  %v2723_v0 = vmax.f32 %v2691_v49, 0.0  ;;  %v2689_v17 = vadd.f32 %v9379_v4, %v2650_v52  ;;  %v9596_v46 = vadd.f32 %v6893_v2, %v9544_v50  ;;  %v2570_v52 = vpop.f32.mrf.mxu0 }
 0x20c   : > { %v3269_v33 = vsel %vm9438_vm11, %v3018_v37, %v3268_v9  ;;  %v2655_v30 = vmul.f32 %v9366_v13, %v2576_v45  ;;  %v2568_v41 = vadd.f32 %v2567_v21, %v9485_v62  ;;  %v2999_v31 = vshll.u32 %v6451_v10, 16  ;;  %v9609_v2 = vld [vmem:[#allocation2 + $0x10] sm:$0xf] }
 0x20d   : > { %3270 = vst [vmem:[#allocation2 + $0x60] sm:$0xf] %v3269_v33  ;;  %v9602_v22 = vrot.slane %v2996_v55, 7  ;;  %v6454_v42 = vpack.c.bf16 %v2723_v0, %v2723_v0  ;;  %v2721_v1 = vmax.f32 %v2689_v17, 0.0  ;;  %v3019_v20 = vrot.slane %v9571_v38, 4  ;;  %v7742_v53 = vld [vmem:[%s10994_s2 + $0x1f0] sm:$0xff]  }
 0x20e   : > { %v2694_v14 = vadd.f32 %v9379_v4, %v2655_v30  ;;  %v9606_v36 = vadd.f32 %v6896_v61, %v6895_v59  ;;  %v2653_v50 = vmul.f32 %v9366_v13, %v2568_v41  ;;  %v3410_v54 = vshrl.u32 %v9600_v43, 16  ;;  %v7764_v38 = vld [vmem:[%s10994_s2 + $0x150] sm:$0xff]   ;;  %v11140_v0 = vld [vmem:[#allocation11_spill] sm:$0xff] }
 0x20f   : > { %v3001_v62 = vor.u32 %v2999_v31, %v9602_v22  ;;  %v3021_v44 = vshrl.u32 %v6454_v42, 16  ;;  %v3413_v5 = vshll.u32 %v9600_v43, 16  ;;  %v3024_v8 = vshll.u32 %v6454_v42, 16  ;;  %v7765_v45 = vld [vmem:[%s10994_s2 + $0x110] sm:$0xff]   ;;  %v9641_v61 = vld [vmem:[#allocation2 + $0x18] sm:$0xf]  ;;  %7177 = vmatprep.subr.bf16.mxu1 %v7764_v38 }
 0x210   : > { %v6452_v7 = vpack.c.bf16 %v2721_v1, %v2721_v1  ;;  %v2726_v11 = vmax.f32 %v2694_v14, 0.0  ;;  %v2692_v40 = vadd.f32 %v9379_v4, %v2653_v50  ;;  %v9619_v48 = vcombine.low %v9600_v43, %v9609_v2  ;;  %v11139_v55 = vld [vmem:[#allocation14_spill] sm:$0xff]  ;;  %v3265_v41 = vld [vmem:[#allocation2 + $0x5c] sm:$0x1]  ;;  %7178 = vmatpush3.bf16.msra.mxu1 %v7765_v45  ;;  %v9653_v50 = vpop.f32.mrf.mxu1  ;;  %v11142_v45 = vld [vmem:[#allocation28_spill] sm:$0xff] }
 0x211   : > { %v3262_v51 = vsel %vm9438_vm11, %v3001_v62, %v3261_v3  ;;  %v3023_v35 = vrot.slane %v3021_v44, 7  ;;  %v2418_v47 = vadd.f32 %v9539_v16, %v11138_v25  ;;  %v3423_v24 = vshrl.u32 %v9609_v2, 16  ;;  %v7743_v42 = vld [vmem:[%s10994_s2 + $0x1b0] sm:$0xff]   ;;  %v9655_v62 = vld [vmem:[#allocation2 + $0x1c] sm:$0xf]  ;;  %v7748_v44 = vld [vmem:[%s10994_s2 + $0x1e8] sm:$0xff]  }
 0x212   : > { %3263 = vst [vmem:[#allocation2 + $0x54] sm:$0xf] %v3262_v51  ;;  %v3004_v59 = vshrl.u32 %v6452_v7, 16  ;;  %v6457_v58 = vpack.c.bf16 %v2726_v11, %v2726_v11  ;;  %v2724_v56 = vmax.f32 %v2692_v40, 0.0  ;;  %v3002_v16 = vrot.slane %v9602_v22, 4  ;;  %4982 = vmatprep.mubr.bf16.mxu0 %v9619_v48  ;;  %v7477_v51 = vpop.f32.mrf.mxu0 }
 0x213   : > { %v3026_v10 = vor.u32 %v3024_v8, %v3023_v35  ;;  %v3028_v9 = vrot.slane %v3023_v35, 4  ;;  %v2579_v49 = vadd.f32 %v7474_v32, %v2418_v47  ;;  %v3007_v57 = vshll.u32 %v6452_v7, 16  ;;  %v3282_v32 = vld [vmem:[#allocation2 + $0x78] sm:$0xf] }
 0x214   : > { %v3006_v21 = vrot.slane %v3004_v59, 7  ;;  %v3047_v19 = vshrl.u32 %v6457_v58, 16  ;;  %v6455_v37 = vpack.c.bf16 %v2724_v56, %v2724_v56  ;;  %v11141_v17 = vcombine.low %v11139_v55, %v11140_v0 }
 0x215   : > { %v3027_v33 = vsel %vm9459_vm12, %v3019_v20, %v3026_v10  ;;  %v3273_v30 = vsel %vm9465_vm13, %v3028_v9, %v3272_v18  ;;  %v3050_v22 = vshll.u32 %v6457_v58, 16  ;;  %v2656_v31 = vmul.f32 %v9366_v13, %v2579_v49  ;;  %v9682_v9 = vpop.f32.mrf.mxu1 }
 0x216   : > { %4983 = vmatmul.mubr.bf16.vlgmr.msra.gmra.mxu0 %v11141_v17  ;;  %3271 = vst [vmem:[#allocation2 + $0x64] sm:$0xf] %v3027_v33  ;;  %3274 = vst [vmem:[#allocation2 + $0x68] sm:$0x1] %v3273_v30  ;;  %v3009_v1 = vor.u32 %v3007_v57, %v3006_v21  ;;  %v3011_v3 = vrot.slane %v3006_v21, 4  ;;  %v9651_v14 = vrot.slane %v3047_v19, 7  ;;  %v9674_v56 = vcombine.low %v9641_v61, %v9655_v62  ;;  %v2583_v17 = vpop.f32.mrf.mxu0 }
 0x217   : > { %7280 = vmatpush3.bf16.msra.mxu0 %v7737_v12  ;;  %v3030_v20 = vshrl.u32 %v6455_v37, 16  ;;  %v6281_v8 = vrot.slane %v9600_v43, 9  ;;  %v3826_v7 = vrot.slane %v9609_v2, 5  ;;  %v2695_v11 = vadd.f32 %v9379_v4, %v2656_v31  ;;  %v7754_v57 = vld [vmem:[%s10994_s2 + $0x1e0] sm:$0xff]   ;;  %v9697_v30 = vld [vmem:[#allocation2 + $0x14] sm:$0x1] }
 0x218   : > { %7281 = vmatprep.subr.bf16.mxu0 %v7742_v53  ;;  %v3434_v40 = vshrl.u32 %v9641_v61, 16  ;;  %v3010_v35 = vsel %vm9459_vm12, %v3002_v16, %v3009_v1  ;;  %v3266_v18 = vsel %vm9465_vm13, %v3011_v3, %v3265_v41  ;;  %v3052_v25 = vor.u32 %v3050_v22, %v9651_v14  ;;  %v7749_v53 = vld [vmem:[%s10994_s2 + $0x1a8] sm:$0xff]   ;;  %4990 = vmatprep.mubr.bf16.mxu0 %v9674_v56  ;;  %v7755_v3 = vld [vmem:[%s10994_s2 + $0x1a0] sm:$0xff]  }
 0x219   : > { %v3437_v47 = vshll.u32 %v9641_v61, 16  ;;  %3264 = vst [vmem:[#allocation2 + $0x58] sm:$0xf] %v3010_v35  ;;  %3267 = vst [vmem:[#allocation2 + $0x5c] sm:$0x1] %v3266_v18  ;;  %v9670_v12 = vrot.slane %v3030_v20, 7  ;;  %v2571_v49 = vadd.f32 %v2570_v52, %v9506_v28  ;;  %v2431_v21 = vadd.f32 %v9590_v60, %v11142_v45 }
 0x21a   : > { %v3033_v59 = vshll.u32 %v6455_v37, 16  ;;  %v2727_v58 = vmax.f32 %v2695_v11, 0.0  ;;  %v3283_v38 = vsel %vm9438_vm11, %v3052_v25, %v3282_v32  ;;  %v3275_v16 = vld [vmem:[#allocation2 + $0x6c] sm:$0xf]  ;;  %v3447_v10 = vshrl.u32 %v9655_v62, 16  ;;  %v11143_v60 = vld [vmem:[#allocation26_spill] sm:$0xff] }
 0x21b   : > { %7282 = vmatpush3.bf16.msra.mxu0 %v7743_v42  ;;  %v3053_v19 = vrot.slane %v9651_v14, 4  ;;  %3284 = vst [vmem:[#allocation2 + $0x78] sm:$0xf] %v3283_v38  ;;  %v6282_v0 = vrot.slane %v9641_v61, 9  ;;  %v2654_v28 = vmul.f32 %v9366_v13, %v2571_v49  ;;  %v2592_v52 = vadd.f32 %v7477_v51, %v2431_v21  ;;  %v9709_v14 = vpop.f32.mrf.mxu1  ;;  %v3286_v18 = vld [vmem:[#allocation2 + $0x80] sm:$0x1] }
 0x21c   : > { %7283 = vmatprep.subr.bf16.mxu0 %v7748_v44  ;;  %v3035_v37 = vor.u32 %v3033_v59, %v9670_v12  ;;  %v6458_v55 = vpack.c.bf16 %v2727_v58, %v2727_v58  ;;  %v2423_v33 = vadd.f32 %v9575_v34, %v11143_v60  ;;  %v3412_v41 = vrot.slane %v3410_v54, 4  ;;  %v7761_v21 = vld [vmem:[%s10994_s2 + $0x198] sm:$0xff]  }
 0x21d   : > { %v3415_v1 = vrot.slane %v3413_v5, 5  ;;  %v2693_v34 = vadd.f32 %v9379_v4, %v2654_v28  ;;  %v2659_v54 = vmul.f32 %v9366_v13, %v2592_v52  ;;  %v3419_v44 = vshll.u32 %v9609_v2, 16  ;;  %v7760_v5 = vld [vmem:[%s10994_s2 + $0x1d8] sm:$0xff]   ;;  %v7766_v28 = vld [vmem:[%s10994_s2 + $0x1d0] sm:$0xff]  }
 0x21e   : > { %v3276_v22 = vsel %vm9438_vm11, %v3035_v37, %v3275_v16  ;;  %v3055_v31 = vshrl.u32 %v6458_v55, 16  ;;  %v3058_v42 = vshll.u32 %v6458_v55, 16  ;;  %v2584_v20 = vadd.f32 %v2583_v17, %v2423_v33  ;;  %v6902_v37 = vpop.f32.mrf.mxu1 }
 0x21f   : > { %7284 = vmatpush3.bf16.msra.mxu0 %v7749_v53  ;;  %3277 = vst [vmem:[#allocation2 + $0x6c] sm:$0xf] %v3276_v22  ;;  %v3416_v11 = vor.u32 %v3415_v1, %v3412_v41  ;;  %v3425_v51 = vrot.slane %v3423_v24, 4  ;;  %v3429_v35 = vshll.u32 %v9697_v30, 16  ;;  %v2725_v25 = vmax.f32 %v2693_v34, 0.0 }
 0x220   : > { %7285 = vmatprep.subr.bf16.mxu0 %v7754_v57  ;;  %v3057_v32 = vrot.slane %v3055_v31, 7  ;;  %v2698_v59 = vadd.f32 %v9379_v4, %v2659_v54  ;;  %v2657_v58 = vmul.f32 %v9366_v13, %v2584_v20  ;;  %v3421_v53 = vrot.slane %v3419_v44, 5  ;;  %v7771_v31 = vld [vmem:[%s10994_s2 + $0x108] sm:$0xff]   ;;  %v7478_v54 = vpop.f32.mrf.mxu0 }
 0x221   : > { %v3036_v38 = vrot.slane %v9670_v12, 4  ;;  %v3417_v45 = vrot.slane %v3416_v11, 4  ;;  %v6456_v24 = vpack.c.bf16 %v2725_v25, %v2725_v25  ;;  %v7770_v12 = vld [vmem:[%s10994_s2 + $0x148] sm:$0xff]   ;;  %v3431_v22 = vrot.slane %v3429_v35, 5  ;;  %v7767_v11 = vld [vmem:[%s10994_s2 + $0x190] sm:$0xff]  }
 0x222   : > { %v3060_v16 = vor.u32 %v3058_v42, %v3057_v32  ;;  %v3062_v49 = vrot.slane %v3057_v32, 4  ;;  %v2730_v57 = vmax.f32 %v2698_v59, 0.0  ;;  %v2696_v55 = vadd.f32 %v9379_v4, %v2657_v58  ;;  %7179 = vmatprep.subr.bf16.mxu1 %v7770_v12  ;;  %v9755_v59 = vpop.f32.mrf.mxu1  ;;  %v3279_v58 = vld [vmem:[#allocation2 + $0x74] sm:$0x1]  ;;  %v9774_v12 = vld [vmem:[#allocation2 + $0x28] sm:$0xf] }
 0x223   : > { %7286 = vmatpush3.bf16.msra.mxu0 %v7755_v3  ;;  %v3426_v17 = vor.u32 %v3425_v51, %v3421_v53  ;;  %v3422_v41 = vsel %vm7962_vm2, %v3417_v45, %v3421_v53  ;;  %v3038_v42 = vshrl.u32 %v6456_v24, 16  ;;  %v3829_v34 = vrot.slane %v9697_v30, 5  ;;  %7180 = vmatpush3.bf16.msra.mxu1 %v7771_v31 }
 0x224   : > { %7287 = vmatprep.subr.bf16.mxu0 %v7760_v5  ;;  %v3061_v52 = vsel %vm9459_vm12, %v3053_v19, %v3060_v16  ;;  %v3287_v60 = vsel %vm9465_vm13, %v3062_v49, %v3286_v18  ;;  %v6461_v1 = vpack.c.bf16 %v2730_v57, %v2730_v57  ;;  %v2728_v3 = vmax.f32 %v2696_v55, 0.0  ;;  %v11145_v5 = vld [vmem:[#allocation29_spill] sm:$0xff] }
 0x225   : > { %3285 = vst [vmem:[#allocation2 + $0x7c] sm:$0xf] %v3061_v52  ;;  %3288 = vst [vmem:[#allocation2 + $0x80] sm:$0x1] %v3287_v60  ;;  %v3041_v19 = vshll.u32 %v6456_v24, 16  ;;  %v3427_v20 = vrot.slane %v3426_v17, 4  ;;  %v2434_v32 = vadd.f32 %v9596_v46, %v11145_v5  ;;  %v3827_v25 = vsel %vm8158_vm5, %v6281_v8, %v3826_v7  ;;  %v2586_v52 = vpop.f32.mrf.mxu0 }
 0x226   : > { %v3828_v44 = vrot.slane %v3826_v7, 4  ;;  %v3040_v51 = vrot.slane %v3038_v42, 7  ;;  %v3081_v35 = vshrl.u32 %v6461_v1, 16  ;;  %v6459_v18 = vpack.c.bf16 %v2728_v3, %v2728_v3  ;;  %v7772_v46 = vld [vmem:[%s10994_s2 + $0x1c8] sm:$0xff]   ;;  %v3296_v8 = vld [vmem:[#allocation2 + $0x90] sm:$0xf]  ;;  %v6905_v42 = vpop.f32.mrf.mxu1 }
 0x227   : > { %7288 = vmatpush3.bf16.msra.mxu0 %v7761_v21  ;;  %v3084_v53 = vshll.u32 %v6461_v1, 16  ;;  %v3432_v16 = vsel %vm7962_vm2, %v3427_v20, %v3431_v22  ;;  %v2595_v49 = vadd.f32 %v7478_v54, %v2434_v32  ;;  %v3833_v24 = vrot.slane %v9655_v62, 5  ;;  %v7773_v60 = vld [vmem:[%s10994_s2 + $0x188] sm:$0xff]   ;;  %v7481_v32 = vpop.f32.mrf.mxu0 }
 0x228   : > { %7289 = vmatprep.subr.bf16.mxu0 %v7766_v28  ;;  %v3830_v2 = vsel %vm8158_vm5, %v3828_v44, %v3829_v34  ;;  %v3043_v43 = vor.u32 %v3041_v19, %v3040_v51  ;;  %v3045_v45 = vrot.slane %v3040_v51, 4  ;;  %v9764_v21 = vrot.slane %v3081_v35, 7  ;;  %v9772_v28 = vld [vmem:[#allocation2 + $0x24] sm:$0xf] }
 0x229   : > { %v3064_v7 = vshrl.u32 %v6459_v18, 16  ;;  %v9767_v57 = vcombine.low %v3422_v41, %v3432_v16  ;;  %v9769_v55 = vcombine.low %v3827_v25, %v3830_v2  ;;  %v2660_v17 = vmul.f32 %v9366_v13, %v2595_v49  ;;  %v3289_v19 = vld [vmem:[#allocation2 + $0x84] sm:$0xf]  ;;  %v11147_v2 = vld [vmem:[#allocation27_spill] sm:$0xff] }
 0x22a   : > { %v9781_v22 = vadd.f32 %v9682_v9, %v9653_v50  ;;  %v3044_v41 = vsel %vm9459_vm12, %v3036_v38, %v3043_v43  ;;  %v3280_v13 = vsel %vm9465_vm13, %v3045_v45, %v3279_v58  ;;  %v3086_v31 = vor.u32 %v3084_v53, %v9764_v21  ;;  %v3339_v9 = vld [vmem:[#allocation2 + $0x20] sm:$0x1] }
 0x22b   : > { %7290 = vmatpush3.bf16.msra.mxu0 %v7767_v11  ;;  %3278 = vst [vmem:[#allocation2 + $0x70] sm:$0xf] %v3044_v41  ;;  %3281 = vst [vmem:[#allocation2 + $0x74] sm:$0x1] %v3280_v13  ;;  %v6903_v1 = vadd.f32 %v6902_v37, %v9709_v14  ;;  %v9789_v3 = vrot.slane %v3064_v7, 7  ;;  %v3067_v34 = vshll.u32 %v6459_v18, 16  ;;  %4829 = vmatprep.mubr.bf16.mxu1 %v9767_v57  ;;  %v9813_v18 = vpop.f32.mrf.mxu1 }
 0x22c   : > { %7291 = vmatprep.subr.bf16.mxu0 %v7772_v46  ;;  %4991 = vmatmul.mubr.bf16.gmra.mxu0 %v9769_v55  ;;  %v2699_v50 = vadd.f32 %v9379_v4, %v2660_v17  ;;  %v3087_v38 = vrot.slane %v9764_v21, 4  ;;  %v3297_v54 = vsel %vm9438_vm11, %v3086_v31, %v3296_v8  ;;  %v3458_v14 = vshrl.u32 %v9772_v28, 16  ;;  %v11148_v8 = vld [vmem:[#allocation32_spill] sm:$0xff]  ;;  %v2599_v17 = vpop.f32.mrf.mxu0 }
 0x22d   : > { %4830 = vmatmul.mubr.bf16.gmra.mxu1 %v9619_v48  ;;  %v9801_v37 = vcombine.low %v9772_v28, %v9774_v12  ;;  %3298 = vst [vmem:[#allocation2 + $0x90] sm:$0xf] %v3297_v54  ;;  %v3069_v20 = vor.u32 %v3067_v34, %v9789_v3  ;;  %v3461_v4 = vshll.u32 %v9772_v28, 16  ;;  %v3436_v5 = vrot.slane %v3434_v40, 4  ;;  %v6908_v31 = vpop.f32.mrf.mxu1  ;;  %v11149_v34 = vld [vmem:[#allocation30_spill] sm:$0xff]  ;;  %v7779_v54 = vld [vmem:[%s10994_s2 + $0x180] sm:$0xff]  }
 0x22e   : > { %v2731_v44 = vmax.f32 %v2699_v50, 0.0  ;;  %v3439_v48 = vrot.slane %v3437_v47, 5  ;;  %v3443_v11 = vshll.u32 %v9655_v62, 16  ;;  %v3449_v51 = vrot.slane %v3447_v10, 4  ;;  %v9849_v62 = vld [vmem:[%s10996_s4] ss:$0 sm:$0xff] }
 0x22f   : > { %7292 = vmatpush3.bf16.msra.mxu0 %v7773_v60  ;;  %4998 = vmatprep.mubr.bf16.mxu0 %v9801_v37  ;;  %v3453_v35 = vshll.u32 %v3339_v9, 16  ;;  %v3290_v25 = vsel %vm9438_vm11, %v3069_v20, %v3289_v19  ;;  %v3471_v40 = vshrl.u32 %v9774_v12, 16  ;;  %v3836_v58 = vrot.slane %v3339_v9, 5  ;;  %v3300_v19 = vld [vmem:[#allocation2 + $0x98] sm:$0x1] }
 0x230   : > { %v6462_v46 = vpack.c.bf16 %v2731_v44, %v2731_v44  ;;  %3291 = vst [vmem:[#allocation2 + $0x84] sm:$0xf] %v3290_v25  ;;  %v3440_v53 = vor.u32 %v3439_v48, %v3436_v5  ;;  %v3445_v16 = vrot.slane %v3443_v11, 5  ;;  %v6906_v47 = vadd.f32 %v6905_v42, %v9755_v59  ;;  %v7776_v59 = vld [vmem:[%s10994_s2 + $0x140] sm:$0xff]  }
 0x231   : > { %v2426_v49 = vadd.f32 %v9581_v29, %v11147_v2  ;;  %v3455_v45 = vrot.slane %v3453_v35, 5  ;;  %v2447_v7 = vadd.f32 %v6903_v1, %v11148_v8  ;;  %v2439_v50 = vadd.f32 %v9606_v36, %v11149_v34  ;;  %v7777_v36 = vld [vmem:[%s10994_s2 + $0x100] sm:$0xff]   ;;  %7181 = vmatprep.subr.bf16.mxu1 %v7776_v59 }
 0x232   : > { %v3089_v43 = vshrl.u32 %v6462_v46, 16  ;;  %v3092_v10 = vshll.u32 %v6462_v46, 16  ;;  %v3441_v60 = vrot.slane %v3440_v53, 4  ;;  %v3450_v41 = vor.u32 %v3449_v51, %v3445_v16  ;;  %v7778_v1 = vld [vmem:[%s10994_s2 + $0x1c0] sm:$0xff]   ;;  %7182 = vmatpush3.bf16.msra.mxu1 %v7777_v36  ;;  %v9866_v53 = vpop.f32.mrf.mxu1 }
 0x233   : > { %v2587_v13 = vadd.f32 %v2586_v52, %v2426_v49  ;;  %v2608_v9 = vadd.f32 %v7481_v32, %v2447_v7  ;;  %v3834_v29 = vsel %vm8158_vm5, %v6282_v0, %v3833_v24  ;;  %v3835_v52 = vrot.slane %v3833_v24, 4  ;;  %7293 = vmatprep.subr.bf16.mxu0 %v7778_v1  ;;  %v9860_v51 = vld [vmem:[%s10997_s5] ss:$0 sm:$0xff] }
 0x234   : > { %v3091_v42 = vrot.slane %v3089_v43, 7  ;;  %v3446_v61 = vsel %vm7962_vm2, %v3441_v60, %v3445_v16  ;;  %v3451_v0 = vrot.slane %v3450_v41, 4  ;;  %v2600_v20 = vadd.f32 %v2599_v17, %v2439_v50  ;;  %7294 = vmatpush3.bf16.msra.mxu0 %v7779_v54  ;;  %v7482_v43 = vpop.f32.mrf.mxu0  ;;  %v9883_v17 = vld [vmem:[#allocation2 + $0x34] sm:$0xf] }
 0x235   : > { %v2658_v24 = vmul.f32 %v9849_v62, %v2587_v13  ;;  %v2663_v32 = vmul.f32 %v9849_v62, %v2608_v9  ;;  %v3837_v48 = vsel %vm8158_vm5, %v3835_v52, %v3836_v58  ;;  %v3070_v60 = vrot.slane %v9789_v3, 4 }
 0x236   : > { %v3094_v44 = vor.u32 %v3092_v10, %v3091_v42  ;;  %v3096_v5 = vrot.slane %v3091_v42, 4  ;;  %v3456_v11 = vsel %vm7962_vm2, %v3451_v0, %v3455_v45  ;;  %v2661_v25 = vmul.f32 %v9849_v62, %v2600_v20  ;;  %v9877_v10 = vld [vmem:[#allocation2 + $0x30] sm:$0xf]  ;;  %v2602_v20 = vpop.f32.mrf.mxu0 }
 0x237   : > { %v2697_v35 = vadd.f32 %v9860_v51, %v2658_v24  ;;  %v9864_v46 = vcombine.low %v3834_v29, %v3837_v48  ;;  %v9874_v2 = vcombine.low %v3446_v61, %v3456_v11  ;;  %v2702_v49 = vadd.f32 %v9860_v51, %v2663_v32 }
 0x238   : > { %v3095_v58 = vsel %vm9459_vm12, %v3087_v38, %v3094_v44  ;;  %v3301_v16 = vsel %vm9465_vm13, %v3096_v5, %v3300_v19  ;;  %v6283_v45 = vrot.slane %v9772_v28, 9  ;;  %v2700_v21 = vadd.f32 %v9860_v51, %v2661_v25  ;;  %v11150_v38 = vld [vmem:[#allocation33_spill] sm:$0xff]  ;;  %v9959_v28 = vld [vmem:[#allocation2 + $0x40] sm:$0xf] }
 0x239   : > { %3299 = vst [vmem:[#allocation2 + $0x94] sm:$0xf] %v3095_v58  ;;  %3302 = vst [vmem:[#allocation2 + $0x98] sm:$0x1] %v3301_v16  ;;  %v2729_v8 = vmax.f32 %v2697_v35, 0.0  ;;  %4999 = vmatmul.mubr.bf16.gmra.mxu0 %v9864_v46  ;;  %v2450_v7 = vadd.f32 %v6906_v47, %v11150_v38  ;;  %v3840_v41 = vrot.slane %v9774_v12, 5  ;;  %4837 = vmatprep.mubr.bf16.mxu1 %v9874_v2  ;;  %v9893_v47 = vpop.f32.mrf.mxu1 }
 0x23a   : > { %v2734_v13 = vmax.f32 %v2702_v49, 0.0  ;;  %v9889_v34 = vadd.f32 %v6908_v31, %v9813_v18  ;;  %v2732_v59 = vmax.f32 %v2700_v21, 0.0  ;;  %4838 = vmatmul.mubr.bf16.gmra.mxu1 %v9674_v56  ;;  %v3482_v9 = vshrl.u32 %v9877_v10, 16  ;;  %v3293_v5 = vld [vmem:[#allocation2 + $0x8c] sm:$0x1] }
 0x23b   : > { %v6460_v50 = vpack.c.bf16 %v2729_v8, %v2729_v8  ;;  %v2611_v42 = vadd.f32 %v7482_v43, %v2450_v7  ;;  %v9897_v3 = vcombine.low %v9877_v10, %v9883_v17  ;;  %v3460_v52 = vrot.slane %v3458_v14, 4  ;;  %v3310_v35 = vld [vmem:[#allocation2 + $0xa8] sm:$0xf]  ;;  %v3342_v38 = vld [vmem:[#allocation2 + $0x2c] sm:$0x1] }
 0x23c   : > { %v6465_v29 = vpack.c.bf16 %v2734_v13, %v2734_v13  ;;  %v3463_v18 = vrot.slane %v3461_v4, 5  ;;  %v6463_v1 = vpack.c.bf16 %v2732_v59, %v2732_v59  ;;  %v3467_v24 = vshll.u32 %v9774_v12, 16  ;;  %v6913_v4 = vpop.f32.mrf.mxu1  ;;  %v3303_v13 = vld [vmem:[#allocation2 + $0x9c] sm:$0xf] }
 0x23d   : > { %v3072_v31 = vshrl.u32 %v6460_v50, 16  ;;  %v3075_v36 = vshll.u32 %v6460_v50, 16  ;;  %v2664_v54 = vmul.f32 %v9849_v62, %v2611_v42  ;;  %5006 = vmatprep.mubr.bf16.mxu0 %v9897_v3  ;;  %v3473_v16 = vrot.slane %v3471_v40, 4  ;;  %v9957_v12 = vld [vmem:[#allocation2 + $0x3c] sm:$0xf] }
 0x23e   : > { %v3115_v19 = vshrl.u32 %v6465_v29, 16  ;;  %v3118_v61 = vshll.u32 %v6465_v29, 16  ;;  %v3464_v0 = vor.u32 %v3463_v18, %v3460_v52  ;;  %v3098_v32 = vshrl.u32 %v6463_v1, 16  ;;  %v7485_v29 = vpop.f32.mrf.mxu0 }
 0x23f   : > { %v3074_v44 = vrot.slane %v3072_v31, 7  ;;  %v3101_v14 = vshll.u32 %v6463_v1, 16  ;;  %v2703_v48 = vadd.f32 %v9860_v51, %v2664_v54  ;;  %v3469_v58 = vrot.slane %v3467_v24, 5  ;;  %v7780_v1 = vld [vmem:[%s10994_s2 + $0x238] sm:$0xff]  }
 0x240   : > { %v9907_v11 = vrot.slane %v3115_v19, 7  ;;  %v3465_v25 = vrot.slane %v3464_v0, 4  ;;  %v9911_v8 = vrot.slane %v3098_v32, 7  ;;  %v3485_v50 = vshll.u32 %v9877_v10, 16  ;;  %v7781_v0 = vld [vmem:[%s10995_s3 + $0x38] sm:$0xff]   ;;  %7487 = vmatprep.subr.bf16.mxu1 %v7780_v1 }
 0x241   : > { %v3077_v49 = vor.u32 %v3075_v36, %v3074_v44  ;;  %v3079_v43 = vrot.slane %v3074_v44, 4  ;;  %v2735_v21 = vmax.f32 %v2703_v48, 0.0  ;;  %v3495_v59 = vshrl.u32 %v9883_v17, 16  ;;  %v6914_v36 = vpop.f32.mrf.mxu1  ;;  %v11151_v32 = vld [vmem:[#allocation31_spill] sm:$0xff]  ;;  %7535 = vmatprep.subr.bf16.mxu0 %v7781_v0 }
 0x242   : > { %v3120_v7 = vor.u32 %v3118_v61, %v9907_v11  ;;  %v3474_v42 = vor.u32 %v3473_v16, %v3469_v58  ;;  %v3103_v18 = vor.u32 %v3101_v14, %v9911_v8  ;;  %v6284_v31 = vrot.slane %v9877_v10, 9 }
 0x243   : > { %v3078_v52 = vsel %vm9459_vm12, %v3070_v60, %v3077_v49  ;;  %v3294_v40 = vsel %vm9465_vm13, %v3079_v43, %v3293_v5  ;;  %v6466_v19 = vpack.c.bf16 %v2735_v21, %v2735_v21  ;;  %v3477_v60 = vshll.u32 %v3342_v38, 16  ;;  %v2615_v43 = vpop.f32.mrf.mxu0 }
 0x244   : > { %3292 = vst [vmem:[#allocation2 + $0x88] sm:$0xf] %v3078_v52  ;;  %3295 = vst [vmem:[#allocation2 + $0x8c] sm:$0x1] %v3294_v40  ;;  %v3311_v54 = vsel %vm9438_vm11, %v3120_v7, %v3310_v35  ;;  %v3475_v61 = vrot.slane %v3474_v42, 4  ;;  %v3121_v24 = vrot.slane %v9907_v11, 4  ;;  %v3304_v44 = vsel %vm9438_vm11, %v3103_v18, %v3303_v13 }
 0x245   : > { %3312 = vst [vmem:[#allocation2 + $0xa8] sm:$0xf] %v3311_v54  ;;  %v3470_v5 = vsel %vm7962_vm2, %v3465_v25, %v3469_v58  ;;  %v2442_v14 = vadd.f32 %v9781_v22, %v11151_v32  ;;  %3305 = vst [vmem:[#allocation2 + $0x9c] sm:$0xf] %v3304_v44  ;;  %v3123_v48 = vshrl.u32 %v6466_v19, 16  ;;  %v3479_v35 = vrot.slane %v3477_v60, 5  ;;  %v6916_v54 = vpop.f32.mrf.mxu1 }
 0x246   : > { %v3843_v16 = vrot.slane %v3342_v38, 5  ;;  %v6915_v49 = vadd.f32 %v6914_v36, %v6913_v4  ;;  %v3126_v21 = vshll.u32 %v6466_v19, 16  ;;  %v2455_v7 = vadd.f32 %v9889_v34, %v9340_v6 }
 0x247   : > { %v2603_v11 = vadd.f32 %v2602_v20, %v2442_v14  ;;  %v3842_v13 = vrot.slane %v3840_v41, 4  ;;  %v3125_v25 = vrot.slane %v3123_v48, 7  ;;  %v3480_v22 = vsel %vm7962_vm2, %v3475_v61, %v3479_v35  ;;  %v3314_v20 = vld [vmem:[#allocation2 + $0xb0] sm:$0x1] }
 0x248   : > { %v2463_v58 = vadd.f32 %v6915_v49, %v9350_v63  ;;  %v3841_v4 = vsel %vm8158_vm5, %v6283_v45, %v3840_v41  ;;  %v9950_v38 = vcombine.low %v3470_v5, %v3480_v22  ;;  %v2616_v34 = vadd.f32 %v2615_v43, %v2455_v7 }
 0x249   : > { %v2662_v6 = vmul.f32 %v9849_v62, %v2603_v11  ;;  %v3844_v42 = vsel %vm8158_vm5, %v3842_v13, %v3843_v16  ;;  %v3128_v52 = vor.u32 %v3126_v21, %v3125_v25  ;;  %v3130_v40 = vrot.slane %v3125_v25, 4  ;;  %v7486_v16 = vpop.f32.mrf.mxu0  ;;  %v6917_v21 = vpop.f32.mrf.mxu1 }
 0x24a   : > { %v2624_v18 = vadd.f32 %v7485_v29, %v2463_v58  ;;  %v9955_v63 = vcombine.low %v3841_v4, %v3844_v42  ;;  %v3847_v45 = vrot.slane %v9883_v17, 5  ;;  %4845 = vmatprep.mubr.bf16.mxu1 %v9950_v38  ;;  %v6912_v41 = vadd.f32 %v9893_v47, %v9866_v53  ;;  %v9975_v53 = vld [vmem:[#allocation2 + $0x38] sm:$0x1] }
 0x24b   : > { %v2701_v36 = vadd.f32 %v9860_v51, %v2662_v6  ;;  %v2665_v1 = vmul.f32 %v9849_v62, %v2616_v34  ;;  %v3104_v29 = vrot.slane %v9911_v8, 4  ;;  %v3129_v19 = vsel %vm9459_vm12, %v3121_v24, %v3128_v52  ;;  %4846 = vmatmul.mubr.bf16.gmra.mxu1 %v9801_v37 }
 0x24c   : > { %v3315_v61 = vsel %vm9465_vm13, %v3130_v40, %v3314_v20  ;;  %v2667_v60 = vmul.f32 %v9849_v62, %v2624_v18  ;;  %5007 = vmatmul.mubr.bf16.gmra.mxu0 %v9955_v63  ;;  %3313 = vst [vmem:[#allocation2 + $0xac] sm:$0xf] %v3129_v19  ;;  %v3506_v8 = vshrl.u32 %v9957_v12, 16  ;;  %v9981_v24 = vcombine.low %v9957_v12, %v9959_v28  ;;  %v2618_v18 = vpop.f32.mrf.mxu0 }
 0x24d   : > { %3316 = vst [vmem:[#allocation2 + $0xb0] sm:$0x1] %v3315_v61  ;;  %v2733_v47 = vmax.f32 %v2701_v36, 0.0  ;;  %v2704_v0 = vadd.f32 %v9860_v51, %v2665_v1  ;;  %v3484_v5 = vrot.slane %v3482_v9, 4  ;;  %v3487_v32 = vrot.slane %v3485_v50, 5 }
 0x24e   : > { %v2706_v44 = vadd.f32 %v9860_v51, %v2667_v60  ;;  %v3491_v14 = vshll.u32 %v9883_v17, 16  ;;  %5014 = vmatprep.mubr.bf16.mxu0 %v9981_v24  ;;  %v3497_v49 = vrot.slane %v3495_v59, 4  ;;  %v3501_v43 = vshll.u32 %v9975_v53, 16  ;;  %v3307_v36 = vld [vmem:[#allocation2 + $0xa4] sm:$0x1] }
 0x24f   : > { %v6464_v48 = vpack.c.bf16 %v2733_v47, %v2733_v47  ;;  %v2736_v35 = vmax.f32 %v2704_v0, 0.0  ;;  %v3509_v7 = vshll.u32 %v9957_v12, 16  ;;  %v3488_v9 = vor.u32 %v3487_v32, %v3484_v5 }
 0x250   : > { %v2738_v11 = vmax.f32 %v2706_v44, 0.0  ;;  %v3493_v13 = vrot.slane %v3491_v14, 5  ;;  %v3519_v22 = vshrl.u32 %v9959_v28, 16  ;;  %v6285_v58 = vrot.slane %v9957_v12, 9  ;;  %v3317_v14 = vld [vmem:[#allocation2 + $0xb4] sm:$0xf] }
 0x251   : > { %v3106_v25 = vshrl.u32 %v6464_v48, 16  ;;  %v6467_v50 = vpack.c.bf16 %v2736_v35, %v2736_v35  ;;  %v3109_v4 = vshll.u32 %v6464_v48, 16  ;;  %v6918_v34 = vadd.f32 %v6917_v21, %v6916_v54 }
 0x252   : > { %v6469_v20 = vpack.c.bf16 %v2738_v11, %v2738_v11  ;;  %v3498_v6 = vor.u32 %v3497_v49, %v3493_v13  ;;  %v3489_v52 = vrot.slane %v3488_v9, 4  ;;  %v3503_v40 = vrot.slane %v3501_v43, 5 }
 0x253   : > { %v3108_v42 = vrot.slane %v3106_v25, 7  ;;  %v3132_v59 = vshrl.u32 %v6467_v50, 16  ;;  %v3135_v19 = vshll.u32 %v6467_v50, 16  ;;  %v2458_v60 = vadd.f32 %v6912_v41, %v9343_v23  ;;  %v3324_v41 = vld [vmem:[#allocation2 + $0xc0] sm:$0xf] }
 0x254   : > { %v3149_v1 = vshrl.u32 %v6469_v20, 16  ;;  %v3499_v61 = vrot.slane %v3498_v6, 4  ;;  %v2466_v5 = vadd.f32 %v6918_v34, %v9371_v39  ;;  %v3152_v54 = vshll.u32 %v6469_v20, 16  ;;  %v10015_v50 = vld [vmem:[#allocation2 + $0x48] sm:$0xf] }
 0x255   : > { %v3111_v47 = vor.u32 %v3109_v4, %v3108_v42  ;;  %v3113_v0 = vrot.slane %v3108_v42, 4  ;;  %v9997_v44 = vrot.slane %v3132_v59, 7  ;;  %v2619_v35 = vadd.f32 %v2618_v18, %v2458_v60  ;;  %v10023_v6 = vld [vmem:[#allocation2 + $0x4c] sm:$0xf] }
 0x256   : > { %v10000_v32 = vrot.slane %v3149_v1, 7  ;;  %v3504_v48 = vsel %vm7962_vm2, %v3499_v61, %v3503_v40  ;;  %v3494_v39 = vsel %vm7962_vm2, %v3489_v52, %v3493_v13  ;;  %v3854_v11 = vrot.slane %v9959_v28, 5 }
 0x257   : > { %v3112_v49 = vsel %vm9459_vm12, %v3104_v29, %v3111_v47  ;;  %v3308_v23 = vsel %vm9465_vm13, %v3113_v0, %v3307_v36  ;;  %v3137_v43 = vor.u32 %v3135_v19, %v9997_v44  ;;  %v10013_v9 = vcombine.low %v3494_v39, %v3504_v48 }
 0x258   : > { %3306 = vst [vmem:[#allocation2 + $0xa0] sm:$0xf] %v3112_v49  ;;  %3309 = vst [vmem:[#allocation2 + $0xa4] sm:$0x1] %v3308_v23  ;;  %v3154_v21 = vor.u32 %v3152_v54, %v10000_v32  ;;  %v2627_v25 = vadd.f32 %v7486_v16, %v2466_v5  ;;  %v3850_v4 = vrot.slane %v9975_v53, 5  ;;  %v2666_v20 = vmul.f32 %v9849_v62, %v2619_v35 }
 0x259   : > { %v3318_v29 = vsel %vm9438_vm11, %v3137_v43, %v3317_v14  ;;  %v3849_v13 = vrot.slane %v3847_v45, 4  ;;  %v3138_v42 = vrot.slane %v9997_v44, 4  ;;  %4853 = vmatprep.mubr.bf16.mxu1 %v10013_v9  ;;  %v3848_v53 = vsel %vm8158_vm5, %v6284_v31, %v3847_v45  ;;  %v10058_v14 = vld [vmem:[#allocation2 + $0x54] sm:$0xf]  ;;  %v10066_v43 = vld [vmem:[#allocation2 + $0x58] sm:$0xf] }
 0x25a   : > { %v3325_v34 = vsel %vm9438_vm11, %v3154_v21, %v3324_v41  ;;  %3319 = vst [vmem:[#allocation2 + $0xb4] sm:$0xf] %v3318_v29  ;;  %v2668_v16 = vmul.f32 %v9849_v62, %v2627_v25  ;;  %v3155_v59 = vrot.slane %v10000_v32, 4  ;;  %v2705_v26 = vadd.f32 %v9860_v51, %v2666_v20  ;;  %4854 = vmatmul.mubr.bf16.gmra.mxu1 %v9897_v3  ;;  %v3348_v62 = vld [vmem:[#allocation2 + $0x44] sm:$0x1] }
 0x25b   : > { %3326 = vst [vmem:[#allocation2 + $0xc0] sm:$0xf] %v3325_v34  ;;  %v3851_v52 = vsel %vm8158_vm5, %v3849_v13, %v3850_v4  ;;  %v3530_v40 = vshrl.u32 %v10015_v50, 16  ;;  %v10047_v10 = vcombine.low %v10015_v50, %v10023_v6  ;;  %v3508_v31 = vrot.slane %v3506_v8, 4 }
 0x25c   : > { %v2707_v17 = vadd.f32 %v9860_v51, %v2668_v16  ;;  %v10043_v18 = vcombine.low %v3848_v53, %v3851_v52  ;;  %v2737_v45 = vmax.f32 %v2705_v26, 0.0  ;;  %v3511_v36 = vrot.slane %v3509_v7, 5  ;;  %v3321_v16 = vld [vmem:[#allocation2 + $0xbc] sm:$0x1] }
 0x25d   : > { %v3515_v1 = vshll.u32 %v9959_v28, 16  ;;  %v3521_v19 = vrot.slane %v3519_v22, 4  ;;  %v3533_v51 = vshll.u32 %v10015_v50, 16  ;;  %v3543_v60 = vshrl.u32 %v10023_v6, 16 }
 0x25e   : > { %v2739_v61 = vmax.f32 %v2707_v17, 0.0  ;;  %5015 = vmatmul.mubr.bf16.gmra.mxu0 %v10043_v18  ;;  %v3525_v47 = vshll.u32 %v3348_v62, 16  ;;  %v6468_v0 = vpack.c.bf16 %v2737_v45, %v2737_v45  ;;  %v3512_v5 = vor.u32 %v3511_v36, %v3508_v31  ;;  %v3351_v17 = vld [vmem:[#allocation2 + $0x50] sm:$0x1] }
 0x25f   : > { %5022 = vmatprep.mubr.bf16.mxu0 %v10047_v10  ;;  %v3517_v8 = vrot.slane %v3515_v1, 5  ;;  %v3856_v54 = vrot.slane %v3854_v11, 4  ;;  %v6286_v28 = vrot.slane %v10015_v50, 9  ;;  %v3861_v22 = vrot.slane %v10023_v6, 5 }
 0x260   : > { %v6470_v7 = vpack.c.bf16 %v2739_v61, %v2739_v61  ;;  %v3857_v48 = vrot.slane %v3348_v62, 5  ;;  %v3140_v35 = vshrl.u32 %v6468_v0, 16  ;;  %v3513_v49 = vrot.slane %v3512_v5, 4 }
 0x261   : > { %v3522_v23 = vor.u32 %v3521_v19, %v3517_v8  ;;  %v3855_v41 = vsel %vm8158_vm5, %v6285_v58, %v3854_v11  ;;  %v3527_v21 = vrot.slane %v3525_v47, 5  ;;  %v3554_v50 = vshrl.u32 %v10058_v14, 16  ;;  %v3328_v11 = vld [vmem:[#allocation2 + $0xc8] sm:$0x1] }
 0x262   : > { %v3157_v39 = vshrl.u32 %v6470_v7, 16  ;;  %v3858_v25 = vsel %vm8158_vm5, %v3856_v54, %v3857_v48  ;;  %v3160_v29 = vshll.u32 %v6470_v7, 16  ;;  %v3142_v4 = vrot.slane %v3140_v35, 7 }
 0x263   : > { %v3143_v20 = vshll.u32 %v6468_v0, 16  ;;  %v3523_v13 = vrot.slane %v3522_v23, 4  ;;  %v3518_v12 = vsel %vm7962_vm2, %v3513_v49, %v3517_v8  ;;  %v10073_v53 = vcombine.low %v3855_v41, %v3858_v25  ;;  %v10099_v8 = vld [vmem:[#allocation2 + $0x60] sm:$0xf]  ;;  %v3354_v41 = vld [vmem:[#allocation2 + $0x5c] sm:$0x1] }
 0x264   : > { %v3159_v34 = vrot.slane %v3157_v39, 7  ;;  %v10077_v58 = vcombine.low %v10058_v14, %v10066_v43  ;;  %v3147_v52 = vrot.slane %v3142_v4, 4  ;;  %v3532_v31 = vrot.slane %v3530_v40, 4 }
 0x265   : > { %v3145_v26 = vor.u32 %v3143_v20, %v3142_v4  ;;  %v3528_v62 = vsel %vm7962_vm2, %v3523_v13, %v3527_v21  ;;  %v3535_v19 = vrot.slane %v3533_v51, 5  ;;  %v3539_v0 = vshll.u32 %v10023_v6, 16 }
 0x266   : > { %v3162_v45 = vor.u32 %v3160_v29, %v3159_v34  ;;  %v3164_v36 = vrot.slane %v3159_v34, 4  ;;  %v10081_v1 = vcombine.low %v3518_v12, %v3528_v62  ;;  %5023 = vmatmul.mubr.bf16.gmra.mxu0 %v10073_v53  ;;  %v3322_v47 = vsel %vm9465_vm13, %v3147_v52, %v3321_v16 }
 0x267   : > { %v3146_v61 = vsel %vm9459_vm12, %v3138_v42, %v3145_v26  ;;  %5030 = vmatprep.mubr.bf16.mxu0 %v10077_v58  ;;  %v3545_v40 = vrot.slane %v3543_v60, 4  ;;  %3323 = vst [vmem:[#allocation2 + $0xbc] sm:$0x1] %v3322_v47  ;;  %v3536_v44 = vor.u32 %v3535_v19, %v3532_v31  ;;  %v3549_v42 = vshll.u32 %v3351_v17, 16  ;;  %v10103_v60 = vld [vmem:[#allocation2 + $0x64] sm:$0xf] }
 0x268   : > { %v3163_v5 = vsel %vm9459_vm12, %v3155_v59, %v3162_v45  ;;  %v3329_v51 = vsel %vm9465_vm13, %v3164_v36, %v3328_v11  ;;  %3320 = vst [vmem:[#allocation2 + $0xb8] sm:$0xf] %v3146_v61  ;;  %4861 = vmatprep.mubr.bf16.mxu1 %v10081_v1  ;;  %v3557_v32 = vshll.u32 %v10058_v14, 16  ;;  %v3541_v6 = vrot.slane %v3539_v0, 5  ;;  %v10135_v47 = vld [vmem:[#allocation2 + $0x70] sm:$0xf] }
 0x269   : > { %3327 = vst [vmem:[#allocation2 + $0xc4] sm:$0xf] %v3163_v5  ;;  %3330 = vst [vmem:[#allocation2 + $0xc8] sm:$0x1] %v3329_v51  ;;  %4862 = vmatmul.mubr.bf16.gmra.mxu1 %v9981_v24  ;;  %v3864_v27 = vrot.slane %v3351_v17, 5  ;;  %v3863_v59 = vrot.slane %v3861_v22, 4  ;;  %v3862_v49 = vsel %vm8158_vm5, %v6286_v28, %v3861_v22  ;;  %v10117_v29 = vcombine.low %v10099_v8, %v10103_v60 }
 0x26a   : > { %v3567_v15 = vshrl.u32 %v10066_v43, 16  ;;  %v3868_v54 = vrot.slane %v10066_v43, 5  ;;  %v3537_v7 = vrot.slane %v3536_v44, 4  ;;  %v3546_v48 = vor.u32 %v3545_v40, %v3541_v6  ;;  %v3357_v51 = vld [vmem:[#allocation2 + $0x68] sm:$0x1] }
 0x26b   : > { %v3551_v35 = vrot.slane %v3549_v42, 5  ;;  %v3865_v23 = vsel %vm8158_vm5, %v3863_v59, %v3864_v27  ;;  %v3578_v21 = vshrl.u32 %v10099_v8, 16  ;;  %v3581_v25 = vshll.u32 %v10099_v8, 16  ;;  %11152 = vst [vmem:[#allocation16_spill] sm:$0xff] %v10117_v29 }
 0x26c   : > { %v10111_v39 = vcombine.low %v3862_v49, %v3865_v23  ;;  %v3547_v4 = vrot.slane %v3546_v48, 4  ;;  %v3556_v20 = vrot.slane %v3554_v50, 4  ;;  %v3559_v13 = vrot.slane %v3557_v32, 5  ;;  %v10126_v50 = vld [vmem:[#allocation2 + $0x6c] sm:$0xf] }
 0x26d   : > { %v3563_v34 = vshll.u32 %v10066_v43, 16  ;;  %v3542_v28 = vsel %vm7962_vm2, %v3537_v7, %v3541_v6  ;;  %v3569_v22 = vrot.slane %v3567_v15, 4  ;;  %v3573_v16 = vshll.u32 %v3354_v41, 16 }
 0x26e   : > { %5031 = vmatmul.mubr.bf16.gmra.mxu0 %v10111_v39  ;;  %v3871_v12 = vrot.slane %v3354_v41, 5  ;;  %v3552_v11 = vsel %vm7962_vm2, %v3547_v4, %v3551_v35  ;;  %v3560_v26 = vor.u32 %v3559_v13, %v3556_v20  ;;  %v3870_v62 = vrot.slane %v3868_v54, 4 }
 0x26f   : > { %5038 = vmatprep.mubr.bf16.mxu0 %v10117_v29  ;;  %v3565_v52 = vrot.slane %v3563_v34, 5  ;;  %v6287_v43 = vrot.slane %v10058_v14, 9  ;;  %v10129_v17 = vcombine.low %v3542_v28, %v3552_v11  ;;  %v3591_v31 = vshrl.u32 %v10103_v60, 16  ;;  %v10166_v28 = vld [vmem:[#allocation2 + $0x7c] sm:$0xf] }
 0x270   : > { %v3875_v45 = vrot.slane %v10103_v60, 5  ;;  %v3561_v36 = vrot.slane %v3560_v26, 4  ;;  %v3872_v61 = vsel %vm8158_vm5, %v3870_v62, %v3871_v12  ;;  %v3575_v0 = vrot.slane %v3573_v16, 5 }
 0x271   : > { %v3570_v19 = vor.u32 %v3569_v22, %v3565_v52  ;;  %4869 = vmatprep.mubr.bf16.mxu1 %v10129_v17  ;;  %v3869_v40 = vsel %vm8158_vm5, %v6287_v43, %v3868_v54  ;;  %v3602_v14 = vshrl.u32 %v10126_v50, 16  ;;  %v3605_v5 = vshll.u32 %v10126_v50, 16  ;;  %v3360_v22 = vld [vmem:[#allocation2 + $0x74] sm:$0x1] }
 0x272   : > { %4870 = vmatmul.mubr.bf16.gmra.mxu1 %v10047_v10  ;;  %v10143_v42 = vcombine.low %v3869_v40, %v3872_v61  ;;  %v3580_v32 = vrot.slane %v3578_v21, 4  ;;  %v3583_v6 = vrot.slane %v3581_v25, 5  ;;  %v3566_v27 = vsel %vm7962_vm2, %v3561_v36, %v3565_v52 }
 0x273   : > { %v3571_v44 = vrot.slane %v3570_v19, 4  ;;  %v10149_v59 = vcombine.low %v10126_v50, %v10135_v47  ;;  %v3587_v15 = vshll.u32 %v10103_v60, 16  ;;  %v3593_v54 = vrot.slane %v3591_v31, 4  ;;  %v10160_v60 = vld [vmem:[#allocation2 + $0x78] sm:$0xf] }
 0x274   : > { %v3584_v48 = vor.u32 %v3583_v6, %v3580_v32  ;;  %v3597_v35 = vshll.u32 %v3357_v51, 16  ;;  %v3877_v49 = vrot.slane %v3875_v45, 4  ;;  %v6288_v23 = vrot.slane %v10099_v8, 9 }
 0x275   : > { %11153 = vst [vmem:[#allocation24_spill] sm:$0xff] %v10149_v59  ;;  %v3576_v7 = vsel %vm7962_vm2, %v3571_v44, %v3575_v0  ;;  %v3615_v21 = vshrl.u32 %v10135_v47, 16  ;;  %v3589_v25 = vrot.slane %v3587_v15, 5  ;;  %v3878_v4 = vrot.slane %v3357_v51, 5  ;;  %v10189_v15 = vld [vmem:[#allocation2 + $0x84] sm:$0xf] }
 0x276   : > { %v10155_v41 = vcombine.low %v3566_v27, %v3576_v7  ;;  %5039 = vmatmul.mubr.bf16.gmra.mxu0 %v10143_v42  ;;  %v3882_v20 = vrot.slane %v10135_v47, 5  ;;  %v3585_v13 = vrot.slane %v3584_v48, 4  ;;  %v3876_v8 = vsel %vm8158_vm5, %v6288_v23, %v3875_v45 }
 0x277   : > { %5046 = vmatprep.mubr.bf16.mxu0 %v10149_v59  ;;  %v3594_v34 = vor.u32 %v3593_v54, %v3589_v25  ;;  %v3599_v16 = vrot.slane %v3597_v35, 5  ;;  %v3879_v12 = vsel %vm8158_vm5, %v3877_v49, %v3878_v4  ;;  %v3604_v11 = vrot.slane %v3602_v14, 4  ;;  %v3363_v35 = vld [vmem:[#allocation2 + $0x80] sm:$0x1] }
 0x278   : > { %4877 = vmatprep.mubr.bf16.mxu1 %v10155_v41  ;;  %v3607_v26 = vrot.slane %v3605_v5, 5  ;;  %v3626_v62 = vshrl.u32 %v10160_v60, 16  ;;  %v3611_v43 = vshll.u32 %v10135_v47, 16  ;;  %v3617_v31 = vrot.slane %v3615_v21, 4  ;;  %v10194_v21 = vld [vmem:[#allocation2 + $0x88] sm:$0xf] }
 0x279   : > { %v3595_v52 = vrot.slane %v3594_v34, 4  ;;  %v3629_v36 = vshll.u32 %v10160_v60, 16  ;;  %v3639_v45 = vshrl.u32 %v10166_v28, 16  ;;  %v3621_v61 = vshll.u32 %v3360_v22, 16 }
 0x27a   : > { %4878 = vmatmul.mubr.bf16.gmra.mxu1 %v10077_v58  ;;  %v3608_v19 = vor.u32 %v3607_v26, %v3604_v11  ;;  %v3590_v0 = vsel %vm7962_vm2, %v3585_v13, %v3589_v25  ;;  %v10179_v14 = vcombine.low %v3876_v8, %v3879_v12  ;;  %v3613_v5 = vrot.slane %v3611_v43, 5 }
 0x27b   : > { %v3600_v40 = vsel %vm7962_vm2, %v3595_v52, %v3599_v16  ;;  %v10185_v47 = vcombine.low %v10160_v60, %v10166_v28  ;;  %v3884_v32 = vrot.slane %v3882_v20, 4  ;;  %v6289_v6 = vrot.slane %v10126_v50, 9 }
 0x27c   : > { %11154 = vst [vmem:[#allocation25_spill] sm:$0xff] %v10179_v14  ;;  %v10181_v51 = vcombine.low %v3590_v0, %v3600_v40  ;;  %v3609_v44 = vrot.slane %v3608_v19, 4  ;;  %v3618_v27 = vor.u32 %v3617_v31, %v3613_v5  ;;  %v3889_v54 = vrot.slane %v10166_v28, 5  ;;  %v3366_v40 = vld [vmem:[#allocation2 + $0x8c] sm:$0x1] }
 0x27d   : > { %11155 = vst [vmem:[#allocation14_spill] sm:$0xff] %v10185_v47  ;;  %v3623_v7 = vrot.slane %v3621_v61, 5  ;;  %v3885_v48 = vrot.slane %v3360_v22, 5  ;;  %v3628_v49 = vrot.slane %v3626_v62, 4  ;;  %v3631_v25 = vrot.slane %v3629_v36, 5 }
 0x27e   : > { %5047 = vmatmul.mubr.bf16.gmra.mxu0 %v10179_v14  ;;  %4885 = vmatprep.mubr.bf16.mxu1 %v10181_v51  ;;  %v3619_v23 = vrot.slane %v3618_v27, 4  ;;  %v3635_v50 = vshll.u32 %v10166_v28, 16  ;;  %v3641_v4 = vrot.slane %v3639_v45, 4  ;;  %v3614_v13 = vsel %vm7962_vm2, %v3609_v44, %v3613_v5  ;;  %v10213_v45 = vld [vmem:[#allocation2 + $0x90] sm:$0xf] }
 0x27f   : > { %5054 = vmatprep.mubr.bf16.mxu0 %v10185_v47  ;;  %v3886_v34 = vsel %vm8158_vm5, %v3884_v32, %v3885_v48  ;;  %v3650_v8 = vshrl.u32 %v10189_v15, 16  ;;  %v3653_v16 = vshll.u32 %v10189_v15, 16  ;;  %v3632_v12 = vor.u32 %v3631_v25, %v3628_v49  ;;  %v10221_v32 = vld [vmem:[#allocation2 + $0x94] sm:$0xf] }
 0x280   : > { %v3624_v22 = vsel %vm7962_vm2, %v3619_v23, %v3623_v7  ;;  %v3637_v11 = vrot.slane %v3635_v50, 5  ;;  %v3645_v26 = vshll.u32 %v3363_v35, 16  ;;  %v3883_v52 = vsel %vm8158_vm5, %v6289_v6, %v3882_v20 }
 0x281   : > { %v10206_v28 = vcombine.low %v3614_v13, %v3624_v22  ;;  %v3663_v62 = vshrl.u32 %v10194_v21, 16  ;;  %v3891_v43 = vrot.slane %v3889_v54, 4  ;;  %v10211_v31 = vcombine.low %v3883_v52, %v3886_v34 }
 0x282   : > { %4886 = vmatmul.mubr.bf16.gmra.mxu1 %v10117_v29  ;;  %v3642_v36 = vor.u32 %v3641_v4, %v3637_v11  ;;  %v10218_v19 = vcombine.low %v10189_v15, %v10194_v21  ;;  %v3633_v61 = vrot.slane %v3632_v12, 4  ;;  %v3892_v0 = vrot.slane %v3363_v35, 5 }
 0x283   : > { %11156 = vst [vmem:[#allocation11_spill] sm:$0xff] %v10206_v28  ;;  %11157 = vst [vmem:[#allocation28_spill] sm:$0xff] %v10211_v31  ;;  %4893 = vmatprep.mubr.bf16.mxu1 %v10206_v28  ;;  %v3652_v5 = vrot.slane %v3650_v8, 4  ;;  %v3647_v44 = vrot.slane %v3645_v26, 5  ;;  %v3655_v6 = vrot.slane %v3653_v16, 5  ;;  %v3659_v27 = vshll.u32 %v10194_v21, 16 }
 0x284   : > { %11158 = vst [vmem:[#allocation26_spill] sm:$0xff] %v10218_v19  ;;  %v3643_v20 = vrot.slane %v3642_v36, 4  ;;  %v6290_v7 = vrot.slane %v10160_v60, 9  ;;  %v3896_v48 = vrot.slane %v10194_v21, 5  ;;  %v3893_v35 = vsel %vm8158_vm5, %v3891_v43, %v3892_v0  ;;  %v10248_v36 = vld [vmem:[#allocation2 + $0xa0] sm:$0xf] }
 0x285   : > { %v3665_v49 = vrot.slane %v3663_v62, 4  ;;  %v3656_v25 = vor.u32 %v3655_v6, %v3652_v5  ;;  %v3661_v50 = vrot.slane %v3659_v27, 5  ;;  %v3669_v4 = vshll.u32 %v3366_v40, 16  ;;  %v3369_v6 = vld [vmem:[#allocation2 + $0x98] sm:$0x1] }
 0x286   : > { %5055 = vmatmul.mubr.bf16.gmra.mxu0 %v10211_v31  ;;  %v3648_v23 = vsel %vm7962_vm2, %v3643_v20, %v3647_v44  ;;  %v3638_v13 = vsel %vm7962_vm2, %v3633_v61, %v3637_v11  ;;  %v3674_v34 = vshrl.u32 %v10213_v45, 16  ;;  %v3677_v60 = vshll.u32 %v10213_v45, 16  ;;  %v10250_v61 = vld [vmem:[#allocation2 + $0x9c] sm:$0xf] }
 0x287   : > { %5062 = vmatprep.mubr.bf16.mxu0 %v10218_v19  ;;  %v3687_v21 = vshrl.u32 %v10221_v32, 16  ;;  %v10236_v8 = vcombine.low %v3638_v13, %v3648_v23  ;;  %v3890_v16 = vsel %vm8158_vm5, %v6290_v7, %v3889_v54  ;;  %v3666_v22 = vor.u32 %v3665_v49, %v3661_v50 }
 0x288   : > { %v10241_v12 = vcombine.low %v3890_v16, %v3893_v35  ;;  %v10245_v26 = vcombine.low %v10213_v45, %v10221_v32  ;;  %v3657_v11 = vrot.slane %v3656_v25, 4  ;;  %v3671_v62 = vrot.slane %v3669_v4, 5 }
 0x289   : > { %11159 = vst [vmem:[#allocation3_spill] sm:$0xff] %v10236_v8  ;;  %v3667_v52 = vrot.slane %v3666_v22, 4  ;;  %v3898_v43 = vrot.slane %v3896_v48, 4  ;;  %v3676_v54 = vrot.slane %v3674_v34, 4  ;;  %v3679_v0 = vrot.slane %v3677_v60, 5 }
 0x28a   : > { %4894 = vmatmul.mubr.bf16.gmra.mxu1 %v10149_v59  ;;  %11160 = vst [vmem:[#allocation29_spill] sm:$0xff] %v10241_v12  ;;  %v3683_v5 = vshll.u32 %v10221_v32, 16  ;;  %v3689_v20 = vrot.slane %v3687_v21, 4  ;;  %v3899_v44 = vrot.slane %v3366_v40, 5  ;;  %v6291_v27 = vrot.slane %v10189_v15, 9 }
 0x28b   : > { %4901 = vmatprep.mubr.bf16.mxu1 %v10236_v8  ;;  %v3672_v7 = vsel %vm7962_vm2, %v3667_v52, %v3671_v62  ;;  %v3711_v35 = vshrl.u32 %v10248_v36, 16  ;;  %v3903_v23 = vrot.slane %v10221_v32, 5  ;;  %v3698_v4 = vshrl.u32 %v10250_v61, 16  ;;  %v10271_v22 = vld [vmem:[#allocation2 + $0xa8] sm:$0xf] }
 0x28c   : > { %v3685_v49 = vrot.slane %v3683_v5, 5  ;;  %v3900_v25 = vsel %vm8158_vm5, %v3898_v43, %v3899_v44  ;;  %v3701_v40 = vshll.u32 %v10250_v61, 16  ;;  %v3662_v15 = vsel %vm7962_vm2, %v3657_v11, %v3661_v50  ;;  %v10276_v43 = vld [vmem:[#allocation2 + $0xac] sm:$0xf] }
 0x28d   : > { %v3680_v13 = vor.u32 %v3679_v0, %v3676_v54  ;;  %v3693_v60 = vshll.u32 %v3369_v6, 16  ;;  %v6292_v21 = vrot.slane %v10213_v45, 9  ;;  %v10267_v16 = vcombine.low %v3662_v15, %v3672_v7 }
 0x28e   : > { %5063 = vmatmul.mubr.bf16.gmra.mxu0 %v10241_v12  ;;  %v3690_v34 = vor.u32 %v3689_v20, %v3685_v49  ;;  %v3897_v32 = vsel %vm8158_vm5, %v6291_v27, %v3896_v48  ;;  %v3707_v50 = vshll.u32 %v10248_v36, 16  ;;  %v3713_v11 = vrot.slane %v3711_v35, 4 }
 0x28f   : > { %5070 = vmatprep.mubr.bf16.mxu0 %v10245_v26  ;;  %11161 = vst [vmem:[#allocation10_spill] sm:$0xff] %v10267_v16  ;;  %v10274_v52 = vcombine.low %v3897_v32, %v3900_v25  ;;  %v3910_v45 = vrot.slane %v10248_v36, 5  ;;  %v3905_v54 = vrot.slane %v3903_v23, 4  ;;  %v3700_v0 = vrot.slane %v3698_v4, 4 }
 0x290   : > { %v3691_v62 = vrot.slane %v3690_v34, 4  ;;  %v3703_v5 = vrot.slane %v3701_v40, 5  ;;  %v10283_v48 = vcombine.low %v10250_v61, %v10248_v36  ;;  %v3681_v20 = vrot.slane %v3680_v13, 4  ;;  %v3372_v34 = vld [vmem:[#allocation2 + $0xa4] sm:$0x1] }
 0x291   : > { %11162 = vst [vmem:[#allocation27_spill] sm:$0xff] %v10274_v52  ;;  %v3695_v44 = vrot.slane %v3693_v60, 5  ;;  %v3709_v27 = vrot.slane %v3707_v50, 5  ;;  %v3906_v7 = vrot.slane %v3369_v6, 5  ;;  %v3722_v25 = vshrl.u32 %v10271_v22, 16 }
 0x292   : > { %4902 = vmatmul.mubr.bf16.gmra.mxu1 %v10185_v47  ;;  %v3725_v35 = vshll.u32 %v10271_v22, 16  ;;  %v3735_v15 = vshrl.u32 %v10276_v43, 16  ;;  %v6293_v40 = vrot.slane %v10250_v61, 9  ;;  %v3904_v13 = vsel %vm8158_vm5, %v6292_v21, %v3903_v23 }
 0x293   : > { %4909 = vmatprep.mubr.bf16.mxu1 %v10267_v16  ;;  %v3696_v4 = vsel %vm7962_vm2, %v3691_v62, %v3695_v44  ;;  %v3714_v36 = vor.u32 %v3713_v11, %v3709_v27  ;;  %v3907_v6 = vsel %vm8158_vm5, %v3905_v54, %v3906_v7  ;;  %v3704_v60 = vor.u32 %v3703_v5, %v3700_v0  ;;  %v10302_v62 = vld [vmem:[#allocation2 + $0xb4] sm:$0xf]  ;;  %v10307_v0 = vld [vmem:[#allocation2 + $0xb8] sm:$0xf] }
 0x294   : > { %v3686_v32 = vsel %vm7962_vm2, %v3681_v20, %v3685_v49  ;;  %v3717_v50 = vshll.u32 %v3372_v34, 16  ;;  %v3731_v12 = vshll.u32 %v10276_v43, 16  ;;  %v3724_v11 = vrot.slane %v3722_v25, 4 }
 0x295   : > { %v10300_v16 = vcombine.low %v3686_v32, %v3696_v4  ;;  %v3727_v61 = vrot.slane %v3725_v35, 5  ;;  %v3737_v44 = vrot.slane %v3735_v15, 4  ;;  %v10305_v23 = vcombine.low %v3904_v13, %v3907_v6  ;;  %v10318_v35 = vld [vmem:[#allocation2 + $0xc0] sm:$0xf]  ;;  %v6959_v15 = vpop.f32.mrf.mxu1  ;;  %v3375_v13 = vld [vmem:[#allocation2 + $0xb0] sm:$0x1] }
 0x296   : > { %5071 = vmatmul.mubr.bf16.gmra.mxu0 %v10274_v52  ;;  %v3912_v52 = vrot.slane %v3910_v45, 4  ;;  %v3715_v21 = vrot.slane %v3714_v36, 4  ;;  %v3913_v54 = vrot.slane %v3372_v34, 5  ;;  %v10309_v49 = vrot.slane %v3731_v12, 5  ;;  %v10325_v6 = vld [vmem:[#allocation2 + $0xc4] sm:$0xf] }
 0x297   : > { %5078 = vmatprep.mubr.bf16.mxu0 %v10283_v48  ;;  %11163 = vst [vmem:[#allocation32_spill] sm:$0xff] %v10300_v16  ;;  %11164 = vst [vmem:[#allocation30_spill] sm:$0xff] %v10305_v23  ;;  %v10316_v7 = vcombine.low %v10271_v22, %v10276_v43  ;;  %v3705_v25 = vrot.slane %v3704_v60, 4  ;;  %v3719_v4 = vrot.slane %v3717_v50, 5  ;;  %v3911_v34 = vsel %vm8158_vm5, %v6293_v40, %v3910_v45 }
 0x298   : > { %v3914_v12 = vsel %vm8158_vm5, %v3912_v52, %v3913_v54  ;;  %v3746_v36 = vshrl.u32 %v10302_v62, 16  ;;  %v3749_v32 = vshll.u32 %v10302_v62, 16  ;;  %v3759_v60 = vshrl.u32 %v10307_v0, 16  ;;  %v11182_v30 = vld [vmem:[#allocation27_spill] sm:$0xff] }
 0x299   : > { %v3728_v5 = vor.u32 %v3727_v61, %v3724_v11  ;;  %v3738_v50 = vor.u32 %v3737_v44, %v10309_v49  ;;  %v3720_v45 = vsel %vm7962_vm2, %v3715_v21, %v3719_v4  ;;  %v3930_v52 = vshrl.u32 %v10318_v35, 16  ;;  %v6960_v61 = vpop.f32.mrf.mxu1 }
 0x29a   : > { %4910 = vmatmul.mubr.bf16.gmra.mxu1 %v10218_v19  ;;  %v3933_v40 = vshll.u32 %v10318_v35, 16  ;;  %v3755_v54 = vshll.u32 %v10307_v0, 16  ;;  %v3710_v20 = vsel %vm7962_vm2, %v3705_v25, %v3709_v27  ;;  %v3943_v11 = vshrl.u32 %v10325_v6, 16 }
 0x29b   : > { %4917 = vmatprep.mubr.bf16.mxu1 %v10300_v16  ;;  %v3741_v16 = vshll.u32 %v3375_v13, 16  ;;  %v10345_v21 = vcombine.low %v10302_v62, %v10307_v0  ;;  %v11166_v4 = vrot.slane %v10276_v43, 5  ;;  %v10349_v47 = vadd.f32 %v6960_v61, %v6959_v15  ;;  %v3378_v61 = vld [vmem:[#allocation2 + $0xbc] sm:$0x1] }
 0x29c   : > { %v10351_v31 = vcombine.low %v3710_v20, %v3720_v45  ;;  %v3729_v27 = vrot.slane %v3728_v5, 4  ;;  %v3739_v25 = vrot.slane %v3738_v50, 4  ;;  %v3757_v8 = vrot.slane %v3755_v54, 5 }
 0x29d   : > { %v3919_v19 = vrot.slane %v11166_v4, 4  ;;  %v3932_v59 = vrot.slane %v3930_v52, 4  ;;  %v3935_v44 = vrot.slane %v3933_v40, 5  ;;  %v3939_v14 = vshll.u32 %v10325_v6, 16 }
 0x29e   : > { %5079 = vmatmul.mubr.bf16.gmra.mxu0 %v10305_v23  ;;  %v10339_v23 = vcombine.low %v3911_v34, %v3914_v12  ;;  %v3761_v34 = vrot.slane %v3759_v60, 4  ;;  %v3381_v12 = vld [vmem:[#allocation2 + $0xc8] sm:$0x1]  ;;  %v3743_v28 = vrot.slane %v3741_v16, 5  ;;  %v3920_v29 = vrot.slane %v3375_v13, 5 }
 0x29f   : > { %5086 = vmatprep.mubr.bf16.mxu0 %v10316_v7  ;;  %v3748_v4 = vrot.slane %v3746_v36, 4  ;;  %v3945_v15 = vrot.slane %v3943_v11, 4  ;;  %v3751_v20 = vrot.slane %v3749_v32, 5  ;;  %v3936_v45 = vor.u32 %v3935_v44, %v3932_v59 }
 0x2a0   : > { %11165 = vst [vmem:[#allocation33_spill] sm:$0xff] %v10339_v23  ;;  %v3941_v5 = vrot.slane %v3939_v14, 5  ;;  %v3949_v50 = vshll.u32 %v3381_v12, 16  ;;  %v3734_v60 = vsel %vm7962_vm2, %v3729_v27, %v10309_v49  ;;  %v3921_v52 = vsel %vm8158_vm5, %v3919_v19, %v3920_v29 }
 0x2a1   : > { %v6296_v40 = vrot.slane %v10318_v35, 9  ;;  %v3958_v16 = vrot.slane %v10325_v6, 5  ;;  %v3744_v59 = vsel %vm7962_vm2, %v3739_v25, %v3743_v28  ;;  %v3762_v14 = vor.u32 %v3761_v34, %v3757_v8 }
 0x2a2   : > { %4918 = vmatmul.mubr.bf16.gmra.mxu1 %v10245_v26  ;;  %v3937_v36 = vrot.slane %v3936_v45, 4  ;;  %v3946_v13 = vor.u32 %v3945_v15, %v3941_v5  ;;  %v3765_v32 = vshll.u32 %v3378_v61, 16  ;;  %v3961_v11 = vrot.slane %v3381_v12, 5 }
 0x2a3   : > { %4925 = vmatprep.mubr.bf16.mxu1 %v10351_v31  ;;  %v3959_v54 = vsel %vm8158_vm5, %v6296_v40, %v3958_v16  ;;  %v3960_v49 = vrot.slane %v3958_v16, 4  ;;  %v3752_v44 = vor.u32 %v3751_v20, %v3748_v4  ;;  %v3951_v27 = vrot.slane %v3949_v50, 5 }
 0x2a4   : > { %v3942_v29 = vsel %vm7962_vm2, %v3937_v36, %v3941_v5  ;;  %v3947_v19 = vrot.slane %v3946_v13, 4  ;;  %v11167_v25 = vrot.slane %v10276_v43, 5  ;;  %v11168_v34 = vrot.slane %v10271_v22, 9 }
 0x2a5   : > { %v3962_v28 = vsel %vm8158_vm5, %v3960_v49, %v3961_v11  ;;  %v3763_v4 = vrot.slane %v3762_v14, 4  ;;  %v10393_v43 = vcombine.low %v10318_v35, %v10325_v6  ;;  %v3753_v22 = vrot.slane %v3752_v44, 4  ;;  %v7789_v49 = vld [vmem:[%s10995_s3 + $0x18] sm:$0xff]   ;;  %v7793_v44 = vld [vmem:[%s10995_s3 + $0x8] sm:$0xff]  }
 0x2a6   : > { %5087 = vmatmul.mubr.bf16.gmra.mxu0 %v10339_v23  ;;  %v10371_v23 = vcombine.low %v3734_v60, %v3744_v59  ;;  %v3918_v12 = vsel %vm8158_vm5, %v11168_v34, %v11167_v25  ;;  %v3952_v15 = vsel %vm7962_vm2, %v3947_v19, %v3951_v27  ;;  %v10384_v20 = vcombine.low %v3959_v54, %v3962_v28  ;;  %v7784_v54 = vld [vmem:[%s10994_s2 + $0x228] sm:$0xff]   ;;  %v7788_v11 = vld [vmem:[%s10994_s2 + $0x218] sm:$0xff]  }
 0x2a7   : > { %5094 = vmatprep.mubr.bf16.mxu0 %v10345_v21  ;;  %v10387_v45 = vcombine.low %v3918_v12, %v3921_v52  ;;  %v10389_v5 = vcombine.low %v3942_v29, %v3952_v15  ;;  %v3767_v50 = vrot.slane %v3765_v32, 5  ;;  %v11169_v60 = vrot.slane %v10307_v0, 5  ;;  %v7782_v0 = vld [vmem:[%s10994_s2 + $0x230] sm:$0xff]   ;;  %v7787_v32 = vld [vmem:[%s10995_s3 + $0x20] sm:$0xff]   ;;  %v6962_v29 = vpop.f32.mrf.mxu1  ;;  %v7792_v27 = vld [vmem:[%s10994_s2 + $0x208] sm:$0xff]  }
 0x2a8   : > { %v3927_v52 = vrot.slane %v3378_v61, 5  ;;  %v6295_v59 = vrot.slane %v10302_v62, 9  ;;  %v3758_v14 = vsel %vm7962_vm2, %v3753_v22, %v3757_v8  ;;  %v7783_v8 = vld [vmem:[%s10995_s3 + $0x30] sm:$0xff]   ;;  %v7810_v62 = vld [vmem:[%s10995_s3 + $0x38] sm:$0xff]   ;;  %v7794_v12 = vld [vmem:[%s10994_s2 + $0x200] sm:$0xff]  }
 0x2a9   : > { %v3926_v40 = vrot.slane %v11169_v60, 4  ;;  %v3768_v16 = vsel %vm7962_vm2, %v3763_v4, %v3767_v50  ;;  %v11170_v36 = vmov %v11169_v60  ;;  %v6963_v25 = vpop.f32.mrf.mxu1 }
 0x2aa   : > { %4926 = vmatmul.mubr.bf16.gmra.mxu1 %v10283_v48  ;;  %v10406_v6 = vcombine.low %v3758_v14, %v3768_v16  ;;  %v3925_v13 = vsel %vm8158_vm5, %v6295_v59, %v11170_v36  ;;  %v6964_v15 = vadd.f32 %v6963_v25, %v6962_v29  ;;  %v11178_v25 = vld [vmem:[#allocation10_spill] sm:$0xff] }
 0x2ab   : > { %4933 = vmatprep.mubr.bf16.mxu1 %v10371_v23  ;;  %v3928_v35 = vsel %vm8158_vm5, %v3926_v40, %v3927_v52  ;;  %v11172_v40 = vld [vmem:[#allocation11_spill] sm:$0xff] }
 0x2ac   : > { %v10414_v61 = vcombine.low %v3925_v13, %v3928_v35  ;;  %v11173_v13 = vld [vmem:[#allocation25_spill] sm:$0xff] }
 0x2ae   : > { %5095 = vmatmul.mubr.bf16.gmra.mxu0 %v10387_v45 }
 0x2af   : > { %5102 = vmatprep.mubr.bf16.mxu0 %v10393_v43 }
 0x2b2   : > { %4934 = vmatmul.mubr.bf16.gmra.mxu1 %v10316_v7 }
 0x2b3   : > { %4941 = vmatprep.mubr.bf16.mxu1 %v10406_v6 }
 0x2b6   : > { %5103 = vmatmul.mubr.bf16.gmra.mxu0 %v10414_v61 }
 0x2b7   : > { %5304 = vmatprep.mubr.bf16.mxu0 %v9874_v2 }
 0x2ba   : > { %4942 = vmatmul.mubr.bf16.gmra.mxu1 %v10345_v21 }
 0x2bb   : > { %5143 = vmatprep.mubr.bf16.mxu1 %v9769_v55  ;;  %v7785_v55 = vld [vmem:[%s10995_s3 + $0x28] sm:$0xff]  }
 0x2be   : > { %5305 = vmatmul.mubr.bf16.vlgmr.msra.gmra.mxu0 %v9674_v56  ;;  %v7811_v56 = vld [vmem:[%s10994_s2 + $0x238] sm:$0xff]  }
 0x2bf   : > { %5312 = vmatprep.mubr.bf16.mxu0 %v9950_v38  ;;  %7536 = vmatpush3.bf16.msra.mxu0 %v7810_v62  ;;  %v11174_v62 = vld [vmem:[#allocation24_spill] sm:$0xff] }
 0x2c0   : > { %7537 = vmatprep.subr.bf16.mxu0 %v7783_v8 }
 0x2c2   : > { %5144 = vmatmul.mubr.bf16.vlgmr.msra.gmra.mxu1 %v9767_v57  ;;  %v7786_v57 = vld [vmem:[%s10994_s2 + $0x220] sm:$0xff]  }
 0x2c3   : > { %7538 = vmatpush3.bf16.msra.mxu0 %v7783_v8  ;;  %5151 = vmatprep.mubr.bf16.mxu1 %v9864_v46 }
 0x2c4   : > { %7488 = vmatpush3.bf16.msra.mxu1 %v7811_v56  ;;  %7539 = vmatprep.subr.bf16.mxu0 %v7785_v55 }
 0x2c5   : > { %7489 = vmatprep.subr.bf16.mxu1 %v7782_v0 }
 0x2c6   : > { %5313 = vmatmul.mubr.bf16.gmra.mxu0 %v9801_v37  ;;  %v7791_v37 = vld [vmem:[%s10995_s3 + $0x10] sm:$0xff]  }
 0x2c7   : > { %5320 = vmatprep.mubr.bf16.mxu0 %v10013_v9  ;;  %7540 = vmatpush3.bf16.msra.mxu0 %v7785_v55  ;;  %v11175_v55 = vld [vmem:[#allocation3_spill] sm:$0xff] }
 0x2c8   : > { %7490 = vmatpush3.bf16.msra.mxu1 %v7782_v0  ;;  %7541 = vmatprep.subr.bf16.mxu0 %v7787_v32 }
 0x2c9   : > { %7491 = vmatprep.subr.bf16.mxu1 %v7784_v54 }
 0x2ca   : > { %5152 = vmatmul.mubr.bf16.gmra.mxu1 %v9874_v2  ;;  %v7790_v2 = vld [vmem:[%s10994_s2 + $0x210] sm:$0xff]  }
 0x2cb   : > { %7542 = vmatpush3.bf16.msra.mxu0 %v7787_v32  ;;  %5159 = vmatprep.mubr.bf16.mxu1 %v9955_v63 }
 0x2cc   : > { %7492 = vmatpush3.bf16.msra.mxu1 %v7784_v54  ;;  %7543 = vmatprep.subr.bf16.mxu0 %v7789_v49 }
 0x2cd   : > { %7493 = vmatprep.subr.bf16.mxu1 %v7786_v57 }
 0x2ce   : > { %5321 = vmatmul.mubr.bf16.gmra.mxu0 %v9897_v3  ;;  %v7795_v3 = vld [vmem:[%s10995_s3] sm:$0xff]  }
 0x2cf   : > { %5328 = vmatprep.mubr.bf16.mxu0 %v10081_v1  ;;  %7544 = vmatpush3.bf16.msra.mxu0 %v7789_v49  ;;  %v10510_v49 = vld [vmem:[#allocation2 + $0xd0] sm:$0xf] }
 0x2d0   : > { %7494 = vmatpush3.bf16.msra.mxu1 %v7786_v57  ;;  %7545 = vmatprep.subr.bf16.mxu0 %v7791_v37  ;;  %v10508_v57 = vld [vmem:[#allocation2 + $0xcc] sm:$0xf] }
 0x2d1   : > { %7495 = vmatprep.subr.bf16.mxu1 %v7788_v11 }
 0x2d2   : > { %5160 = vmatmul.mubr.bf16.gmra.mxu1 %v9950_v38 }
 0x2d3   : > { %7546 = vmatpush3.bf16.msra.mxu0 %v7791_v37  ;;  %5167 = vmatprep.mubr.bf16.mxu1 %v10043_v18  ;;  %v11176_v37 = vld [vmem:[#allocation28_spill] sm:$0xff] }
 0x2d4   : > { %7496 = vmatpush3.bf16.msra.mxu1 %v7788_v11  ;;  %7547 = vmatprep.subr.bf16.mxu0 %v7793_v44 }
 0x2d5   : > { %7497 = vmatprep.subr.bf16.mxu1 %v7790_v2 }
 0x2d6   : > { %v7071_v19 = vpop.f32.mrf.mxu0  ;;  %5329 = vmatmul.mubr.bf16.gmra.mxu0 %v9981_v24 }
 0x2d7   : > { %5336 = vmatprep.mubr.bf16.mxu0 %v10129_v17  ;;  %7548 = vmatpush3.bf16.msra.mxu0 %v7793_v44  ;;  %v6297_v44 = vrot.slane %v10508_v57, 9 }
 0x2d8   : > { %v7072_v38 = vpop.f32.mrf.mxu0  ;;  %7498 = vmatpush3.bf16.msra.mxu1 %v7790_v2  ;;  %7549 = vmatprep.subr.bf16.mxu0 %v7795_v3 }
 0x2d9   : > { %v7073_v28 = vadd.f32 %v7072_v38, %v7071_v19  ;;  %7499 = vmatprep.subr.bf16.mxu1 %v7792_v27 }
 0x2da   : > { %v7074_v34 = vpop.f32.mrf.mxu0  ;;  %5168 = vmatmul.mubr.bf16.gmra.mxu1 %v10013_v9 }
 0x2db   : > { %v10483_v4 = vadd.f32 %v7073_v28, %v10349_v47  ;;  %7550 = vmatpush3.bf16.msra.mxu0 %v7795_v3  ;;  %5175 = vmatprep.mubr.bf16.mxu1 %v10073_v53  ;;  %v3992_v3 = vrot.slane %v10510_v49, 5 }
 0x2dc   : > { %v7075_v24 = vpop.f32.mrf.mxu0  ;;  %7500 = vmatpush3.bf16.msra.mxu1 %v7792_v27 }
 0x2dd   : > { %v7076_v22 = vadd.f32 %v7075_v24, %v7074_v34  ;;  %7501 = vmatprep.subr.bf16.mxu1 %v7794_v12  ;;  %v10521_v38 = vsel %vm8158_vm5, %v6297_v44, %v3992_v3  ;;  %v3994_v28 = vrot.slane %v3992_v3, 4  ;;  %v3967_v3 = vshll.u32 %v10508_v57, 16 }
 0x2de   : > { %5337 = vmatmul.mubr.bf16.gmra.mxu0 %v10047_v10  ;;  %v11171_v10 = vld [vmem:[#allocation16_spill] sm:$0xff] }
 0x2df   : > { %v10488_v50 = vadd.f32 %v7076_v22, %v6964_v15  ;;  %5344 = vmatprep.mubr.bf16.mxu0 %v10155_v41 }
 0x2e0   : > { %7502 = vmatpush3.bf16.msra.mxu1 %v7794_v12 }
 0x2e2   : > { %5176 = vmatmul.mubr.bf16.gmra.mxu1 %v10081_v1 }
 0x2e3   : > { %5183 = vmatprep.mubr.bf16.mxu1 %v10111_v39 }
 0x2e6   : > { %5345 = vmatmul.mubr.bf16.gmra.mxu0 %v10077_v58 }
 0x2e7   : > { %5352 = vmatprep.mubr.bf16.mxu0 %v10181_v51 }
 0x2ea   : > { %5184 = vmatmul.mubr.bf16.gmra.mxu1 %v10129_v17 }
 0x2eb   : > { %5191 = vmatprep.mubr.bf16.mxu1 %v10143_v42 }
 0x2ec   : > { %v7077_v9 = vpop.f32.mrf.mxu0 }
 0x2ed   : > { %v6965_v47 = vpop.f32.mrf.mxu1 }
 0x2ee   : > { %5353 = vmatmul.mubr.bf16.gmra.mxu0 %v11171_v10  ;;  %v7078_v60 = vpop.f32.mrf.mxu0 }
 0x2ef   : > { %5360 = vmatprep.mubr.bf16.mxu0 %v11172_v40  ;;  %v7079_v16 = vadd.f32 %v7078_v60, %v7077_v9  ;;  %v6966_v52 = vpop.f32.mrf.mxu1  ;;  %v11179_v60 = vld [vmem:[#allocation29_spill] sm:$0xff] }
 0x2f0   : > { %v6967_v1 = vadd.f32 %v6966_v52, %v6965_v47  ;;  %v7080_v59 = vpop.f32.mrf.mxu0  ;;  %v11180_v52 = vld [vmem:[#allocation26_spill] sm:$0xff] }
 0x2f1   : > { %v6968_v14 = vpop.f32.mrf.mxu1 }
 0x2f2   : > { %v10499_v35 = vadd.f32 %v7079_v16, %v6967_v1  ;;  %v7081_v58 = vpop.f32.mrf.mxu0  ;;  %5192 = vmatmul.mubr.bf16.gmra.mxu1 %v10155_v41  ;;  %v10512_v41 = vld [vmem:[#allocation2 + $0xd4] sm:$0x1]  ;;  %v11181_v1 = vld [vmem:[#allocation32_spill] sm:$0xff] }
 0x2f3   : > { %v7082_v17 = vadd.f32 %v7081_v58, %v7080_v59  ;;  %v6969_v36 = vpop.f32.mrf.mxu1  ;;  %5199 = vmatprep.mubr.bf16.mxu1 %v11173_v13  ;;  %v3995_v2 = vrot.slane %v10512_v41, 5 }
 0x2f4   : > { %v6970_v8 = vadd.f32 %v6969_v36, %v6968_v14 }
 0x2f5   : > { %v10528_v22 = vsel %vm8158_vm5, %v3994_v28, %v3995_v2  ;;  %v11183_v2 = vld [vmem:[#allocation30_spill] sm:$0xff] }
 0x2f6   : > { %5361 = vmatmul.mubr.bf16.gmra.mxu0 %v11174_v62  ;;  %v10504_v0 = vadd.f32 %v7082_v17, %v6970_v8  ;;  %v6351_v47 = vcombine.low %v10521_v38, %v10528_v22 }
 0x2f7   : > { %5368 = vmatprep.mubr.bf16.mxu0 %v11175_v55 }
 0x2f9   : > { %v7083_v56 = vpop.f32.mrf.mxu0 }
 0x2fa   : > { %5200 = vmatmul.mubr.bf16.gmra.mxu1 %v10181_v51  ;;  %v6971_v32 = vpop.f32.mrf.mxu1  ;;  %v11177_v51 = vld [vmem:[#allocation14_spill] sm:$0xff] }
 0x2fb   : > { %v7084_v54 = vpop.f32.mrf.mxu0  ;;  %5207 = vmatprep.mubr.bf16.mxu1 %v11176_v37 }
 0x2fc   : > { %v7085_v11 = vadd.f32 %v7084_v54, %v7083_v56  ;;  %v6972_v29 = vpop.f32.mrf.mxu1 }
 0x2fd   : > { %v7086_v19 = vpop.f32.mrf.mxu0  ;;  %v6973_v27 = vadd.f32 %v6972_v29, %v6971_v32  ;;  %v3973_v29 = vshll.u32 %v10510_v49, 16 }
 0x2fe   : > { %5369 = vmatmul.mubr.bf16.gmra.mxu0 %v11177_v51  ;;  %v6974_v34 = vpop.f32.mrf.mxu1 }
 0x2ff   : > { %5376 = vmatprep.mubr.bf16.mxu0 %v11178_v25  ;;  %v7087_v12 = vpop.f32.mrf.mxu0  ;;  %v10524_v24 = vadd.f32 %v7085_v11, %v6973_v27  ;;  %v11184_v27 = vld [vmem:[#allocation33_spill] sm:$0xff] }
 0x300   : > { %v7088_v15 = vadd.f32 %v7087_v12, %v7086_v19  ;;  %v6975_v9 = vpop.f32.mrf.mxu1  ;;  %v3977_v19 = vshrl.u32 %v10510_v49, 16 }
 0x301   : > { %v6976_v10 = vadd.f32 %v6975_v9, %v6974_v34  ;;  %v3975_v34 = vrot.slane %v3973_v29, 5 }
 0x302   : > { %5208 = vmatmul.mubr.bf16.gmra.mxu1 %v11172_v40  ;;  %v3979_v12 = vrot.slane %v3977_v19, 4 }
 0x303   : > { %5215 = vmatprep.mubr.bf16.mxu1 %v11179_v60  ;;  %v10534_v16 = vadd.f32 %v7088_v15, %v6976_v10 }
 0x306   : > { %5377 = vmatmul.mubr.bf16.gmra.mxu0 %v11180_v52 }
 0x307   : > { %5384 = vmatprep.mubr.bf16.mxu0 %v11181_v1 }
 0x30a   : > { %5216 = vmatmul.mubr.bf16.gmra.mxu1 %v11175_v55 }
 0x30b   : > { %5223 = vmatprep.mubr.bf16.mxu1 %v11182_v30  ;;  %v6977_v14 = vpop.f32.mrf.mxu1 }
 0x30c   : > { %v7089_v59 = vpop.f32.mrf.mxu0 }
 0x30d   : > { %v6978_v17 = vpop.f32.mrf.mxu1 }
 0x30e   : > { %5385 = vmatmul.mubr.bf16.gmra.mxu0 %v10245_v26  ;;  %v7090_v58 = vpop.f32.mrf.mxu0  ;;  %v6979_v36 = vadd.f32 %v6978_v17, %v6977_v14  ;;  %v3964_v26 = vshrl.u32 %v10508_v57, 16  ;;  %v3980_v14 = vor.u32 %v3979_v12, %v3975_v34 }
 0x30f   : > { %5392 = vmatprep.mubr.bf16.mxu0 %v10351_v31  ;;  %v7091_v40 = vadd.f32 %v7090_v58, %v7089_v59  ;;  %v6980_v62 = vpop.f32.mrf.mxu1 }
 0x310   : > { %v7092_v8 = vpop.f32.mrf.mxu0  ;;  %v3966_v28 = vrot.slane %v3964_v26, 4 }
 0x311   : > { %v10542_v56 = vadd.f32 %v7091_v40, %v6979_v36  ;;  %v6981_v54 = vpop.f32.mrf.mxu1 }
 0x312   : > { %v7093_v32 = vpop.f32.mrf.mxu0  ;;  %5224 = vmatmul.mubr.bf16.gmra.mxu1 %v11178_v25  ;;  %v6982_v11 = vadd.f32 %v6981_v54, %v6980_v62  ;;  %v3969_v25 = vrot.slane %v3967_v3, 5 }
 0x313   : > { %v7094_v55 = vadd.f32 %v7093_v32, %v7092_v8  ;;  %5231 = vmatprep.mubr.bf16.mxu1 %v11183_v2  ;;  %v3981_v32 = vrot.slane %v3980_v14, 4 }
 0x314   : > { %v3970_v59 = vor.u32 %v3969_v25, %v3966_v28 }
 0x315   : > { %v10546_v44 = vadd.f32 %v7094_v55, %v6982_v11 }
 0x316   : > { %5393 = vmatmul.mubr.bf16.gmra.mxu0 %v10283_v48  ;;  %v3971_v62 = vrot.slane %v3970_v59, 4 }
 0x317   : > { %5400 = vmatprep.mubr.bf16.mxu0 %v10371_v23 }
 0x31a   : > { %5232 = vmatmul.mubr.bf16.gmra.mxu1 %v11181_v1  ;;  %v6983_v51 = vpop.f32.mrf.mxu1  ;;  %v3983_v1 = vshll.u32 %v10512_v41, 16 }
 0x31b   : > { %5239 = vmatprep.mubr.bf16.mxu1 %v11184_v27 }
 0x31c   : > { %v6984_v48 = vpop.f32.mrf.mxu1  ;;  %v3985_v54 = vrot.slane %v3983_v1, 5  ;;  %v6349_v1 = vcombine.low %v10508_v57, %v10510_v49 }
 0x31d   : > { %v6985_v9 = vadd.f32 %v6984_v48, %v6983_v51 }
 0x31e   : > { %v7095_v15 = vpop.f32.mrf.mxu0  ;;  %5401 = vmatmul.mubr.bf16.gmra.mxu0 %v10316_v7  ;;  %v6986_v10 = vpop.f32.mrf.mxu1  ;;  %v3986_v3 = vsel %vm7962_vm2, %v3981_v32, %v3985_v54  ;;  %v11185_v32 = vld [vmem:[#allocation5_spill] sm:$0xff] }
 0x31f   : > { %5408 = vmatprep.mubr.bf16.mxu0 %v10406_v6 }
 0x320   : > { %v7096_v52 = vpop.f32.mrf.mxu0  ;;  %v6987_v17 = vpop.f32.mrf.mxu1 }
 0x321   : > { %v7097_v58 = vadd.f32 %v7096_v52, %v7095_v15  ;;  %v6988_v36 = vadd.f32 %v6987_v17, %v6986_v10 }
 0x322   : > { %v7098_v40 = vpop.f32.mrf.mxu0  ;;  %5240 = vmatmul.mubr.bf16.gmra.mxu1 %v10351_v31  ;;  %v3976_v31 = vsel %vm7962_vm2, %v3971_v62, %v3975_v34 }
 0x323   : > { %v10560_v8 = vadd.f32 %v7097_v58, %v6985_v9  ;;  %5247 = vmatprep.mubr.bf16.mxu1 %v10387_v45  ;;  %v6350_v25 = vcombine.low %v3976_v31, %v3986_v3 }
 0x324   : > { %v7099_v7 = vpop.f32.mrf.mxu0 }
 0x325   : > { %v7100_v55 = vadd.f32 %v7099_v7, %v7098_v40 }
 0x326   : > { %v7101_v11 = vpop.f32.mrf.mxu0  ;;  %5409 = vmatmul.mubr.bf16.gmra.mxu0 %v10345_v21 }
 0x327   : > { %v10564_v26 = vadd.f32 %v7100_v55, %v6988_v36  ;;  %5416 = vmatprep.mubr.bf16.mxu0 %v10389_v5 }
 0x328   : > { %v7102_v41 = vpop.f32.mrf.mxu0 }
 0x329   : > { %v6989_v29 = vpop.f32.mrf.mxu1  ;;  %v7103_v19 = vadd.f32 %v7102_v41, %v7101_v11 }
 0x32a   : > { %v7104_v51 = vpop.f32.mrf.mxu0  ;;  %5248 = vmatmul.mubr.bf16.gmra.mxu1 %v10371_v23 }
 0x32b   : > { %v6990_v28 = vpop.f32.mrf.mxu1  ;;  %5255 = vmatprep.mubr.bf16.mxu1 %v10414_v61 }
 0x32c   : > { %v6991_v21 = vadd.f32 %v6990_v28, %v6989_v29  ;;  %v7105_v12 = vpop.f32.mrf.mxu0 }
 0x32d   : > { %v6992_v48 = vpop.f32.mrf.mxu1  ;;  %v7106_v15 = vadd.f32 %v7105_v12, %v7104_v51  ;;  %v11187_v12 = vld [vmem:[#allocation12_spill] sm:$0xff] }
 0x32e   : > { %v10573_v9 = vadd.f32 %v7103_v19, %v6991_v21  ;;  %v7107_v10 = vpop.f32.mrf.mxu0  ;;  %5417 = vmatmul.mubr.bf16.gmra.mxu0 %v10393_v43 }
 0x32f   : > { %v6993_v33 = vpop.f32.mrf.mxu1  ;;  %5424 = vmatprep.mubr.bf16.mxu0 %v6350_v25  ;;  %v11186_v25 = vld [vmem:[#allocation8_spill] sm:$0xff] }
 0x330   : > { %v6994_v34 = vadd.f32 %v6993_v33, %v6992_v48  ;;  %v7108_v52 = vpop.f32.mrf.mxu0 }
 0x331   : > { %v7109_v59 = vadd.f32 %v7108_v52, %v7107_v10 }
 0x332   : > { %v10576_v14 = vadd.f32 %v7106_v15, %v6994_v34  ;;  %v7110_v23 = vpop.f32.mrf.mxu0  ;;  %v6995_v58 = vpop.f32.mrf.mxu1  ;;  %5256 = vmatmul.mubr.bf16.gmra.mxu1 %v10406_v6 }
 0x333   : > { %5263 = vmatprep.mubr.bf16.mxu1 %v10384_v20 }
 0x334   : > { %v7111_v17 = vpop.f32.mrf.mxu0  ;;  %v6996_v40 = vpop.f32.mrf.mxu1 }
 0x335   : > { %v7112_v36 = vadd.f32 %v7111_v17, %v7110_v23  ;;  %v6997_v43 = vadd.f32 %v6996_v40, %v6995_v58  ;;  %v11188_v40 = vld [vmem:[#allocation15_spill] sm:$0xff] }
 0x336   : > { %v7113_v7 = vpop.f32.mrf.mxu0  ;;  %5425 = vmatmul.mubr.bf16.gmra.mxu0 %v6349_v1  ;;  %v6998_v62 = vpop.f32.mrf.mxu1 }
 0x337   : > { %7551 = vmatprep.mubr.bf16.mxu0 %v11185_v32  ;;  %v10583_v54 = vadd.f32 %v7109_v59, %v6997_v43  ;;  %v11189_v43 = vld [vmem:[#allocation17_spill] sm:$0xff] }
 0x338   : > { %v7114_v55 = vpop.f32.mrf.mxu0  ;;  %v6999_v11 = vpop.f32.mrf.mxu1 }
 0x339   : > { %v7115_v41 = vadd.f32 %v7114_v55, %v7113_v7  ;;  %v7000_v57 = vadd.f32 %v6999_v11, %v6998_v62 }
 0x33a   : > { %v7116_v49 = vpop.f32.mrf.mxu0  ;;  %v7001_v31 = vpop.f32.mrf.mxu1  ;;  %5264 = vmatmul.mubr.bf16.gmra.mxu1 %v10389_v5 }
 0x33b   : > { %v10586_v6 = vadd.f32 %v7112_v36, %v7000_v57  ;;  %7503 = vmatprep.mubr.bf16.mxu1 %v9864_v46 }
 0x33c   : > { %v7117_v3 = vpop.f32.mrf.mxu0  ;;  %v7002_v29 = vpop.f32.mrf.mxu1 }
 0x33d   : > { %v7118_v19 = vadd.f32 %v7117_v3, %v7116_v49  ;;  %v7003_v51 = vadd.f32 %v7002_v29, %v7001_v31 }
 0x33e   : > { %v7119_v28 = vpop.f32.mrf.mxu0  ;;  %7552 = vmatmul.mubr.bf16.vlgmr.msra.gmra.mxu0 %v11186_v25  ;;  %v7004_v21 = vpop.f32.mrf.mxu1 }
 0x33f   : > { %7555 = vmatprep.mubr.bf16.mxu0 %v11187_v12  ;;  %v10591_v48 = vadd.f32 %v7115_v41, %v7003_v51 }
 0x340   : > { %v7120_v15 = vpop.f32.mrf.mxu0  ;;  %v7005_v10 = vpop.f32.mrf.mxu1 }
 0x341   : > { %v7121_v33 = vadd.f32 %v7120_v15, %v7119_v28  ;;  %v7006_v5 = vadd.f32 %v7005_v10, %v7004_v21  ;;  %v11191_v28 = vld [vmem:[#allocation19_spill] sm:$0xff] }
 0x342   : > { %v7122_v34 = vpop.f32.mrf.mxu0  ;;  %v7007_v52 = vpop.f32.mrf.mxu1  ;;  %7504 = vmatmul.mubr.bf16.vlgmr.msra.gmra.mxu1 %v9955_v63 }
 0x343   : > { %v10594_v46 = vadd.f32 %v7118_v19, %v7006_v5  ;;  %7507 = vmatprep.mubr.bf16.mxu1 %v10043_v18  ;;  %v11190_v19 = vld [vmem:[#allocation18_spill] sm:$0xff] }
 0x344   : > { %v7123_v59 = vpop.f32.mrf.mxu0  ;;  %v7008_v23 = vpop.f32.mrf.mxu1 }
 0x345   : > { %v7124_v1 = vadd.f32 %v7123_v59, %v7122_v34  ;;  %v7009_v58 = vadd.f32 %v7008_v23, %v7007_v52 }
 0x346   : > { %v7125_v17 = vpop.f32.mrf.mxu0  ;;  %7556 = vmatmul.mubr.bf16.gmra.mxu0 %v11188_v40  ;;  %v7010_v36 = vpop.f32.mrf.mxu1 }
 0x347   : > { %7559 = vmatprep.mubr.bf16.mxu0 %v11189_v43  ;;  %v10599_v7 = vadd.f32 %v7121_v33, %v7009_v58 }
 0x348   : > { %v7126_v62 = vpop.f32.mrf.mxu0  ;;  %v7011_v32 = vpop.f32.mrf.mxu1 }
 0x349   : > { %v7127_v55 = vadd.f32 %v7126_v62, %v7125_v17  ;;  %v7012_v63 = vadd.f32 %v7011_v32, %v7010_v36  ;;  %v11193_v17 = vld [vmem:[#allocation21_spill] sm:$0xff] }
 0x34a   : > { %v7128_v11 = vpop.f32.mrf.mxu0  ;;  %v7013_v41 = vpop.f32.mrf.mxu1  ;;  %7508 = vmatmul.mubr.bf16.gmra.mxu1 %v10073_v53 }
 0x34b   : > { %v10602_v18 = vadd.f32 %v7124_v1, %v7012_v63  ;;  %7511 = vmatprep.mubr.bf16.mxu1 %v10111_v39  ;;  %v11192_v1 = vld [vmem:[#allocation20_spill] sm:$0xff] }
 0x34c   : > { %v7129_v57 = vpop.f32.mrf.mxu0  ;;  %v7014_v49 = vpop.f32.mrf.mxu1 }
 0x34d   : > { %v7130_v31 = vadd.f32 %v7129_v57, %v7128_v11  ;;  %v7015_v3 = vadd.f32 %v7014_v49, %v7013_v41 }
 0x34e   : > { %v7131_v29 = vpop.f32.mrf.mxu0  ;;  %7560 = vmatmul.mubr.bf16.gmra.mxu0 %v11190_v19  ;;  %v7016_v51 = vpop.f32.mrf.mxu1 }
 0x34f   : > { %7563 = vmatprep.mubr.bf16.mxu0 %v11191_v28  ;;  %v10607_v25 = vadd.f32 %v7127_v55, %v7015_v3 }
 0x350   : > { %v7132_v21 = vpop.f32.mrf.mxu0  ;;  %v7017_v12 = vpop.f32.mrf.mxu1 }
 0x351   : > { %v7133_v15 = vadd.f32 %v7132_v21, %v7131_v29  ;;  %v7018_v53 = vadd.f32 %v7017_v12, %v7016_v51  ;;  %v11195_v29 = vld [vmem:[#allocation23_spill] sm:$0xff] }
 0x352   : > { %v7134_v10 = vpop.f32.mrf.mxu0  ;;  %v7019_v33 = vpop.f32.mrf.mxu1  ;;  %7512 = vmatmul.mubr.bf16.gmra.mxu1 %v10143_v42 }
 0x353   : > { %v10610_v39 = vadd.f32 %v7130_v31, %v7018_v53  ;;  %7515 = vmatprep.mubr.bf16.mxu1 %v11173_v13  ;;  %v11194_v31 = vld [vmem:[#allocation22_spill] sm:$0xff] }
 0x354   : > { %v7135_v5 = vpop.f32.mrf.mxu0  ;;  %v7020_v34 = vpop.f32.mrf.mxu1 }
 0x355   : > { %v7136_v52 = vadd.f32 %v7135_v5, %v7134_v10  ;;  %v7021_v59 = vadd.f32 %v7020_v34, %v7019_v33 }
 0x356   : > { %v7137_v23 = vpop.f32.mrf.mxu0  ;;  %7564 = vmatmul.mubr.bf16.gmra.mxu0 %v11192_v1  ;;  %v7022_v58 = vpop.f32.mrf.mxu1 }
 0x357   : > { %7567 = vmatprep.mubr.bf16.mxu0 %v11193_v17  ;;  %v10615_v40 = vadd.f32 %v7133_v15, %v7021_v59 }
 0x358   : > { %v7138_v36 = vpop.f32.mrf.mxu0  ;;  %v7023_v43 = vpop.f32.mrf.mxu1 }
 0x359   : > { %v7139_v62 = vadd.f32 %v7138_v36, %v7137_v23  ;;  %v7024_v42 = vadd.f32 %v7023_v43, %v7022_v58  ;;  %v11197_v23 = vld [vmem:[#allocation6_spill] sm:$0xff] }
 0x35a   : > { %v7140_v32 = vpop.f32.mrf.mxu0  ;;  %v7025_v55 = vpop.f32.mrf.mxu1  ;;  %7516 = vmatmul.mubr.bf16.gmra.mxu1 %v11176_v37 }
 0x35b   : > { %v10618_v13 = vadd.f32 %v7136_v52, %v7024_v42  ;;  %7519 = vmatprep.mubr.bf16.mxu1 %v11179_v60  ;;  %v11196_v52 = vld [vmem:[#allocation4_spill] sm:$0xff] }
 0x35c   : > { %v7141_v63 = vpop.f32.mrf.mxu0  ;;  %v7026_v11 = vpop.f32.mrf.mxu1 }
 0x35d   : > { %v7142_v41 = vadd.f32 %v7141_v63, %v7140_v32  ;;  %v7027_v57 = vadd.f32 %v7026_v11, %v7025_v55 }
 0x35e   : > { %v7143_v49 = vpop.f32.mrf.mxu0  ;;  %7568 = vmatmul.mubr.bf16.gmra.mxu0 %v11194_v31  ;;  %v7028_v3 = vpop.f32.mrf.mxu1 }
 0x35f   : > { %7571 = vmatprep.mubr.bf16.mxu0 %v11195_v29  ;;  %v10623_v19 = vadd.f32 %v7139_v62, %v7027_v57 }
 0x360   : > { %v7144_v51 = vpop.f32.mrf.mxu0  ;;  %v7029_v28 = vpop.f32.mrf.mxu1 }
 0x361   : > { %v7145_v21 = vadd.f32 %v7144_v51, %v7143_v49  ;;  %v7030_v37 = vadd.f32 %v7029_v28, %v7028_v3  ;;  %v11199_v49 = vld [vmem:[#allocation13_spill] sm:$0xff] }
 0x362   : > { %v7146_v12 = vpop.f32.mrf.mxu0  ;;  %v7031_v15 = vpop.f32.mrf.mxu1  ;;  %7520 = vmatmul.mubr.bf16.gmra.mxu1 %v11182_v30 }
 0x363   : > { %v10626_v60 = vadd.f32 %v7142_v41, %v7030_v37  ;;  %7523 = vmatprep.mubr.bf16.mxu1 %v11183_v2  ;;  %v11198_v41 = vld [vmem:[#allocation9_spill] sm:$0xff] }
 0x364   : > { %v7147_v53 = vpop.f32.mrf.mxu0  ;;  %v7032_v10 = vpop.f32.mrf.mxu1 }
 0x365   : > { %v7148_v33 = vadd.f32 %v7147_v53, %v7146_v12  ;;  %v7033_v5 = vadd.f32 %v7032_v10, %v7031_v15 }
 0x366   : > { %v7149_v34 = vpop.f32.mrf.mxu0  ;;  %7572 = vmatmul.mubr.bf16.gmra.mxu0 %v11196_v52  ;;  %v7034_v59 = vpop.f32.mrf.mxu1 }
 0x367   : > { %7575 = vmatprep.mubr.bf16.mxu0 %v11197_v23  ;;  %v10631_v1 = vadd.f32 %v7145_v21, %v7033_v5 }
 0x368   : > { %v7150_v58 = vpop.f32.mrf.mxu0  ;;  %v7035_v17 = vpop.f32.mrf.mxu1 }
 0x369   : > { %v7151_v36 = vadd.f32 %v7150_v58, %v7149_v34  ;;  %v7036_v30 = vadd.f32 %v7035_v17, %v7034_v59 }
 0x36a   : > { %v7152_v43 = vpop.f32.mrf.mxu0  ;;  %v7037_v62 = vpop.f32.mrf.mxu1  ;;  %7524 = vmatmul.mubr.bf16.gmra.mxu1 %v11184_v27 }
 0x36b   : > { %v10634_v2 = vadd.f32 %v7148_v33, %v7036_v30  ;;  %7527 = vmatprep.mubr.bf16.mxu1 %v10387_v45  ;;  %v11200_v33 = vld [vmem:[#allocation7_spill] sm:$0xff] }
 0x36c   : > { %v7153_v42 = vpop.f32.mrf.mxu0  ;;  %v7038_v32 = vpop.f32.mrf.mxu1 }
 0x36d   : > { %v7154_v55 = vadd.f32 %v7153_v42, %v7152_v43  ;;  %v7039_v63 = vadd.f32 %v7038_v32, %v7037_v62 }
 0x36e   : > { %v7155_v11 = vpop.f32.mrf.mxu0  ;;  %7576 = vmatmul.mubr.bf16.gmra.mxu0 %v11198_v41  ;;  %v7040_v57 = vpop.f32.mrf.mxu1 }
 0x36f   : > { %7579 = vmatprep.mubr.bf16.mxu0 %v11199_v49  ;;  %v10639_v31 = vadd.f32 %v7151_v36, %v7039_v63 }
 0x370   : > { %v7156_v3 = vpop.f32.mrf.mxu0  ;;  %v7041_v29 = vpop.f32.mrf.mxu1 }
 0x371   : > { %v7157_v51 = vadd.f32 %v7156_v3, %v7155_v11  ;;  %v7042_v27 = vadd.f32 %v7041_v29, %v7040_v57 }
 0x372   : > { %v7158_v28 = vpop.f32.mrf.mxu0  ;;  %v7043_v21 = vpop.f32.mrf.mxu1  ;;  %7528 = vmatmul.mubr.bf16.gmra.mxu1 %v10414_v61 }
 0x373   : > { %v10642_v45 = vadd.f32 %v7154_v55, %v7042_v27  ;;  %7531 = vmatprep.mubr.bf16.mxu1 %v10384_v20 }
 0x374   : > { %v7159_v37 = vpop.f32.mrf.mxu0  ;;  %v7044_v12 = vpop.f32.mrf.mxu1 }
 0x375   : > { %v7160_v15 = vadd.f32 %v7159_v37, %v7158_v28  ;;  %v7045_v53 = vadd.f32 %v7044_v12, %v7043_v21 }
 0x376   : > { %v7161_v10 = vpop.f32.mrf.mxu0  ;;  %7580 = vmatmul.mubr.bf16.gmra.mxu0 %v11200_v33  ;;  %v7046_v5 = vpop.f32.mrf.mxu1 }
 0x377   : > { %v10646_v34 = vadd.f32 %v7157_v51, %v7045_v53 }
 0x378   : > { %v7162_v52 = vpop.f32.mrf.mxu0  ;;  %v7047_v59 = vpop.f32.mrf.mxu1 }
 0x379   : > { %v7163_v23 = vadd.f32 %v7162_v52, %v7161_v10  ;;  %v7048_v58 = vadd.f32 %v7047_v59, %v7046_v5 }
 0x37a   : > { %v7164_v17 = vpop.f32.mrf.mxu0  ;;  %v7049_v61 = vpop.f32.mrf.mxu1  ;;  %7532 = vmatmul.mubr.bf16.gmra.mxu1 %v6351_v47 }
 0x37b   : > { %v10651_v20 = vadd.f32 %v7160_v15, %v7048_v58 }
 0x37c   : > { %v7165_v36 = vpop.f32.mrf.mxu0  ;;  %v7050_v30 = vpop.f32.mrf.mxu1 }
 0x37d   : > { %v7166_v43 = vadd.f32 %v7165_v36, %v7164_v17  ;;  %v7051_v62 = vadd.f32 %v7050_v30, %v7049_v61 }
 0x37e   : > { %v7295_v42 = vpop.f32.mrf.mxu0  ;;  %v7052_v32 = vpop.f32.mrf.mxu1 }
 0x37f   : > { %v10653_v55 = vadd.f32 %v7163_v23, %v7051_v62 }
 0x380   : > { %v7296_v63 = vpop.f32.mrf.mxu0  ;;  %v7053_v11 = vpop.f32.mrf.mxu1 }
 0x381   : > { %v7297_v41 = vadd.f32 %v7296_v63, %v7295_v42  ;;  %v7054_v57 = vadd.f32 %v7053_v11, %v7052_v32 }
 0x382   : > { %v7298_v49 = vpop.f32.mrf.mxu0  ;;  %v7183_v3 = vpop.f32.mrf.mxu1 }
 0x383   : > { %v10655_v29 = vadd.f32 %v7166_v43, %v7054_v57 }
 0x384   : > { %v7299_v38 = vpop.f32.mrf.mxu0  ;;  %v7184_v22 = vpop.f32.mrf.mxu1 }
 0x385   : > { %v7300_v47 = vadd.f32 %v7299_v38, %v7298_v49  ;;  %v7185_v51 = vadd.f32 %v7184_v22, %v7183_v3 }
 0x386   : > { %v7301_v27 = vpop.f32.mrf.mxu0  ;;  %v7186_v28 = vpop.f32.mrf.mxu1 }
 0x387   : > { %v5146_v21 = vadd.f32 %v7185_v51, %v10483_v4 }
 0x388   : > { %v7302_v37 = vpop.f32.mrf.mxu0  ;;  %v7187_v12 = vpop.f32.mrf.mxu1 }
 0x389   : > { %v7303_v15 = vadd.f32 %v7302_v37, %v7301_v27  ;;  %v7188_v53 = vadd.f32 %v7187_v12, %v7186_v28  ;;  %v10658_v33 = vadd.f32 %v7297_v41, %v5146_v21 }
 0x38a   : > { %v7304_v10 = vpop.f32.mrf.mxu0  ;;  %v7189_v5 = vpop.f32.mrf.mxu1 }
 0x38b   : > { %v5149_v52 = vadd.f32 %v7188_v53, %v10488_v50 }
 0x38c   : > { %v7305_v59 = vpop.f32.mrf.mxu0  ;;  %v7190_v23 = vpop.f32.mrf.mxu1 }
 0x38d   : > { %v7306_v58 = vadd.f32 %v7305_v59, %v7304_v10  ;;  %v7191_v17 = vadd.f32 %v7190_v23, %v7189_v5  ;;  %v10661_v36 = vadd.f32 %v7300_v47, %v5149_v52 }
 0x38e   : > { %v7307_v61 = vpop.f32.mrf.mxu0  ;;  %v7192_v30 = vpop.f32.mrf.mxu1 }
 0x38f   : > { %v5154_v4 = vadd.f32 %v7191_v17, %v10499_v35 }
 0x390   : > { %v7308_v43 = vpop.f32.mrf.mxu0  ;;  %v7193_v62 = vpop.f32.mrf.mxu1 }
 0x391   : > { %v7309_v42 = vadd.f32 %v7308_v43, %v7307_v61  ;;  %v7194_v32 = vadd.f32 %v7193_v62, %v7192_v30  ;;  %v10664_v11 = vadd.f32 %v7303_v15, %v5154_v4 }
 0x392   : > { %v7310_v63 = vpop.f32.mrf.mxu0  ;;  %v7195_v41 = vpop.f32.mrf.mxu1 }
 0x393   : > { %v5157_v50 = vadd.f32 %v7194_v32, %v10504_v0 }
 0x394   : > { %v7311_v57 = vpop.f32.mrf.mxu0  ;;  %v7196_v49 = vpop.f32.mrf.mxu1 }
 0x395   : > { %v7312_v3 = vadd.f32 %v7311_v57, %v7310_v63  ;;  %v7197_v38 = vadd.f32 %v7196_v49, %v7195_v41  ;;  %v10667_v47 = vadd.f32 %v7306_v58, %v5157_v50 }
 0x396   : > { %v7313_v22 = vpop.f32.mrf.mxu0  ;;  %v7198_v51 = vpop.f32.mrf.mxu1 }
 0x397   : > { %v5162_v35 = vadd.f32 %v7197_v38, %v10524_v24 }
 0x398   : > { %v7314_v27 = vpop.f32.mrf.mxu0  ;;  %v7199_v28 = vpop.f32.mrf.mxu1 }
 0x399   : > { %v7315_v21 = vadd.f32 %v7314_v27, %v7313_v22  ;;  %v7200_v37 = vadd.f32 %v7199_v28, %v7198_v51  ;;  %v10670_v15 = vadd.f32 %v7309_v42, %v5162_v35 }
 0x39a   : > { %v7316_v12 = vpop.f32.mrf.mxu0  ;;  %v7201_v53 = vpop.f32.mrf.mxu1 }
 0x39b   : > { %v5165_v0 = vadd.f32 %v7200_v37, %v10534_v16 }
 0x39c   : > { %v7317_v10 = vpop.f32.mrf.mxu0  ;;  %v7202_v5 = vpop.f32.mrf.mxu1 }
 0x39d   : > { %v7318_v52 = vadd.f32 %v7317_v10, %v7316_v12  ;;  %v7203_v59 = vadd.f32 %v7202_v5, %v7201_v53  ;;  %v10673_v58 = vadd.f32 %v7312_v3, %v5165_v0 }
 0x39e   : > { %v7319_v23 = vpop.f32.mrf.mxu0  ;;  %v7204_v17 = vpop.f32.mrf.mxu1 }
 0x39f   : > { %v5170_v24 = vadd.f32 %v7203_v59, %v10542_v56 }
 0x3a0   : > { %v7320_v61 = vpop.f32.mrf.mxu0  ;;  %v7205_v30 = vpop.f32.mrf.mxu1 }
 0x3a1   : > { %v7321_v4 = vadd.f32 %v7320_v61, %v7319_v23  ;;  %v7206_v43 = vadd.f32 %v7205_v30, %v7204_v17  ;;  %v10676_v42 = vadd.f32 %v7315_v21, %v5170_v24 }
 0x3a2   : > { %v7322_v62 = vpop.f32.mrf.mxu0  ;;  %v7207_v32 = vpop.f32.mrf.mxu1 }
 0x3a3   : > { %v5173_v16 = vadd.f32 %v7206_v43, %v10546_v44 }
 0x3a4   : > { %v7323_v63 = vpop.f32.mrf.mxu0  ;;  %v7208_v41 = vpop.f32.mrf.mxu1 }
 0x3a5   : > { %v7324_v50 = vadd.f32 %v7323_v63, %v7322_v62  ;;  %v7209_v57 = vadd.f32 %v7208_v41, %v7207_v32  ;;  %v10679_v3 = vadd.f32 %v7318_v52, %v5173_v16 }
 0x3a6   : > { %v7325_v49 = vpop.f32.mrf.mxu0  ;;  %v7210_v38 = vpop.f32.mrf.mxu1 }
 0x3a7   : > { %v5178_v56 = vadd.f32 %v7209_v57, %v10560_v8 }
 0x3a8   : > { %v7326_v22 = vpop.f32.mrf.mxu0  ;;  %v7211_v51 = vpop.f32.mrf.mxu1 }
 0x3a9   : > { %v7327_v35 = vadd.f32 %v7326_v22, %v7325_v49  ;;  %v7212_v27 = vadd.f32 %v7211_v51, %v7210_v38  ;;  %v10682_v21 = vadd.f32 %v7321_v4, %v5178_v56 }
 0x3aa   : > { %v7328_v28 = vpop.f32.mrf.mxu0  ;;  %v7213_v37 = vpop.f32.mrf.mxu1 }
 0x3ab   : > { %v5181_v44 = vadd.f32 %v7212_v27, %v10564_v26 }
 0x3ac   : > { %v7329_v12 = vpop.f32.mrf.mxu0  ;;  %v7214_v53 = vpop.f32.mrf.mxu1 }
 0x3ad   : > { %v7330_v0 = vadd.f32 %v7329_v12, %v7328_v28  ;;  %v7215_v10 = vadd.f32 %v7214_v53, %v7213_v37  ;;  %v10685_v52 = vadd.f32 %v7324_v50, %v5181_v44 }
 0x3ae   : > { %v7331_v5 = vpop.f32.mrf.mxu0  ;;  %v7216_v59 = vpop.f32.mrf.mxu1 }
 0x3af   : > { %v5186_v8 = vadd.f32 %v7215_v10, %v10573_v9 }
 0x3b0   : > { %v7332_v23 = vpop.f32.mrf.mxu0  ;;  %v7217_v17 = vpop.f32.mrf.mxu1 }
 0x3b1   : > { %v7333_v24 = vadd.f32 %v7332_v23, %v7331_v5  ;;  %v7218_v61 = vadd.f32 %v7217_v17, %v7216_v59  ;;  %v10688_v4 = vadd.f32 %v7327_v35, %v5186_v8 }
 0x3b2   : > { %v7334_v30 = vpop.f32.mrf.mxu0  ;;  %v7219_v43 = vpop.f32.mrf.mxu1 }
 0x3b3   : > { %v5189_v26 = vadd.f32 %v7218_v61, %v10576_v14 }
 0x3b4   : > { %v7335_v62 = vpop.f32.mrf.mxu0  ;;  %v7220_v32 = vpop.f32.mrf.mxu1 }
 0x3b5   : > { %v7336_v16 = vadd.f32 %v7335_v62, %v7334_v30  ;;  %v7221_v63 = vadd.f32 %v7220_v32, %v7219_v43  ;;  %v10691_v50 = vadd.f32 %v7330_v0, %v5189_v26 }
 0x3b6   : > { %v7337_v41 = vpop.f32.mrf.mxu0  ;;  %v7222_v57 = vpop.f32.mrf.mxu1 }
 0x3b7   : > { %v5194_v9 = vadd.f32 %v7221_v63, %v10583_v54 }
 0x3b8   : > { %v7338_v49 = vpop.f32.mrf.mxu0  ;;  %v7223_v38 = vpop.f32.mrf.mxu1 }
 0x3b9   : > { %v7339_v56 = vadd.f32 %v7338_v49, %v7337_v41  ;;  %v7224_v22 = vadd.f32 %v7223_v38, %v7222_v57  ;;  %v10694_v35 = vadd.f32 %v7333_v24, %v5194_v9 }
 0x3ba   : > { %v7340_v51 = vpop.f32.mrf.mxu0  ;;  %v7225_v27 = vpop.f32.mrf.mxu1 }
 0x3bb   : > { %v5197_v14 = vadd.f32 %v7224_v22, %v10586_v6 }
 0x3bc   : > { %v7341_v28 = vpop.f32.mrf.mxu0  ;;  %v7226_v37 = vpop.f32.mrf.mxu1 }
 0x3bd   : > { %v7342_v44 = vadd.f32 %v7341_v28, %v7340_v51  ;;  %v7227_v12 = vadd.f32 %v7226_v37, %v7225_v27  ;;  %v10697_v0 = vadd.f32 %v7336_v16, %v5197_v14 }
 0x3be   : > { %v7343_v53 = vpop.f32.mrf.mxu0  ;;  %v7228_v10 = vpop.f32.mrf.mxu1 }
 0x3bf   : > { %v5202_v54 = vadd.f32 %v7227_v12, %v10591_v48 }
 0x3c0   : > { %v7344_v5 = vpop.f32.mrf.mxu0  ;;  %v7229_v59 = vpop.f32.mrf.mxu1 }
 0x3c1   : > { %v7345_v8 = vadd.f32 %v7344_v5, %v7343_v53  ;;  %v7230_v23 = vadd.f32 %v7229_v59, %v7228_v10  ;;  %v10700_v24 = vadd.f32 %v7339_v56, %v5202_v54 }
 0x3c2   : > { %v7346_v17 = vpop.f32.mrf.mxu0  ;;  %v7231_v61 = vpop.f32.mrf.mxu1 }
 0x3c3   : > { %v5205_v6 = vadd.f32 %v7230_v23, %v10594_v46 }
 0x3c4   : > { %v7347_v30 = vpop.f32.mrf.mxu0  ;;  %v7232_v43 = vpop.f32.mrf.mxu1 }
 0x3c5   : > { %v7348_v26 = vadd.f32 %v7347_v30, %v7346_v17  ;;  %v7233_v62 = vadd.f32 %v7232_v43, %v7231_v61  ;;  %v10703_v16 = vadd.f32 %v7342_v44, %v5205_v6 }
 0x3c6   : > { %v7349_v32 = vpop.f32.mrf.mxu0  ;;  %v7234_v63 = vpop.f32.mrf.mxu1 }
 0x3c7   : > { %v5210_v48 = vadd.f32 %v7233_v62, %v10599_v7 }
 0x3c8   : > { %v7350_v41 = vpop.f32.mrf.mxu0  ;;  %v7235_v57 = vpop.f32.mrf.mxu1 }
 0x3c9   : > { %v7351_v9 = vadd.f32 %v7350_v41, %v7349_v32  ;;  %v7236_v49 = vadd.f32 %v7235_v57, %v7234_v63  ;;  %v10706_v56 = vadd.f32 %v7345_v8, %v5210_v48 }
 0x3ca   : > { %v7352_v38 = vpop.f32.mrf.mxu0  ;;  %v7237_v22 = vpop.f32.mrf.mxu1 }
 0x3cb   : > { %v5213_v46 = vadd.f32 %v7236_v49, %v10602_v18 }
 0x3cc   : > { %v7353_v51 = vpop.f32.mrf.mxu0  ;;  %v7238_v27 = vpop.f32.mrf.mxu1 }
 0x3cd   : > { %v7354_v14 = vadd.f32 %v7353_v51, %v7352_v38  ;;  %v7239_v28 = vadd.f32 %v7238_v27, %v7237_v22  ;;  %v10709_v44 = vadd.f32 %v7348_v26, %v5213_v46 }
 0x3ce   : > { %v7355_v37 = vpop.f32.mrf.mxu0  ;;  %v7240_v12 = vpop.f32.mrf.mxu1 }
 0x3cf   : > { %v5218_v7 = vadd.f32 %v7239_v28, %v10607_v25 }
 0x3d0   : > { %v7356_v53 = vpop.f32.mrf.mxu0  ;;  %v7241_v10 = vpop.f32.mrf.mxu1 }
 0x3d1   : > { %v7357_v54 = vadd.f32 %v7356_v53, %v7355_v37  ;;  %v7242_v5 = vadd.f32 %v7241_v10, %v7240_v12  ;;  %v10712_v8 = vadd.f32 %v7351_v9, %v5218_v7 }
 0x3d2   : > { %v7358_v59 = vpop.f32.mrf.mxu0  ;;  %v7243_v23 = vpop.f32.mrf.mxu1 }
 0x3d3   : > { %v5221_v18 = vadd.f32 %v7242_v5, %v10610_v39 }
 0x3d4   : > { %v7359_v17 = vpop.f32.mrf.mxu0  ;;  %v7244_v61 = vpop.f32.mrf.mxu1 }
 0x3d5   : > { %v7360_v6 = vadd.f32 %v7359_v17, %v7358_v59  ;;  %v7245_v30 = vadd.f32 %v7244_v61, %v7243_v23  ;;  %v10715_v26 = vadd.f32 %v7354_v14, %v5221_v18 }
 0x3d6   : > { %v7361_v43 = vpop.f32.mrf.mxu0  ;;  %v7246_v62 = vpop.f32.mrf.mxu1 }
 0x3d7   : > { %v5226_v25 = vadd.f32 %v7245_v30, %v10615_v40 }
 0x3d8   : > { %v7362_v32 = vpop.f32.mrf.mxu0  ;;  %v7247_v63 = vpop.f32.mrf.mxu1 }
 0x3d9   : > { %v7363_v48 = vadd.f32 %v7362_v32, %v7361_v43  ;;  %v7248_v41 = vadd.f32 %v7247_v63, %v7246_v62  ;;  %v10718_v9 = vadd.f32 %v7357_v54, %v5226_v25 }
 0x3da   : > { %v7364_v57 = vpop.f32.mrf.mxu0  ;;  %v7249_v49 = vpop.f32.mrf.mxu1 }
 0x3db   : > { %v5229_v39 = vadd.f32 %v7248_v41, %v10618_v13 }
 0x3dc   : > { %v7365_v38 = vpop.f32.mrf.mxu0  ;;  %v7250_v22 = vpop.f32.mrf.mxu1 }
 0x3dd   : > { %v7366_v46 = vadd.f32 %v7365_v38, %v7364_v57  ;;  %v7251_v51 = vadd.f32 %v7250_v22, %v7249_v49  ;;  %v10721_v14 = vadd.f32 %v7360_v6, %v5229_v39 }
 0x3de   : > { %v7367_v27 = vpop.f32.mrf.mxu0  ;;  %v7252_v28 = vpop.f32.mrf.mxu1 }
 0x3df   : > { %v5234_v40 = vadd.f32 %v7251_v51, %v10623_v19 }
 0x3e0   : > { %v7368_v37 = vpop.f32.mrf.mxu0  ;;  %v7253_v12 = vpop.f32.mrf.mxu1 }
 0x3e1   : > { %v7369_v7 = vadd.f32 %v7368_v37, %v7367_v27  ;;  %v7254_v53 = vadd.f32 %v7253_v12, %v7252_v28  ;;  %v10724_v54 = vadd.f32 %v7363_v48, %v5234_v40 }
 0x3e2   : > { %v7370_v10 = vpop.f32.mrf.mxu0  ;;  %v7255_v5 = vpop.f32.mrf.mxu1 }
 0x3e3   : > { %v5237_v13 = vadd.f32 %v7254_v53, %v10626_v60 }
 0x3e4   : > { %v7371_v59 = vpop.f32.mrf.mxu0  ;;  %v7256_v23 = vpop.f32.mrf.mxu1 }
 0x3e5   : > { %v7372_v18 = vadd.f32 %v7371_v59, %v7370_v10  ;;  %v7257_v17 = vadd.f32 %v7256_v23, %v7255_v5  ;;  %v10727_v6 = vadd.f32 %v7366_v46, %v5237_v13 }
 0x3e6   : > { %v7373_v61 = vpop.f32.mrf.mxu0  ;;  %v7258_v30 = vpop.f32.mrf.mxu1 }
 0x3e7   : > { %v5242_v19 = vadd.f32 %v7257_v17, %v10631_v1 }
 0x3e8   : > { %v7374_v43 = vpop.f32.mrf.mxu0  ;;  %v7259_v62 = vpop.f32.mrf.mxu1 }
 0x3e9   : > { %v7375_v25 = vadd.f32 %v7374_v43, %v7373_v61  ;;  %v7260_v32 = vadd.f32 %v7259_v62, %v7258_v30  ;;  %v10730_v48 = vadd.f32 %v7369_v7, %v5242_v19 }
 0x3ea   : > { %v7376_v63 = vpop.f32.mrf.mxu0  ;;  %v7261_v41 = vpop.f32.mrf.mxu1 }
 0x3eb   : > { %v5245_v60 = vadd.f32 %v7260_v32, %v10634_v2 }
 0x3ec   : > { %v7377_v57 = vpop.f32.mrf.mxu0  ;;  %v7262_v49 = vpop.f32.mrf.mxu1 }
 0x3ed   : > { %v7378_v39 = vadd.f32 %v7377_v57, %v7376_v63  ;;  %v7263_v38 = vadd.f32 %v7262_v49, %v7261_v41  ;;  %v10733_v46 = vadd.f32 %v7372_v18, %v5245_v60  ;;  %v10764_v57 = vld [vmem:[%s11000_s8] ss:$0 sm:$0xff] }
 0x3ee   : > { %v7379_v22 = vpop.f32.mrf.mxu0  ;;  %v7264_v51 = vpop.f32.mrf.mxu1 }
 0x3ef   : > { %v5250_v1 = vadd.f32 %v7263_v38, %v10639_v31 }
 0x3f0   : > { %v7380_v27 = vpop.f32.mrf.mxu0  ;;  %v7265_v28 = vpop.f32.mrf.mxu1 }
 0x3f1   : > { %v7381_v40 = vadd.f32 %v7380_v27, %v7379_v22  ;;  %v7266_v37 = vadd.f32 %v7265_v28, %v7264_v51  ;;  %v10736_v7 = vadd.f32 %v7375_v25, %v5250_v1  ;;  %v10772_v22 = vld [vmem:[%s11001_s9] ss:$0 sm:$0xff] }
 0x3f2   : > { %v7382_v12 = vpop.f32.mrf.mxu0  ;;  %v7267_v53 = vpop.f32.mrf.mxu1  ;;  %v10777_v1 = vld [vmem:[%s10998_s6] ss:$0 sm:$0xff] }
 0x3f3   : > { %v5253_v2 = vadd.f32 %v7266_v37, %v10642_v45 }
 0x3f4   : > { %v7383_v10 = vpop.f32.mrf.mxu0  ;;  %v7268_v5 = vpop.f32.mrf.mxu1 }
 0x3f5   : > { %v7384_v13 = vadd.f32 %v7383_v10, %v7382_v12  ;;  %v7269_v59 = vadd.f32 %v7268_v5, %v7267_v53  ;;  %v10741_v18 = vadd.f32 %v7378_v39, %v5253_v2 }
 0x3f6   : > { %v10739_v23 = vpop.f32.mrf.mxu0  ;;  %v7270_v17 = vpop.f32.mrf.mxu1 }
 0x3f7   : > { %v5258_v31 = vadd.f32 %v7269_v59, %v10646_v34 }
 0x3f8   : > { %v10744_v61 = vpop.f32.mrf.mxu0  ;;  %v7271_v30 = vpop.f32.mrf.mxu1 }
 0x3f9   : > { %v7272_v19 = vadd.f32 %v7271_v30, %v7270_v17  ;;  %v10748_v62 = vadd.f32 %v7381_v40, %v5258_v31  ;;  %v10783_v40 = vld [vmem:[%s10999_s7] ss:$0 sm:$0xff] }
 0x3fa   : > { %v10746_v43 = vpop.f32.mrf.mxu0  ;;  %v10750_v45 = vpop.f32.mrf.mxu1 }
 0x3fb   : > { %v5261_v25 = vadd.f32 %v7272_v19, %v10651_v20 }
 0x3fc   : > { %v10753_v32 = vpop.f32.mrf.mxu0  ;;  %v10755_v63 = vpop.f32.mrf.mxu1 }
 0x3fd   : > { %v10757_v60 = vadd.f32 %v7384_v13, %v5261_v25 }
 0x3fe   : > { %v7553_v41 = vpop.f32.mrf.mxu0  ;;  %v10759_v34 = vpop.f32.mrf.mxu1 }
 0x3ff   : > { %v5906_v20 = vmul.f32 %v7553_v41, %v10764_v57 }
 0x400   : > { %v5770_v49 = vpop.f32.mrf.mxu0  ;;  %v10766_v39 = vpop.f32.mrf.mxu1 }
 0x401   : > { %v5904_v37 = vmul.f32 %v10764_v57, %v5770_v49  ;;  %v5945_v53 = vadd.f32 %v10772_v22, %v5906_v20 }
 0x402   : > { %v7554_v38 = vpop.f32.mrf.mxu0  ;;  %v7505_v51 = vpop.f32.mrf.mxu1 }
 0x403   : > { %v5476_v27 = vadd.f32 %v7505_v51, %v10664_v11  ;;  %v5907_v13 = vmul.f32 %v7554_v38, %v10764_v57  ;;  %v5943_v19 = vadd.f32 %v10772_v22, %v5904_v37 }
 0x404   : > { %v5773_v28 = vpop.f32.mrf.mxu0  ;;  %v5467_v12 = vpop.f32.mrf.mxu1 }
 0x405   : > { %v5603_v2 = vmul.f32 %v10777_v1, %v5476_v27  ;;  %v5468_v10 = vadd.f32 %v5467_v12, %v10658_v33  ;;  %v5905_v33 = vmul.f32 %v10764_v57, %v5773_v28  ;;  %v5946_v27 = vadd.f32 %v10772_v22, %v5907_v13 }
 0x406   : > { %v7557_v5 = vpop.f32.mrf.mxu0  ;;  %v7506_v11 = vpop.f32.mrf.mxu1 }
 0x407   : > { %v5642_v59 = vadd.f32 %v10783_v40, %v5603_v2  ;;  %v5601_v17 = vmul.f32 %v10777_v1, %v5468_v10  ;;  %v5479_v31 = vadd.f32 %v7506_v11, %v10667_v47  ;;  %v5910_v41 = vmul.f32 %v7557_v5, %v10764_v57 }
 0x408   : > { %v5786_v30 = vpop.f32.mrf.mxu0  ;;  %v5470_v25 = vpop.f32.mrf.mxu1  ;;  %v5944_v5 = vadd.f32 %v10772_v22, %v5905_v33 }
 0x409   : > { %v5977_v49 = vadd.f32 %v5945_v53, %v5642_v59  ;;  %v5640_v20 = vadd.f32 %v10783_v40, %v5601_v17  ;;  %v5604_v47 = vmul.f32 %v10777_v1, %v5479_v31  ;;  %v5471_v38 = vadd.f32 %v5470_v25, %v10661_v36 }
 0x40a   : > { %v7558_v51 = vpop.f32.mrf.mxu0  ;;  %v7509_v12 = vpop.f32.mrf.mxu1  ;;  %v5949_v11 = vadd.f32 %v10772_v22, %v5910_v41  ;;  %v5908_v36 = vmul.f32 %v10764_v57, %v5786_v30 }
 0x40b   : > { %6009 = vst [vmem:[%s10797_s29 + $0x10] sm:$0xff] %v5977_v49  ;;  %v5975_v2 = vadd.f32 %v5943_v19, %v5640_v20  ;;  %v5643_v37 = vadd.f32 %v10783_v40, %v5604_v47  ;;  %v5602_v28 = vmul.f32 %v10777_v1, %v5471_v38  ;;  %v5492_v53 = vadd.f32 %v7509_v12, %v10676_v42 }
 0x40c   : > { %v5789_v10 = vpop.f32.mrf.mxu0  ;;  %v5483_v59 = vpop.f32.mrf.mxu1  ;;  %v5911_v42 = vmul.f32 %v7558_v51, %v10764_v57  ;;  %v5947_v38 = vadd.f32 %v10772_v22, %v5908_v36 }
 0x40d   : > { %6007 = vst [vmem:[%s10797_s29] sm:$0xff] %v5975_v2  ;;  %v5978_v13 = vadd.f32 %v5946_v27, %v5643_v37  ;;  %v5641_v17 = vadd.f32 %v10783_v40, %v5602_v28  ;;  %v5607_v31 = vmul.f32 %v10777_v1, %v5492_v53  ;;  %v5484_v19 = vadd.f32 %v5483_v59, %v10670_v15 }
 0x40e   : > { %v7561_v25 = vpop.f32.mrf.mxu0  ;;  %v7510_v49 = vpop.f32.mrf.mxu1  ;;  %v5909_v27 = vmul.f32 %v10764_v57, %v5789_v10 }
 0x40f   : > { %6010 = vst [vmem:[%s10797_s29 + $0x18] sm:$0xff] %v5978_v13  ;;  %v5976_v33 = vadd.f32 %v5944_v5, %v5641_v17  ;;  %v5646_v41 = vadd.f32 %v10783_v40, %v5607_v31  ;;  %v5605_v30 = vmul.f32 %v10777_v1, %v5484_v19  ;;  %v5495_v20 = vadd.f32 %v7510_v49, %v10679_v3 }
 0x410   : > { %v5802_v47 = vpop.f32.mrf.mxu0  ;;  %v5486_v12 = vpop.f32.mrf.mxu1  ;;  %v5914_v15 = vmul.f32 %v7561_v25, %v10764_v57  ;;  %v5950_v3 = vadd.f32 %v10772_v22, %v5911_v42  ;;  %v5948_v17 = vadd.f32 %v10772_v22, %v5909_v27 }
 0x411   : > { %6008 = vst [vmem:[%s10797_s29 + $0x8] sm:$0xff] %v5976_v33  ;;  %v5981_v51 = vadd.f32 %v5949_v11, %v5646_v41  ;;  %v5644_v2 = vadd.f32 %v10783_v40, %v5605_v30  ;;  %v5608_v37 = vmul.f32 %v10777_v1, %v5495_v20  ;;  %v5487_v28 = vadd.f32 %v5486_v12, %v10673_v58 }
 0x412   : > { %v7562_v53 = vpop.f32.mrf.mxu0  ;;  %v7513_v5 = vpop.f32.mrf.mxu1  ;;  %v5953_v31 = vadd.f32 %v10772_v22, %v5914_v15  ;;  %v5912_v58 = vmul.f32 %v10764_v57, %v5802_v47 }
 0x413   : > { %6013 = vst [vmem:[%s10797_s29 + $0x30] sm:$0xff] %v5981_v51  ;;  %v5979_v36 = vadd.f32 %v5947_v38, %v5644_v2  ;;  %v5647_v10 = vadd.f32 %v10783_v40, %v5608_v37  ;;  %v5606_v59 = vmul.f32 %v10777_v1, %v5487_v28  ;;  %v5508_v11 = vadd.f32 %v7513_v5, %v10688_v4 }
 0x414   : > { %v5805_v13 = vpop.f32.mrf.mxu0  ;;  %v5499_v19 = vpop.f32.mrf.mxu1  ;;  %v5915_v4 = vmul.f32 %v7562_v53, %v10764_v57  ;;  %v5951_v15 = vadd.f32 %v10772_v22, %v5912_v58 }
 0x415   : > { %6011 = vst [vmem:[%s10797_s29 + $0x20] sm:$0xff] %v5979_v36  ;;  %v5982_v25 = vadd.f32 %v5950_v3, %v5647_v10  ;;  %v5645_v42 = vadd.f32 %v10783_v40, %v5606_v59  ;;  %v5611_v49 = vmul.f32 %v10777_v1, %v5508_v11  ;;  %v5500_v33 = vadd.f32 %v5499_v19, %v10682_v21 }
 0x416   : > { %v7565_v41 = vpop.f32.mrf.mxu0  ;;  %v7514_v30 = vpop.f32.mrf.mxu1  ;;  %v5913_v51 = vmul.f32 %v10764_v57, %v5805_v13 }
 0x417   : > { %6014 = vst [vmem:[%s10797_s29 + $0x38] sm:$0xff] %v5982_v25  ;;  %v5980_v20 = vadd.f32 %v5948_v17, %v5645_v42  ;;  %v5650_v38 = vadd.f32 %v10783_v40, %v5611_v49  ;;  %v5609_v47 = vmul.f32 %v10777_v1, %v5500_v33  ;;  %v5511_v27 = vadd.f32 %v7514_v30, %v10691_v50 }
 0x418   : > { %v5818_v12 = vpop.f32.mrf.mxu0  ;;  %v5502_v2 = vpop.f32.mrf.mxu1  ;;  %v5918_v21 = vmul.f32 %v7565_v41, %v10764_v57  ;;  %v5954_v50 = vadd.f32 %v10772_v22, %v5915_v4 }
 0x419   : > { %6012 = vst [vmem:[%s10797_s29 + $0x28] sm:$0xff] %v5980_v20  ;;  %v5985_v37 = vadd.f32 %v5953_v31, %v5650_v38  ;;  %v5648_v28 = vadd.f32 %v10783_v40, %v5609_v47  ;;  %v5612_v53 = vmul.f32 %v10777_v1, %v5511_v27  ;;  %v5503_v3 = vadd.f32 %v5502_v2, %v10685_v52 }
 0x41a   : > { %v7566_v5 = vpop.f32.mrf.mxu0  ;;  %v7517_v36 = vpop.f32.mrf.mxu1  ;;  %v5952_v31 = vadd.f32 %v10772_v22, %v5913_v51  ;;  %v5957_v58 = vadd.f32 %v10772_v22, %v5918_v21  ;;  %v5916_v52 = vmul.f32 %v10764_v57, %v5818_v12 }
 0x41b   : > { %6017 = vst [vmem:[%s10797_s29 + $0x50] sm:$0xff] %v5985_v37  ;;  %v5983_v10 = vadd.f32 %v5951_v15, %v5648_v28  ;;  %v5651_v59 = vadd.f32 %v10783_v40, %v5612_v53  ;;  %v5610_v11 = vmul.f32 %v10777_v1, %v5503_v3  ;;  %v5524_v13 = vadd.f32 %v7517_v36, %v10700_v24 }
 0x41c   : > { %v5821_v17 = vpop.f32.mrf.mxu0  ;;  %v5515_v19 = vpop.f32.mrf.mxu1  ;;  %v5919_v24 = vmul.f32 %v7566_v5, %v10764_v57  ;;  %v5955_v12 = vadd.f32 %v10772_v22, %v5916_v52 }
 0x41d   : > { %6015 = vst [vmem:[%s10797_s29 + $0x40] sm:$0xff] %v5983_v10  ;;  %v5986_v25 = vadd.f32 %v5954_v50, %v5651_v59  ;;  %v5649_v42 = vadd.f32 %v10783_v40, %v5610_v11  ;;  %v5615_v49 = vmul.f32 %v10777_v1, %v5524_v13  ;;  %v5516_v33 = vadd.f32 %v5515_v19, %v10694_v35 }
 0x41e   : > { %v7569_v41 = vpop.f32.mrf.mxu0  ;;  %v7518_v4 = vpop.f32.mrf.mxu1  ;;  %v5917_v15 = vmul.f32 %v10764_v57, %v5821_v17 }
 0x41f   : > { %6018 = vst [vmem:[%s10797_s29 + $0x58] sm:$0xff] %v5986_v25  ;;  %v5984_v30 = vadd.f32 %v5952_v31, %v5649_v42  ;;  %v5654_v20 = vadd.f32 %v10783_v40, %v5615_v49  ;;  %v5613_v38 = vmul.f32 %v10777_v1, %v5516_v33  ;;  %v5527_v47 = vadd.f32 %v7518_v4, %v10703_v16 }
 0x420   : > { %v5834_v27 = vpop.f32.mrf.mxu0  ;;  %v5518_v51 = vpop.f32.mrf.mxu1  ;;  %v5922_v35 = vmul.f32 %v7569_v41, %v10764_v57  ;;  %v5958_v16 = vadd.f32 %v10772_v22, %v5919_v24  ;;  %v5956_v11 = vadd.f32 %v10772_v22, %v5917_v15 }
 0x421   : > { %6016 = vst [vmem:[%s10797_s29 + $0x48] sm:$0xff] %v5984_v30  ;;  %v5989_v2 = vadd.f32 %v5957_v58, %v5654_v20  ;;  %v5652_v21 = vadd.f32 %v10783_v40, %v5613_v38  ;;  %v5616_v37 = vmul.f32 %v10777_v1, %v5527_v47  ;;  %v5519_v28 = vadd.f32 %v5518_v51, %v10697_v0 }
 0x422   : > { %v7570_v53 = vpop.f32.mrf.mxu0  ;;  %v7521_v3 = vpop.f32.mrf.mxu1  ;;  %v5961_v13 = vadd.f32 %v10772_v22, %v5922_v35  ;;  %v5920_v0 = vmul.f32 %v10764_v57, %v5834_v27 }
 0x423   : > { %6021 = vst [vmem:[%s10797_s29 + $0x70] sm:$0xff] %v5989_v2  ;;  %v5987_v5 = vadd.f32 %v5955_v12, %v5652_v21  ;;  %v5655_v50 = vadd.f32 %v10783_v40, %v5616_v37  ;;  %v5614_v36 = vmul.f32 %v10777_v1, %v5519_v28  ;;  %v5540_v10 = vadd.f32 %v7521_v3, %v10712_v8 }
 0x424   : > { %v5837_v59 = vpop.f32.mrf.mxu0  ;;  %v5531_v17 = vpop.f32.mrf.mxu1  ;;  %v5923_v8 = vmul.f32 %v7570_v53, %v10764_v57  ;;  %v5959_v30 = vadd.f32 %v10772_v22, %v5920_v0 }
 0x425   : > { %6019 = vst [vmem:[%s10797_s29 + $0x60] sm:$0xff] %v5987_v5  ;;  %v5990_v31 = vadd.f32 %v5958_v16, %v5655_v50  ;;  %v5653_v58 = vadd.f32 %v10783_v40, %v5614_v36  ;;  %v5619_v52 = vmul.f32 %v10777_v1, %v5540_v10  ;;  %v5532_v19 = vadd.f32 %v5531_v17, %v10706_v56 }
 0x426   : > { %v7573_v25 = vpop.f32.mrf.mxu0  ;;  %v7522_v42 = vpop.f32.mrf.mxu1  ;;  %v5921_v20 = vmul.f32 %v10764_v57, %v5837_v59 }
 0x427   : > { %6022 = vst [vmem:[%s10797_s29 + $0x78] sm:$0xff] %v5990_v31  ;;  %v5988_v49 = vadd.f32 %v5956_v11, %v5653_v58  ;;  %v5658_v33 = vadd.f32 %v10783_v40, %v5619_v52  ;;  %v5617_v41 = vmul.f32 %v10777_v1, %v5532_v19  ;;  %v5543_v24 = vadd.f32 %v7522_v42, %v10715_v26 }
 0x428   : > { %v5850_v4 = vpop.f32.mrf.mxu0  ;;  %v5534_v38 = vpop.f32.mrf.mxu1  ;;  %v5926_v56 = vmul.f32 %v7573_v25, %v10764_v57  ;;  %v5962_v26 = vadd.f32 %v10772_v22, %v5923_v8  ;;  %v5960_v16 = vadd.f32 %v10772_v22, %v5921_v20 }
 0x429   : > { %6020 = vst [vmem:[%s10797_s29 + $0x68] sm:$0xff] %v5988_v49  ;;  %v5993_v47 = vadd.f32 %v5961_v13, %v5658_v33  ;;  %v5656_v27 = vadd.f32 %v10783_v40, %v5617_v41  ;;  %v5620_v12 = vmul.f32 %v10777_v1, %v5543_v24  ;;  %v5535_v15 = vadd.f32 %v5534_v38, %v10709_v44 }
 0x42a   : > { %v7574_v51 = vpop.f32.mrf.mxu0  ;;  %v7525_v35 = vpop.f32.mrf.mxu1  ;;  %v5965_v3 = vadd.f32 %v10772_v22, %v5926_v56  ;;  %v5924_v44 = vmul.f32 %v10764_v57, %v5850_v4 }
 0x42b   : > { %6025 = vst [vmem:[%s10797_s29 + $0x90] sm:$0xff] %v5993_v47  ;;  %v5991_v2 = vadd.f32 %v5959_v30, %v5656_v27  ;;  %v5659_v21 = vadd.f32 %v10783_v40, %v5620_v12  ;;  %v5618_v37 = vmul.f32 %v10777_v1, %v5535_v15  ;;  %v5556_v28 = vadd.f32 %v7525_v35, %v10724_v54 }
 0x42c   : > { %v5853_v53 = vpop.f32.mrf.mxu0  ;;  %v5547_v5 = vpop.f32.mrf.mxu1  ;;  %v7275_v54 = vadd.f32 %v10755_v63, %v10750_v45  ;;  %v5927_v13 = vmul.f32 %v7574_v51, %v10764_v57  ;;  %v5963_v25 = vadd.f32 %v10772_v22, %v5924_v44  ;;  %v7278_v27 = vadd.f32 %v10766_v39, %v10759_v34 }
 0x42d   : > { %6023 = vst [vmem:[%s10797_s29 + $0x80] sm:$0xff] %v5991_v2  ;;  %v5994_v50 = vadd.f32 %v5962_v26, %v5659_v21  ;;  %v5657_v36 = vadd.f32 %v10783_v40, %v5618_v37  ;;  %v5623_v10 = vmul.f32 %v10777_v1, %v5556_v28  ;;  %v5548_v59 = vadd.f32 %v5547_v5, %v10718_v9 }
 0x42e   : > { %v7577_v11 = vpop.f32.mrf.mxu0  ;;  %v7526_v0 = vpop.f32.mrf.mxu1  ;;  %v5925_v9 = vmul.f32 %v10764_v57, %v5853_v53  ;;  %v5266_v24 = vadd.f32 %v7275_v54, %v10653_v55  ;;  %v5966_v4 = vadd.f32 %v10772_v22, %v5927_v13 }
 0x42f   : > { %6026 = vst [vmem:[%s10797_s29 + $0x98] sm:$0xff] %v5994_v50  ;;  %v5992_v17 = vadd.f32 %v5960_v16, %v5657_v36  ;;  %v5662_v31 = vadd.f32 %v10783_v40, %v5623_v10  ;;  %v5621_v58 = vmul.f32 %v10777_v1, %v5548_v59  ;;  %v5559_v52 = vadd.f32 %v7526_v0, %v10727_v6 }
 0x430   : > { %v5866_v19 = vpop.f32.mrf.mxu0  ;;  %v5550_v8 = vpop.f32.mrf.mxu1  ;;  %v5930_v45 = vmul.f32 %v7577_v11, %v10764_v57  ;;  %v7387_v6 = vadd.f32 %v10744_v61, %v10739_v23  ;;  %v5964_v23 = vadd.f32 %v10772_v22, %v5925_v9 }
 0x431   : > { %6024 = vst [vmem:[%s10797_s29 + $0x88] sm:$0xff] %v5992_v17  ;;  %v5997_v63 = vadd.f32 %v5965_v3, %v5662_v31  ;;  %v5660_v42 = vadd.f32 %v10783_v40, %v5621_v58  ;;  %v5624_v49 = vmul.f32 %v10777_v1, %v5559_v52  ;;  %v5551_v33 = vadd.f32 %v5550_v8, %v10721_v14 }
 0x432   : > { %v7578_v41 = vpop.f32.mrf.mxu0  ;;  %v7529_v30 = vpop.f32.mrf.mxu1  ;;  %v5969_v55 = vadd.f32 %v10772_v22, %v5930_v45  ;;  %v5928_v61 = vmul.f32 %v10764_v57, %v5866_v19  ;;  %v5427_v39 = vadd.f32 %v7387_v6, %v5266_v24  ;;  %v5269_v3 = vadd.f32 %v7278_v27, %v10655_v29 }
 0x433   : > { %6029 = vst [vmem:[%s10797_s29 + $0xb0] sm:$0xff] %v5997_v63  ;;  %v5995_v20 = vadd.f32 %v5963_v25, %v5660_v42  ;;  %v5663_v38 = vadd.f32 %v10783_v40, %v5624_v49  ;;  %v5622_v56 = vmul.f32 %v10777_v1, %v5551_v33  ;;  %v5572_v47 = vadd.f32 %v7529_v30, %v10736_v7 }
 0x434   : > { %v5869_v14 = vpop.f32.mrf.mxu0  ;;  %v5563_v12 = vpop.f32.mrf.mxu1  ;;  %v5931_v2 = vmul.f32 %v7578_v41, %v10764_v57  ;;  %v7390_v29 = vadd.f32 %v10753_v32, %v10746_v43 }
 0x435   : > { %6027 = vst [vmem:[%s10797_s29 + $0xa0] sm:$0xff] %v5995_v20  ;;  %v5998_v15 = vadd.f32 %v5966_v4, %v5663_v38  ;;  %v5661_v51 = vadd.f32 %v10783_v40, %v5622_v56  ;;  %v5627_v26 = vmul.f32 %v10777_v1, %v5572_v47  ;;  %v5564_v7 = vadd.f32 %v5563_v12, %v10730_v48 }
 0x436   : > { %v7581_v35 = vpop.f32.mrf.mxu0  ;;  %v7530_v34 = vpop.f32.mrf.mxu1  ;;  %v5967_v48 = vadd.f32 %v10772_v22, %v5928_v61  ;;  %v5929_v44 = vmul.f32 %v10764_v57, %v5869_v14  ;;  %v5970_v54 = vadd.f32 %v10772_v22, %v5931_v2  ;;  %v5430_v9 = vadd.f32 %v7390_v29, %v5269_v3 }
 0x437   : > { %6030 = vst [vmem:[%s10797_s29 + $0xb8] sm:$0xff] %v5998_v15  ;;  %v5996_v21 = vadd.f32 %v5964_v23, %v5661_v51  ;;  %v5666_v37 = vadd.f32 %v10783_v40, %v5627_v26  ;;  %v5625_v28 = vmul.f32 %v10777_v1, %v5564_v7  ;;  %v5575_v53 = vadd.f32 %v7530_v34, %v10741_v18 }
 0x438   : > { %v5882_v16 = vpop.f32.mrf.mxu0  ;;  %v5566_v5 = vpop.f32.mrf.mxu1  ;;  %v5934_v50 = vmul.f32 %v7581_v35, %v10764_v57  ;;  %v5968_v52 = vadd.f32 %v10772_v22, %v5929_v44 }
 0x439   : > { %6028 = vst [vmem:[%s10797_s29 + $0xa8] sm:$0xff] %v5996_v21  ;;  %v6001_v36 = vadd.f32 %v5969_v55, %v5666_v37  ;;  %v5664_v10 = vadd.f32 %v10783_v40, %v5625_v28  ;;  %v5628_v59 = vmul.f32 %v10777_v1, %v5575_v53  ;;  %v5567_v18 = vadd.f32 %v5566_v5, %v10733_v46 }
 0x43a   : > { %v7582_v11 = vpop.f32.mrf.mxu0  ;;  %v7533_v13 = vpop.f32.mrf.mxu1  ;;  %v5973_v19 = vadd.f32 %v10772_v22, %v5934_v50  ;;  %v5932_v46 = vmul.f32 %v10764_v57, %v5882_v16 }
 0x43b   : > { %6033 = vst [vmem:[%s10797_s29 + $0xd0] sm:$0xff] %v6001_v36  ;;  %v5999_v0 = vadd.f32 %v5967_v48, %v5664_v10  ;;  %v5667_v17 = vadd.f32 %v10783_v40, %v5628_v59  ;;  %v5626_v31 = vmul.f32 %v10777_v1, %v5567_v18  ;;  %v5588_v58 = vadd.f32 %v7533_v13, %v5427_v39 }
 0x43c   : > { %v5579_v25 = vpop.f32.mrf.mxu1  ;;  %v5885_v63 = vpop.f32.mrf.mxu0  ;;  %v5935_v42 = vmul.f32 %v7582_v11, %v10764_v57  ;;  %v5971_v4 = vadd.f32 %v10772_v22, %v5932_v46 }
 0x43d   : > { %6031 = vst [vmem:[%s10797_s29 + $0xc0] sm:$0xff] %v5999_v0  ;;  %v6002_v43 = vadd.f32 %v5970_v54, %v5667_v17  ;;  %v5665_v32 = vadd.f32 %v10783_v40, %v5626_v31  ;;  %v5631_v8 = vmul.f32 %v10777_v1, %v5588_v58  ;;  %v5580_v45 = vadd.f32 %v5579_v25, %v10748_v62 }
 0x43e   : > { %v7534_v49 = vpop.f32.mrf.mxu1  ;;  %v5933_v30 = vmul.f32 %v10764_v57, %v5885_v63  ;;  %v5974_v27 = vadd.f32 %v10772_v22, %v5935_v42 }
 0x43f   : > { %6034 = vst [vmem:[%s10797_s29 + $0xd8] sm:$0xff] %v6002_v43  ;;  %v6000_v33 = vadd.f32 %v5968_v52, %v5665_v32  ;;  %v5670_v41 = vadd.f32 %v10783_v40, %v5631_v8  ;;  %v5629_v6 = vmul.f32 %v10777_v1, %v5580_v45  ;;  %v5591_v24 = vadd.f32 %v7534_v49, %v5430_v9 }
 0x440   : > { %v5582_v20 = vpop.f32.mrf.mxu1  ;;  %v5972_v61 = vadd.f32 %v10772_v22, %v5933_v30 }
 0x441   : > { %6032 = vst [vmem:[%s10797_s29 + $0xc8] sm:$0xff] %v6000_v33  ;;  %v6005_v62 = vadd.f32 %v5973_v19, %v5670_v41  ;;  %v5668_v38 = vadd.f32 %v10783_v40, %v5629_v6  ;;  %v5632_v56 = vmul.f32 %v10777_v1, %v5591_v24  ;;  %v5583_v47 = vadd.f32 %v5582_v20, %v10757_v60 }
 0x443   : > { %6037 = vst [vmem:[%s10797_s29 + $0xf0] sm:$0xff] %v6005_v62  ;;  %v6003_v14 = vadd.f32 %v5971_v4, %v5668_v38  ;;  %v5671_v23 = vadd.f32 %v10783_v40, %v5632_v56  ;;  %v5630_v55 = vmul.f32 %v10777_v1, %v5583_v47 }
 0x445   : > { %6035 = vst [vmem:[%s10797_s29 + $0xe0] sm:$0xff] %v6003_v14  ;;  %v6006_v57 = vadd.f32 %v5974_v27, %v5671_v23  ;;  %v5669_v12 = vadd.f32 %v10783_v40, %v5630_v55 }
 0x447   : > { %6038 = vst [vmem:[%s10797_s29 + $0xf8] sm:$0xff] %v6006_v57  ;;  %v6004_v15 = vadd.f32 %v5972_v61, %v5669_v12 }
 0x449   : > { %6036 = vst [vmem:[%s10797_s29 + $0xe8] sm:$0xff] %v6004_v15 }
 0x44a PF: > { %s20_s13 = sadd.s32 1, %s7818_s13  }
 0x44b   : > { %p17_p4 = scmp.ge.s32.totalorder %s20_s13, 4  }
 0x44d   :  { %19 = sbr.rel (!%p17_p4) target bundleno = 1 (0x1), region = 91 }

</bundles_post_ra>
